<compile_context>
chip_gen: v6e
topology: v6e:2x2x1
jax: 0.10.0
libtpu: 0.0.40
codegen_flags: <defaults>
</compile_context>

<pallas_src>
import functools

import jax
import jax.numpy as jnp
from jax.experimental import pallas as pl
from jax.experimental.pallas import tpu as pltpu

NEG_SLOPE = 0.01   # nn.LeakyReLU default negative_slope in BasicConv
BN_EPS = 1e-5      # nn.BatchNorm3d default eps


# ----------------------------------------------------------------------------
# Pallas kernels (lane-dense, transposed GEMM layout: out[Cout, M])
# ----------------------------------------------------------------------------
def _leaky(y):
    # identical to where(y>0, y, slope*y) for 0 < slope < 1
    return jnp.maximum(y, NEG_SLOPE * y)


def _gemm_bias_act_kernel(w_ref, p_ref, b_ref, o_ref, *, relu):
    """out = act(W @ P + bias).  BN scale is pre-folded into W.  bf16 MXU
    operands, f32 accumulate + f32 epilogue."""
    acc = jnp.dot(w_ref[...], p_ref[...], preferred_element_type=jnp.float32)
    y = acc + b_ref[...]
    if relu:
        y = _leaky(y)
    o_ref[...] = y.astype(o_ref.dtype)


def _gemm_tail_kernel(w_ref, p_ref, b_ref, w2_ref, r_ref, o_ref):
    """(1,3,3) conv + BN + LeakyReLU fused with the CouplingBlock's bias-free
    1x1x1 conv and residual add: out = W2 @ act(W @ P + b) + residual."""
    acc = jnp.dot(w_ref[...], p_ref[...], preferred_element_type=jnp.float32)
    y = _leaky(acc + b_ref[...])
    out = jnp.dot(w2_ref[...], y.astype(jnp.bfloat16),
                  preferred_element_type=jnp.float32)
    o_ref[...] = (out + r_ref[...].astype(jnp.float32)).astype(o_ref.dtype)


def _concat_1x1_kernel(wa_ref, a_ref, wb_ref, c_ref, b_ref, o_ref):
    """torch.cat((a, c), dim=channels) followed by a 1x1x1 BasicConv, fused as
    a split-weight double dot: out = act(Wa @ a + Wb @ c + bias)."""
    acc = jnp.dot(wa_ref[...], a_ref[...], preferred_element_type=jnp.float32)
    acc = acc + jnp.dot(wb_ref[...], c_ref[...], preferred_element_type=jnp.float32)
    o_ref[...] = _leaky(acc + b_ref[...]).astype(o_ref.dtype)


def _pick_tm(m):
    """Lane-tile for the M (lane) axis.  Small M (<=256) -> single full block
    (splitting only adds sequential grid steps); large M -> big 128-multiple
    tiles so both v7x TensorCores get work and DMAs stay efficient."""
    if m % 128 != 0 or m <= 256:
        return m
    for t in (2048, 1024, 512, 256):
        if m % t == 0 and m // t >= 2:
            return t
    return m


def matmul_T(w_T, patches_T, bias, relu, out_dtype=jnp.bfloat16):
    cout, k = w_T.shape
    m = patches_T.shape[1]
    tm = _pick_tm(m)
    kernel = functools.partial(_gemm_bias_act_kernel, relu=relu)
    return pl.pallas_call(
        kernel,
        out_shape=jax.ShapeDtypeStruct((cout, m), out_dtype),
        grid=(m // tm,),
        in_specs=[
            pl.BlockSpec((cout, k), lambda i: (0, 0)),   # weights (BN folded): resident
            pl.BlockSpec((k, tm), lambda i: (0, i)),     # patches: lane-tiled
            pl.BlockSpec((cout, 1), lambda i: (0, 0)),   # folded-BN bias
        ],
        out_specs=pl.BlockSpec((cout, tm), lambda i: (0, i)),   # lane-dense store
        compiler_params=pltpu.CompilerParams(dimension_semantics=("parallel",)),
    )(w_T, patches_T, bias)


def matmul_T_tail(w_T, patches_T, bias, w2, res_T, out_dtype=jnp.bfloat16):
    cout, k = w_T.shape
    cv = w2.shape[0]
    m = patches_T.shape[1]
    tm = _pick_tm(m)
    return pl.pallas_call(
        _gemm_tail_kernel,
        out_shape=jax.ShapeDtypeStruct((cv, m), out_dtype),
        grid=(m // tm,),
        in_specs=[
            pl.BlockSpec((cout, k), lambda i: (0, 0)),
            pl.BlockSpec((k, tm), lambda i: (0, i)),
            pl.BlockSpec((cout, 1), lambda i: (0, 0)),
            pl.BlockSpec((cv, cout), lambda i: (0, 0)),  # 1x1x1 conv weight (bf16)
            pl.BlockSpec((cv, tm), lambda i: (0, i)),    # residual (lane-tiled)
        ],
        out_specs=pl.BlockSpec((cv, tm), lambda i: (0, i)),
        compiler_params=pltpu.CompilerParams(dimension_semantics=("parallel",)),
    )(w_T, patches_T, bias, w2, res_T)


def concat_1x1(wa, a_T, wb, c_T, bias, out_dtype=jnp.bfloat16):
    cout, ka = wa.shape
    kb = wb.shape[1]
    m = a_T.shape[1]
    tm = _pick_tm(m)
    return pl.pallas_call(
        _concat_1x1_kernel,
        out_shape=jax.ShapeDtypeStruct((cout, m), out_dtype),
        grid=(m // tm,),
        in_specs=[
            pl.BlockSpec((cout, ka), lambda i: (0, 0)),
            pl.BlockSpec((ka, tm), lambda i: (0, i)),
            pl.BlockSpec((cout, kb), lambda i: (0, 0)),
            pl.BlockSpec((kb, tm), lambda i: (0, i)),
            pl.BlockSpec((cout, 1), lambda i: (0, 0)),
        ],
        out_specs=pl.BlockSpec((cout, tm), lambda i: (0, i)),
        compiler_params=pltpu.CompilerParams(dimension_semantics=("parallel",)),
    )(wa, a_T, wb, c_T, bias)


# ----------------------------------------------------------------------------
# Plain-JAX glue: channel-major im2col (bf16 end to end)
# ----------------------------------------------------------------------------
def _triple(v):
    return (v, v, v) if isinstance(v, int) else tuple(v)


def _im2col_T(xp, ksize, stride, out_spatial):
    # xp: padded activation (bf16), channel-major [Cin, B, Dp, Hp, Wp]
    kd, kh, kw = ksize
    do, ho, wo = out_spatial
    sd, sh, sw = stride
    cin = xp.shape[0]
    m = xp.shape[1] * do * ho * wo
    cols = []
    for a in range(kd):
        for c in range(kh):
            for e in range(kw):
                sl = xp[:, :, a:a + sd * (do - 1) + 1:sd,
                              c:c + sh * (ho - 1) + 1:sh,
                              e:e + sw * (wo - 1) + 1:sw]
                cols.append(sl.reshape(cin, m))
    return jnp.concatenate(cols, axis=0)   # [taps*Cin, M]  (tap-major, cin-minor)


def conv3d(x, p, k, stride, padding, relu=True, tail_w=None, residual=None,
           out_dtype=jnp.bfloat16):
    """x: channel-major [Cin, B, D, H, W].  p['w']: GEMM-ready [Cout, K] bf16
    with folded-BN scale already baked in."""
    kd, kh, kw = _triple(k)
    sd, sh, sw = _triple(stride)
    pd, ph, pw = _triple(padding)
    cin, b, d, h, w = x.shape
    do = (d + 2 * pd - kd) // sd + 1
    ho = (h + 2 * ph - kh) // sh + 1
    wo = (w + 2 * pw - kw) // sw + 1
    if x.dtype != jnp.bfloat16:
        x = x.astype(jnp.bfloat16)          # cast once, before pad/im2col
    xp = jnp.pad(x, ((0, 0), (0, 0), (pd, pd), (ph, ph), (pw, pw)))
    patches = _im2col_T(xp, (kd, kh, kw), (sd, sh, sw), (do, ho, wo))
    if tail_w is None:
        out = matmul_T(p["w"], patches, p["bias"], relu, out_dtype)
        cout = p["w"].shape[0]
    else:
        out = matmul_T_tail(p["w"], patches, p["bias"], tail_w, residual, out_dtype)
        cout = tail_w.shape[0]
    return out.reshape(cout, b, do, ho, wo)


def deconv3d(x, p, relu=True, out_dtype=jnp.bfloat16):
    """ConvTranspose3d k=4, s=2, p=1 via 8-output-phase decomposition folded
    into a single block-diagonal GEMM (no zero-upsampling)."""
    cin, b, d, h, w = x.shape
    cout = p["w"].shape[0] // 8
    if x.dtype != jnp.bfloat16:
        x = x.astype(jnp.bfloat16)
    xp = jnp.pad(x, ((0, 0), (0, 0), (1, 1), (1, 1), (1, 1)))
    patches = _im2col_T(xp, (3, 3, 3), (1, 1, 1), (d, h, w))
    out = matmul_T(p["w"], patches, p["bias"], relu, out_dtype)  # [8*Cout, B*D*H*W]
    out = out.reshape(2, 2, 2, cout, b, d, h, w)
    # interleave phases: y[:, :, 2q+rd, 2r+rh, 2s+rw] = phase[rd,rh,rw][..., q, r, s]
    out = jnp.transpose(out, (3, 4, 5, 0, 6, 1, 7, 2))
    return out.reshape(cout, b, 2 * d, 2 * h, 2 * w)


# ----------------------------------------------------------------------------
# Parameter init (PyTorch-style init, converted to GEMM-ready matrices)
# ----------------------------------------------------------------------------
# For an output phase r (per dim), which of the 3 stride-1 taps over the
# once-padded input is used, and which kernel index it carries (-1 = unused):
#   even phase (r=0): y[2q]   = x[q-1]*w[3] + x[q]*w[1]
#   odd  phase (r=1): y[2q+1] = x[q]  *w[2] + x[q+1]*w[0]
_DECONV_SEL = ((3, 1, -1), (-1, 2, 0))


def _deconv_blockdiag_weight(w):
    # w: PyTorch ConvTranspose3d layout [Cin, Cout, 4, 4, 4]
    cin, cout = w.shape[0], w.shape[1]
    zero = jnp.zeros((cout, cin), w.dtype)
    rows = []
    for rd in (0, 1):
        for rh in (0, 1):
            for rw in (0, 1):
                taps = []
                for a in range(3):
                    for c in range(3):
                        for e in range(3):
                            kd, kh, kw = _DECONV_SEL[rd][a], _DECONV_SEL[rh][c], _DECONV_SEL[rw][e]
                            if kd < 0 or kh < 0 or kw < 0:
                                taps.append(zero)
                            else:
                                taps.append(w[:, :, kd, kh, kw].T)   # [Cout, Cin]
                rows.append(jnp.concatenate(taps, axis=1))           # [Cout, 27*Cin]
    return jnp.concatenate(rows, axis=0)                             # [8*Cout, 27*Cin]


def init_params(key, c):
    keys = list(jax.random.split(key, 48))
    it = iter(keys)

    def conv_w_native(cin, cout, k):
        kd, kh, kw = _triple(k)
        n = kd * kh * kw * cout
        return jax.random.normal(next(it), (cout, cin, kd, kh, kw), jnp.float32) * jnp.sqrt(2.0 / n)

    def bn_fold(ch):
        gamma = jnp.ones((ch,), jnp.float32)          # weight_init(): BN weight=1, bias=0
        beta = jnp.zeros((ch,), jnp.float32)
        mean = jnp.zeros((ch,), jnp.float32)          # eval-mode running stats
        var = jnp.ones((ch,), jnp.float32)
        scale = gamma / jnp.sqrt(var + BN_EPS)
        bias = beta - mean * scale
        return scale.reshape(ch, 1), bias.reshape(ch, 1)

    def basic(cin, cout, k):
        kd, kh, kw = _triple(k)
        w = conv_w_native(cin, cout, (kd, kh, kw))
        w_T = jnp.transpose(w, (0, 2, 3, 4, 1)).reshape(cout, kd * kh * kw * cin)
        scale, bias = bn_fold(cout)
        return {"w": (w_T * scale).astype(jnp.bfloat16),   # BN scale folded into rows
                "bias": bias}

    def conv1x1(cv):
        w = conv_w_native(cv, cv, 1)
        return w[:, :, 0, 0, 0].astype(jnp.bfloat16)       # [Cout, Cin] bf16 (MXU path)

    def deconv(cin, cout, bn=True):
        n = 4 * 4 * 4 * cout
        w = jax.random.normal(next(it), (cin, cout, 4, 4, 4), jnp.float32) * jnp.sqrt(2.0 / n)
        w_big = _deconv_blockdiag_weight(w)
        if bn:
            scale, bias = bn_fold(cout)
        else:
            scale = jnp.ones((cout, 1), jnp.float32)
            bias = jnp.zeros((cout, 1), jnp.float32)
        w_big = w_big * jnp.tile(scale, (8, 1))             # fold per-phase BN scale
        return {"w": w_big.astype(jnp.bfloat16), "bias": jnp.tile(bias, (8, 1))}

    def agg_head(cin_a, cin_b, cout):
        # 1x1x1 BasicConv over channel-concat(cin_a, cin_b); stored split for
        # the fused concat+1x1 kernel.
        full = basic(cin_a + cin_b, cout, 1)
        return {"wa": full["w"][:, :cin_a], "wb": full["w"][:, cin_a:],
                "bias": full["bias"]}

    def coupling(cv):
        return {
            "b1_0": basic(cv, cv, (1, 3, 3)),
            "b1_1": conv1x1(cv),
            "b2_0": basic(cv, cv, (1, 3, 3)),
            "b2_1": basic(cv, cv, (1, 3, 3)),
            "b2_2": conv1x1(cv),
        }

    p = {}
    p["conv1"] = [basic(c, 2 * c, 3), basic(2 * c, 2 * c, 3)]
    p["conv2"] = [basic(2 * c, 4 * c, 3), basic(4 * c, 4 * c, 3)]
    p["conv3"] = [basic(4 * c, 6 * c, 3), basic(6 * c, 6 * c, 3)]
    p["conv3_up"] = deconv(6 * c, 4 * c, bn=True)
    p["conv2_up"] = deconv(4 * c, 2 * c, bn=True)
    p["conv1_up"] = deconv(2 * c, 1, bn=False)
    p["agg_0"] = [agg_head(4 * c, 4 * c, 4 * c), basic(4 * c, 4 * c, 3), basic(4 * c, 4 * c, 3)]
    p["agg_1"] = [agg_head(2 * c, 2 * c, 2 * c), basic(2 * c, 2 * c, 3), basic(2 * c, 2 * c, 3)]
    p["coupling3"] = coupling(6 * c)
    p["coupling2"] = coupling(4 * c)
    p["coupling1"] = coupling(2 * c)
    return p


# ----------------------------------------------------------------------------
# Forward (activations are channel-major bf16 [C, B, D, H, W] internally)
# ----------------------------------------------------------------------------
def basic_conv(x, p, k, stride, padding):
    return conv3d(x, p, k, stride, padding, relu=True)


def coupling_block(p, upper, lower):
    cv = lower.shape[0]
    upper_flat = upper.reshape(cv, -1)
    lower_flat = lower.reshape(cv, -1)
    # branch_1: BasicConv(1,3,3) + 1x1x1 conv + (+ upper), fully fused in one kernel
    f2 = conv3d(lower, p["b1_0"], (1, 3, 3), 1, (0, 1, 1),
                tail_w=p["b1_1"], residual=upper_flat)
    # branch_2: BasicConv, BasicConv + 1x1x1 conv + (+ lower) fused
    g = conv3d(f2, p["b2_0"], (1, 3, 3), 1, (0, 1, 1))
    return conv3d(g, p["b2_1"], (1, 3, 3), 1, (0, 1, 1),
                  tail_w=p["b2_2"], residual=lower_flat)


def hourglass2_forward(p, c3_upper, c2_upper, c1_upper, x):
    # public interface is NDHWC; convert once to channel-major and back at the end
    to_cm = lambda t: jnp.transpose(t, (4, 0, 1, 2, 3))
    x = to_cm(x)
    c1u, c2u, c3u = to_cm(c1_upper), to_cm(c2_upper), to_cm(c3_upper)

    conv1 = basic_conv(x, p["conv1"][0], 3, 2, 1)
    conv1 = basic_conv(conv1, p["conv1"][1], 3, 1, 1)
    conv2 = basic_conv(conv1, p["conv2"][0], 3, 2, 1)
    conv2 = basic_conv(conv2, p["conv2"][1], 3, 1, 1)
    conv3 = basic_conv(conv2, p["conv3"][0], 3, 2, 1)
    conv3 = basic_conv(conv3, p["conv3"][1], 3, 1, 1)

    conv3 = coupling_block(p["coupling3"], c3u, conv3)
    conv3_up = deconv3d(conv3, p["conv3_up"], relu=True)

    # torch.cat((conv3_up, conv2), dim=1) + agg_0[0] 1x1x1 BasicConv, one kernel
    h0 = p["agg_0"][0]
    conv2 = concat_1x1(h0["wa"], conv3_up.reshape(conv3_up.shape[0], -1),
                       h0["wb"], conv2.reshape(conv2.shape[0], -1),
                       h0["bias"]).reshape(conv3_up.shape)
    conv2 = basic_conv(conv2, p["agg_0"][1], 3, 1, 1)
    conv2 = basic_conv(conv2, p["agg_0"][2], 3, 1, 1)
    conv2 = coupling_block(p["coupling2"], c2u, conv2)
    conv2_up = deconv3d(conv2, p["conv2_up"], relu=True)

    # torch.cat((conv2_up, conv1), dim=1) + agg_1[0] 1x1x1 BasicConv, one kernel
    h1 = p["agg_1"][0]
    conv1 = concat_1x1(h1["wa"], conv2_up.reshape(conv2_up.shape[0], -1),
                       h1["wb"], conv1.reshape(conv1.shape[0], -1),
                       h1["bias"]).reshape(conv2_up.shape)
    conv1 = basic_conv(conv1, p["agg_1"][1], 3, 1, 1)
    conv1 = basic_conv(conv1, p["agg_1"][2], 3, 1, 1)
    conv1 = coupling_block(p["coupling1"], c1u, conv1)

    out = deconv3d(conv1, p["conv1_up"], relu=False, out_dtype=jnp.float32)
    return jnp.transpose(out, (1, 2, 3, 4, 0))                # back to NDHWC


if __name__ == "__main__":
    C = 4                      # hourglass_2(in_channels=4)
    B, D, H, W = 1, 8, 16, 16  # cost-volume: depth (disparity) x spatial

    key = jax.random.PRNGKey(0)
    kp, kx, k1, k2, k3 = jax.random.split(key, 5)
    params = init_params(kp, C)

    # public layout: NDHWC
    x = jax.random.normal(kx, (B, D, H, W, C), jnp.float32)
    c1_upper = jax.random.normal(k1, (B, D // 2, H // 2, W // 2, 2 * C), jnp.float32)
    c2_upper = jax.random.normal(k2, (B, D // 4, H // 4, W // 4, 4 * C), jnp.float32)
    c3_upper = jax.random.normal(k3, (B, D // 8, H // 8, W // 8, 6 * C), jnp.float32)

    fwd = jax.jit(hourglass2_forward)
    out = fwd(params, c3_upper, c2_upper, c1_upper, x)
    jax.block_until_ready(out)

    assert out.shape == (B, D, H, W, 1), out.shape
    print("KERNEL_OK")
</pallas_src>

<mosaic_0001>
module attributes {stable_mosaic.version = 11 : i64} {
  func.func @_gemm_bias_act_kernel(%arg0: i32, %arg1: memref<8x108xbf16, #tpu.memory_space<vmem>>, %arg2: memref<108x256xbf16, #tpu.memory_space<vmem>>, %arg3: memref<8x1xf32, #tpu.memory_space<vmem>>, %arg4: memref<8x256xbf16, #tpu.memory_space<vmem>>) attributes {dimension_semantics = [#tpu.dimension_semantics<parallel>], iteration_bounds = array<i64: 1>, scalar_prefetch = 0 : i64, scratch_operands = 0 : i64, tpu.core_type = #tpu.core_type<tc>, window_params = [{pipeline_mode = #tpu.pipeline_mode<synchronous>, transform_indices = @transform_0, window_bounds = array<i64: 8, 108>}, {transform_indices = @transform_1, window_bounds = array<i64: 108, 256>}, {pipeline_mode = #tpu.pipeline_mode<synchronous>, transform_indices = @transform_2, window_bounds = array<i64: 8, 1>}, {transform_indices = @transform_3, window_bounds = array<i64: 8, 256>}]} {
    %c0 = arith.constant 0 : index
    %c0_0 = arith.constant 0 : index
    %0 = vector.load %arg1[%c0, %c0_0] : memref<8x108xbf16, #tpu.memory_space<vmem>>, vector<8x108xbf16>
    %c0_1 = arith.constant 0 : index
    %c0_2 = arith.constant 0 : index
    %1 = vector.load %arg2[%c0_1, %c0_2] : memref<108x256xbf16, #tpu.memory_space<vmem>>, vector<108x256xbf16>
    %cst = arith.constant dense<0.000000e+00> : vector<8x256xf32>
    %2 = tpu.matmul %0, %1, %cst {dimension_numbers = #tpu.dot_dimension_numbers<[1], [0], [0], [1], [0, 0, 1, 1], [], []>} : vector<8x108xbf16>, vector<108x256xbf16>, vector<8x256xf32> -> vector<8x256xf32>
    %c0_3 = arith.constant 0 : index
    %c0_4 = arith.constant 0 : index
    %3 = vector.load %arg3[%c0_3, %c0_4] : memref<8x1xf32, #tpu.memory_space<vmem>>, vector<8x1xf32>
    %4 = vector.broadcast %3 : vector<8x1xf32> to vector<8x256xf32>
    %5 = arith.addf %2, %4 : vector<8x256xf32>
    %cst_5 = arith.constant 0.00999999977 : f32
    %6 = vector.broadcast %cst_5 : f32 to vector<8x256xf32>
    %7 = arith.mulf %6, %5 : vector<8x256xf32>
    %8 = arith.maximumf %5, %7 : vector<8x256xf32>
    %9 = arith.truncf %8 : vector<8x256xf32> to vector<8x256xbf16>
    %c0_6 = arith.constant 0 : index
    %c0_7 = arith.constant 0 : index
    %10 = vector.load %arg4[%c0_6, %c0_7] : memref<8x256xbf16, #tpu.memory_space<vmem>>, vector<8x256xbf16>
    tpu.vector_store %arg4[%c0_6, %c0_7], %9 {strides = array<i32>} : memref<8x256xbf16, #tpu.memory_space<vmem>>, vector<8x256xbf16>,
    return
  }
  func.func @transform_0(%arg0: i32) -> (i32, i32) {
    %c0_i32 = arith.constant 0 : i32
    %c0_i32_0 = arith.constant 0 : i32
    %c0_i32_1 = arith.constant 0 : i32
    return %c0_i32, %c0_i32_0 : i32, i32
  }
  func.func @transform_1(%arg0: i32) -> (i32, i32) {
    %c0_i32 = arith.constant 0 : i32
    %c0_i32_0 = arith.constant 0 : i32
    return %c0_i32, %arg0 : i32, i32
  }
  func.func @transform_2(%arg0: i32) -> (i32, i32) {
    %c0_i32 = arith.constant 0 : i32
    %c0_i32_0 = arith.constant 0 : i32
    %c0_i32_1 = arith.constant 0 : i32
    return %c0_i32, %c0_i32_0 : i32, i32
  }
  func.func @transform_3(%arg0: i32) -> (i32, i32) {
    %c0_i32 = arith.constant 0 : i32
    %c0_i32_0 = arith.constant 0 : i32
    return %c0_i32, %arg0 : i32, i32
  }
}

module attributes {stable_mosaic.version = 11 : i64} {
  func.func @_gemm_bias_act_kernel(%arg0: i32, %arg1: memref<8x216xbf16, #tpu.memory_space<vmem>>, %arg2: memref<216x256xbf16, #tpu.memory_space<vmem>>, %arg3: memref<8x1xf32, #tpu.memory_space<vmem>>, %arg4: memref<8x256xbf16, #tpu.memory_space<vmem>>) attributes {dimension_semantics = [#tpu.dimension_semantics<parallel>], iteration_bounds = array<i64: 1>, scalar_prefetch = 0 : i64, scratch_operands = 0 : i64, tpu.core_type = #tpu.core_type<tc>, window_params = [{pipeline_mode = #tpu.pipeline_mode<synchronous>, transform_indices = @transform_0, window_bounds = array<i64: 8, 216>}, {transform_indices = @transform_1, window_bounds = array<i64: 216, 256>}, {pipeline_mode = #tpu.pipeline_mode<synchronous>, transform_indices = @transform_2, window_bounds = array<i64: 8, 1>}, {transform_indices = @transform_3, window_bounds = array<i64: 8, 256>}]} {
    %c0 = arith.constant 0 : index
    %c0_0 = arith.constant 0 : index
    %0 = vector.load %arg1[%c0, %c0_0] : memref<8x216xbf16, #tpu.memory_space<vmem>>, vector<8x216xbf16>
    %c0_1 = arith.constant 0 : index
    %c0_2 = arith.constant 0 : index
    %1 = vector.load %arg2[%c0_1, %c0_2] : memref<216x256xbf16, #tpu.memory_space<vmem>>, vector<216x256xbf16>
    %cst = arith.constant dense<0.000000e+00> : vector<8x256xf32>
    %2 = tpu.matmul %0, %1, %cst {dimension_numbers = #tpu.dot_dimension_numbers<[1], [0], [0], [1], [0, 0, 1, 1], [], []>} : vector<8x216xbf16>, vector<216x256xbf16>, vector<8x256xf32> -> vector<8x256xf32>
    %c0_3 = arith.constant 0 : index
    %c0_4 = arith.constant 0 : index
    %3 = vector.load %arg3[%c0_3, %c0_4] : memref<8x1xf32, #tpu.memory_space<vmem>>, vector<8x1xf32>
    %4 = vector.broadcast %3 : vector<8x1xf32> to vector<8x256xf32>
    %5 = arith.addf %2, %4 : vector<8x256xf32>
    %cst_5 = arith.constant 0.00999999977 : f32
    %6 = vector.broadcast %cst_5 : f32 to vector<8x256xf32>
    %7 = arith.mulf %6, %5 : vector<8x256xf32>
    %8 = arith.maximumf %5, %7 : vector<8x256xf32>
    %9 = arith.truncf %8 : vector<8x256xf32> to vector<8x256xbf16>
    %c0_6 = arith.constant 0 : index
    %c0_7 = arith.constant 0 : index
    %10 = vector.load %arg4[%c0_6, %c0_7] : memref<8x256xbf16, #tpu.memory_space<vmem>>, vector<8x256xbf16>
    tpu.vector_store %arg4[%c0_6, %c0_7], %9 {strides = array<i32>} : memref<8x256xbf16, #tpu.memory_space<vmem>>, vector<8x256xbf16>,
    return
  }
  func.func @transform_0(%arg0: i32) -> (i32, i32) {
    %c0_i32 = arith.constant 0 : i32
    %c0_i32_0 = arith.constant 0 : i32
    %c0_i32_1 = arith.constant 0 : i32
    return %c0_i32, %c0_i32_0 : i32, i32
  }
  func.func @transform_1(%arg0: i32) -> (i32, i32) {
    %c0_i32 = arith.constant 0 : i32
    %c0_i32_0 = arith.constant 0 : i32
    return %c0_i32, %arg0 : i32, i32
  }
  func.func @transform_2(%arg0: i32) -> (i32, i32) {
    %c0_i32 = arith.constant 0 : i32
    %c0_i32_0 = arith.constant 0 : i32
    %c0_i32_1 = arith.constant 0 : i32
    return %c0_i32, %c0_i32_0 : i32, i32
  }
  func.func @transform_3(%arg0: i32) -> (i32, i32) {
    %c0_i32 = arith.constant 0 : i32
    %c0_i32_0 = arith.constant 0 : i32
    return %c0_i32, %arg0 : i32, i32
  }
}

module attributes {stable_mosaic.version = 11 : i64} {
  func.func @_gemm_bias_act_kernel(%arg0: i32, %arg1: memref<16x216xbf16, #tpu.memory_space<vmem>>, %arg2: memref<216x32xbf16, #tpu.memory_space<vmem>>, %arg3: memref<16x1xf32, #tpu.memory_space<vmem>>, %arg4: memref<16x32xbf16, #tpu.memory_space<vmem>>) attributes {dimension_semantics = [#tpu.dimension_semantics<parallel>], iteration_bounds = array<i64: 1>, scalar_prefetch = 0 : i64, scratch_operands = 0 : i64, tpu.core_type = #tpu.core_type<tc>, window_params = [{pipeline_mode = #tpu.pipeline_mode<synchronous>, transform_indices = @transform_0, window_bounds = array<i64: 16, 216>}, {transform_indices = @transform_1, window_bounds = array<i64: 216, 32>}, {pipeline_mode = #tpu.pipeline_mode<synchronous>, transform_indices = @transform_2, window_bounds = array<i64: 16, 1>}, {transform_indices = @transform_3, window_bounds = array<i64: 16, 32>}]} {
    %c0 = arith.constant 0 : index
    %c0_0 = arith.constant 0 : index
    %0 = vector.load %arg1[%c0, %c0_0] : memref<16x216xbf16, #tpu.memory_space<vmem>>, vector<16x216xbf16>
    %c0_1 = arith.constant 0 : index
    %c0_2 = arith.constant 0 : index
    %1 = vector.load %arg2[%c0_1, %c0_2] : memref<216x32xbf16, #tpu.memory_space<vmem>>, vector<216x32xbf16>
    %cst = arith.constant dense<0.000000e+00> : vector<16x32xf32>
    %2 = tpu.matmul %0, %1, %cst {dimension_numbers = #tpu.dot_dimension_numbers<[1], [0], [0], [1], [0, 0, 1, 1], [], []>} : vector<16x216xbf16>, vector<216x32xbf16>, vector<16x32xf32> -> vector<16x32xf32>
    %c0_3 = arith.constant 0 : index
    %c0_4 = arith.constant 0 : index
    %3 = vector.load %arg3[%c0_3, %c0_4] : memref<16x1xf32, #tpu.memory_space<vmem>>, vector<16x1xf32>
    %4 = vector.broadcast %3 : vector<16x1xf32> to vector<16x32xf32>
    %5 = arith.addf %2, %4 : vector<16x32xf32>
    %cst_5 = arith.constant 0.00999999977 : f32
    %6 = vector.broadcast %cst_5 : f32 to vector<16x32xf32>
    %7 = arith.mulf %6, %5 : vector<16x32xf32>
    %8 = arith.maximumf %5, %7 : vector<16x32xf32>
    %9 = arith.truncf %8 : vector<16x32xf32> to vector<16x32xbf16>
    %c0_6 = arith.constant 0 : index
    %c0_7 = arith.constant 0 : index
    %10 = vector.load %arg4[%c0_6, %c0_7] : memref<16x32xbf16, #tpu.memory_space<vmem>>, vector<16x32xbf16>
    tpu.vector_store %arg4[%c0_6, %c0_7], %9 {strides = array<i32>} : memref<16x32xbf16, #tpu.memory_space<vmem>>, vector<16x32xbf16>,
    return
  }
  func.func @transform_0(%arg0: i32) -> (i32, i32) {
    %c0_i32 = arith.constant 0 : i32
    %c0_i32_0 = arith.constant 0 : i32
    %c0_i32_1 = arith.constant 0 : i32
    return %c0_i32, %c0_i32_0 : i32, i32
  }
  func.func @transform_1(%arg0: i32) -> (i32, i32) {
    %c0_i32 = arith.constant 0 : i32
    %c0_i32_0 = arith.constant 0 : i32
    return %c0_i32, %arg0 : i32, i32
  }
  func.func @transform_2(%arg0: i32) -> (i32, i32) {
    %c0_i32 = arith.constant 0 : i32
    %c0_i32_0 = arith.constant 0 : i32
    %c0_i32_1 = arith.constant 0 : i32
    return %c0_i32, %c0_i32_0 : i32, i32
  }
  func.func @transform_3(%arg0: i32) -> (i32, i32) {
    %c0_i32 = arith.constant 0 : i32
    %c0_i32_0 = arith.constant 0 : i32
    return %c0_i32, %arg0 : i32, i32
  }
}

module attributes {stable_mosaic.version = 11 : i64} {
  func.func @_gemm_bias_act_kernel(%arg0: i32, %arg1: memref<16x432xbf16, #tpu.memory_space<vmem>>, %arg2: memref<432x32xbf16, #tpu.memory_space<vmem>>, %arg3: memref<16x1xf32, #tpu.memory_space<vmem>>, %arg4: memref<16x32xbf16, #tpu.memory_space<vmem>>) attributes {dimension_semantics = [#tpu.dimension_semantics<parallel>], iteration_bounds = array<i64: 1>, scalar_prefetch = 0 : i64, scratch_operands = 0 : i64, tpu.core_type = #tpu.core_type<tc>, window_params = [{pipeline_mode = #tpu.pipeline_mode<synchronous>, transform_indices = @transform_0, window_bounds = array<i64: 16, 432>}, {transform_indices = @transform_1, window_bounds = array<i64: 432, 32>}, {pipeline_mode = #tpu.pipeline_mode<synchronous>, transform_indices = @transform_2, window_bounds = array<i64: 16, 1>}, {transform_indices = @transform_3, window_bounds = array<i64: 16, 32>}]} {
    %c0 = arith.constant 0 : index
    %c0_0 = arith.constant 0 : index
    %0 = vector.load %arg1[%c0, %c0_0] : memref<16x432xbf16, #tpu.memory_space<vmem>>, vector<16x432xbf16>
    %c0_1 = arith.constant 0 : index
    %c0_2 = arith.constant 0 : index
    %1 = vector.load %arg2[%c0_1, %c0_2] : memref<432x32xbf16, #tpu.memory_space<vmem>>, vector<432x32xbf16>
    %cst = arith.constant dense<0.000000e+00> : vector<16x32xf32>
    %2 = tpu.matmul %0, %1, %cst {dimension_numbers = #tpu.dot_dimension_numbers<[1], [0], [0], [1], [0, 0, 1, 1], [], []>} : vector<16x432xbf16>, vector<432x32xbf16>, vector<16x32xf32> -> vector<16x32xf32>
    %c0_3 = arith.constant 0 : index
    %c0_4 = arith.constant 0 : index
    %3 = vector.load %arg3[%c0_3, %c0_4] : memref<16x1xf32, #tpu.memory_space<vmem>>, vector<16x1xf32>
    %4 = vector.broadcast %3 : vector<16x1xf32> to vector<16x32xf32>
    %5 = arith.addf %2, %4 : vector<16x32xf32>
    %cst_5 = arith.constant 0.00999999977 : f32
    %6 = vector.broadcast %cst_5 : f32 to vector<16x32xf32>
    %7 = arith.mulf %6, %5 : vector<16x32xf32>
    %8 = arith.maximumf %5, %7 : vector<16x32xf32>
    %9 = arith.truncf %8 : vector<16x32xf32> to vector<16x32xbf16>
    %c0_6 = arith.constant 0 : index
    %c0_7 = arith.constant 0 : index
    %10 = vector.load %arg4[%c0_6, %c0_7] : memref<16x32xbf16, #tpu.memory_space<vmem>>, vector<16x32xbf16>
    tpu.vector_store %arg4[%c0_6, %c0_7], %9 {strides = array<i32>} : memref<16x32xbf16, #tpu.memory_space<vmem>>, vector<16x32xbf16>,
    return
  }
  func.func @transform_0(%arg0: i32) -> (i32, i32) {
    %c0_i32 = arith.constant 0 : i32
    %c0_i32_0 = arith.constant 0 : i32
    %c0_i32_1 = arith.constant 0 : i32
    return %c0_i32, %c0_i32_0 : i32, i32
  }
  func.func @transform_1(%arg0: i32) -> (i32, i32) {
    %c0_i32 = arith.constant 0 : i32
    %c0_i32_0 = arith.constant 0 : i32
    return %c0_i32, %arg0 : i32, i32
  }
  func.func @transform_2(%arg0: i32) -> (i32, i32) {
    %c0_i32 = arith.constant 0 : i32
    %c0_i32_0 = arith.constant 0 : i32
    %c0_i32_1 = arith.constant 0 : i32
    return %c0_i32, %c0_i32_0 : i32, i32
  }
  func.func @transform_3(%arg0: i32) -> (i32, i32) {
    %c0_i32 = arith.constant 0 : i32
    %c0_i32_0 = arith.constant 0 : i32
    return %c0_i32, %arg0 : i32, i32
  }
}

module attributes {stable_mosaic.version = 11 : i64} {
  func.func @_gemm_bias_act_kernel(%arg0: i32, %arg1: memref<24x432xbf16, #tpu.memory_space<vmem>>, %arg2: memref<432x4xbf16, #tpu.memory_space<vmem>>, %arg3: memref<24x1xf32, #tpu.memory_space<vmem>>, %arg4: memref<24x4xbf16, #tpu.memory_space<vmem>>) attributes {dimension_semantics = [#tpu.dimension_semantics<parallel>], iteration_bounds = array<i64: 1>, scalar_prefetch = 0 : i64, scratch_operands = 0 : i64, tpu.core_type = #tpu.core_type<tc>, window_params = [{pipeline_mode = #tpu.pipeline_mode<synchronous>, transform_indices = @transform_0, window_bounds = array<i64: 24, 432>}, {transform_indices = @transform_1, window_bounds = array<i64: 432, 4>}, {pipeline_mode = #tpu.pipeline_mode<synchronous>, transform_indices = @transform_2, window_bounds = array<i64: 24, 1>}, {transform_indices = @transform_3, window_bounds = array<i64: 24, 4>}]} {
    %c0 = arith.constant 0 : index
    %c0_0 = arith.constant 0 : index
    %0 = vector.load %arg1[%c0, %c0_0] : memref<24x432xbf16, #tpu.memory_space<vmem>>, vector<24x432xbf16>
    %c0_1 = arith.constant 0 : index
    %c0_2 = arith.constant 0 : index
    %1 = vector.load %arg2[%c0_1, %c0_2] : memref<432x4xbf16, #tpu.memory_space<vmem>>, vector<432x4xbf16>
    %cst = arith.constant dense<0.000000e+00> : vector<24x4xf32>
    %2 = tpu.matmul %0, %1, %cst {dimension_numbers = #tpu.dot_dimension_numbers<[1], [0], [0], [1], [0, 0, 1, 1], [], []>} : vector<24x432xbf16>, vector<432x4xbf16>, vector<24x4xf32> -> vector<24x4xf32>
    %c0_3 = arith.constant 0 : index
    %c0_4 = arith.constant 0 : index
    %3 = vector.load %arg3[%c0_3, %c0_4] : memref<24x1xf32, #tpu.memory_space<vmem>>, vector<24x1xf32>
    %4 = vector.broadcast %3 : vector<24x1xf32> to vector<24x4xf32>
    %5 = arith.addf %2, %4 : vector<24x4xf32>
    %cst_5 = arith.constant 0.00999999977 : f32
    %6 = vector.broadcast %cst_5 : f32 to vector<24x4xf32>
    %7 = arith.mulf %6, %5 : vector<24x4xf32>
    %8 = arith.maximumf %5, %7 : vector<24x4xf32>
    %9 = arith.truncf %8 : vector<24x4xf32> to vector<24x4xbf16>
    %c0_6 = arith.constant 0 : index
    %c0_7 = arith.constant 0 : index
    %10 = vector.load %arg4[%c0_6, %c0_7] : memref<24x4xbf16, #tpu.memory_space<vmem>>, vector<24x4xbf16>
    tpu.vector_store %arg4[%c0_6, %c0_7], %9 {strides = array<i32>} : memref<24x4xbf16, #tpu.memory_space<vmem>>, vector<24x4xbf16>,
    return
  }
  func.func @transform_0(%arg0: i32) -> (i32, i32) {
    %c0_i32 = arith.constant 0 : i32
    %c0_i32_0 = arith.constant 0 : i32
    %c0_i32_1 = arith.constant 0 : i32
    return %c0_i32, %c0_i32_0 : i32, i32
  }
  func.func @transform_1(%arg0: i32) -> (i32, i32) {
    %c0_i32 = arith.constant 0 : i32
    %c0_i32_0 = arith.constant 0 : i32
    return %c0_i32, %arg0 : i32, i32
  }
  func.func @transform_2(%arg0: i32) -> (i32, i32) {
    %c0_i32 = arith.constant 0 : i32
    %c0_i32_0 = arith.constant 0 : i32
    %c0_i32_1 = arith.constant 0 : i32
    return %c0_i32, %c0_i32_0 : i32, i32
  }
  func.func @transform_3(%arg0: i32) -> (i32, i32) {
    %c0_i32 = arith.constant 0 : i32
    %c0_i32_0 = arith.constant 0 : i32
    return %c0_i32, %arg0 : i32, i32
  }
}

module attributes {stable_mosaic.version = 11 : i64} {
  func.func @_gemm_bias_act_kernel(%arg0: i32, %arg1: memref<24x216xbf16, #tpu.memory_space<vmem>>, %arg2: memref<216x4xbf16, #tpu.memory_space<vmem>>, %arg3: memref<24x1xf32, #tpu.memory_space<vmem>>, %arg4: memref<24x4xbf16, #tpu.memory_space<vmem>>) attributes {dimension_semantics = [#tpu.dimension_semantics<parallel>], iteration_bounds = array<i64: 1>, scalar_prefetch = 0 : i64, scratch_operands = 0 : i64, tpu.core_type = #tpu.core_type<tc>, window_params = [{pipeline_mode = #tpu.pipeline_mode<synchronous>, transform_indices = @transform_0, window_bounds = array<i64: 24, 216>}, {transform_indices = @transform_1, window_bounds = array<i64: 216, 4>}, {pipeline_mode = #tpu.pipeline_mode<synchronous>, transform_indices = @transform_2, window_bounds = array<i64: 24, 1>}, {transform_indices = @transform_3, window_bounds = array<i64: 24, 4>}]} {
    %c0 = arith.constant 0 : index
    %c0_0 = arith.constant 0 : index
    %0 = vector.load %arg1[%c0, %c0_0] : memref<24x216xbf16, #tpu.memory_space<vmem>>, vector<24x216xbf16>
    %c0_1 = arith.constant 0 : index
    %c0_2 = arith.constant 0 : index
    %1 = vector.load %arg2[%c0_1, %c0_2] : memref<216x4xbf16, #tpu.memory_space<vmem>>, vector<216x4xbf16>
    %cst = arith.constant dense<0.000000e+00> : vector<24x4xf32>
    %2 = tpu.matmul %0, %1, %cst {dimension_numbers = #tpu.dot_dimension_numbers<[1], [0], [0], [1], [0, 0, 1, 1], [], []>} : vector<24x216xbf16>, vector<216x4xbf16>, vector<24x4xf32> -> vector<24x4xf32>
    %c0_3 = arith.constant 0 : index
    %c0_4 = arith.constant 0 : index
    %3 = vector.load %arg3[%c0_3, %c0_4] : memref<24x1xf32, #tpu.memory_space<vmem>>, vector<24x1xf32>
    %4 = vector.broadcast %3 : vector<24x1xf32> to vector<24x4xf32>
    %5 = arith.addf %2, %4 : vector<24x4xf32>
    %cst_5 = arith.constant 0.00999999977 : f32
    %6 = vector.broadcast %cst_5 : f32 to vector<24x4xf32>
    %7 = arith.mulf %6, %5 : vector<24x4xf32>
    %8 = arith.maximumf %5, %7 : vector<24x4xf32>
    %9 = arith.truncf %8 : vector<24x4xf32> to vector<24x4xbf16>
    %c0_6 = arith.constant 0 : index
    %c0_7 = arith.constant 0 : index
    %10 = vector.load %arg4[%c0_6, %c0_7] : memref<24x4xbf16, #tpu.memory_space<vmem>>, vector<24x4xbf16>
    tpu.vector_store %arg4[%c0_6, %c0_7], %9 {strides = array<i32>} : memref<24x4xbf16, #tpu.memory_space<vmem>>, vector<24x4xbf16>,
    return
  }
  func.func @transform_0(%arg0: i32) -> (i32, i32) {
    %c0_i32 = arith.constant 0 : i32
    %c0_i32_0 = arith.constant 0 : i32
    %c0_i32_1 = arith.constant 0 : i32
    return %c0_i32, %c0_i32_0 : i32, i32
  }
  func.func @transform_1(%arg0: i32) -> (i32, i32) {
    %c0_i32 = arith.constant 0 : i32
    %c0_i32_0 = arith.constant 0 : i32
    return %c0_i32, %arg0 : i32, i32
  }
  func.func @transform_2(%arg0: i32) -> (i32, i32) {
    %c0_i32 = arith.constant 0 : i32
    %c0_i32_0 = arith.constant 0 : i32
    %c0_i32_1 = arith.constant 0 : i32
    return %c0_i32, %c0_i32_0 : i32, i32
  }
  func.func @transform_3(%arg0: i32) -> (i32, i32) {
    %c0_i32 = arith.constant 0 : i32
    %c0_i32_0 = arith.constant 0 : i32
    return %c0_i32, %arg0 : i32, i32
  }
}

module attributes {stable_mosaic.version = 11 : i64} {
  func.func @_gemm_bias_act_kernel(%arg0: i32, %arg1: memref<24x648xbf16, #tpu.memory_space<vmem>>, %arg2: memref<648x4xbf16, #tpu.memory_space<vmem>>, %arg3: memref<24x1xf32, #tpu.memory_space<vmem>>, %arg4: memref<24x4xbf16, #tpu.memory_space<vmem>>) attributes {dimension_semantics = [#tpu.dimension_semantics<parallel>], iteration_bounds = array<i64: 1>, scalar_prefetch = 0 : i64, scratch_operands = 0 : i64, tpu.core_type = #tpu.core_type<tc>, window_params = [{pipeline_mode = #tpu.pipeline_mode<synchronous>, transform_indices = @transform_0, window_bounds = array<i64: 24, 648>}, {transform_indices = @transform_1, window_bounds = array<i64: 648, 4>}, {pipeline_mode = #tpu.pipeline_mode<synchronous>, transform_indices = @transform_2, window_bounds = array<i64: 24, 1>}, {transform_indices = @transform_3, window_bounds = array<i64: 24, 4>}]} {
    %c0 = arith.constant 0 : index
    %c0_0 = arith.constant 0 : index
    %0 = vector.load %arg1[%c0, %c0_0] : memref<24x648xbf16, #tpu.memory_space<vmem>>, vector<24x648xbf16>
    %c0_1 = arith.constant 0 : index
    %c0_2 = arith.constant 0 : index
    %1 = vector.load %arg2[%c0_1, %c0_2] : memref<648x4xbf16, #tpu.memory_space<vmem>>, vector<648x4xbf16>
    %cst = arith.constant dense<0.000000e+00> : vector<24x4xf32>
    %2 = tpu.matmul %0, %1, %cst {dimension_numbers = #tpu.dot_dimension_numbers<[1], [0], [0], [1], [0, 0, 1, 1], [], []>} : vector<24x648xbf16>, vector<648x4xbf16>, vector<24x4xf32> -> vector<24x4xf32>
    %c0_3 = arith.constant 0 : index
    %c0_4 = arith.constant 0 : index
    %3 = vector.load %arg3[%c0_3, %c0_4] : memref<24x1xf32, #tpu.memory_space<vmem>>, vector<24x1xf32>
    %4 = vector.broadcast %3 : vector<24x1xf32> to vector<24x4xf32>
    %5 = arith.addf %2, %4 : vector<24x4xf32>
    %cst_5 = arith.constant 0.00999999977 : f32
    %6 = vector.broadcast %cst_5 : f32 to vector<24x4xf32>
    %7 = arith.mulf %6, %5 : vector<24x4xf32>
    %8 = arith.maximumf %5, %7 : vector<24x4xf32>
    %9 = arith.truncf %8 : vector<24x4xf32> to vector<24x4xbf16>
    %c0_6 = arith.constant 0 : index
    %c0_7 = arith.constant 0 : index
    %10 = vector.load %arg4[%c0_6, %c0_7] : memref<24x4xbf16, #tpu.memory_space<vmem>>, vector<24x4xbf16>
    tpu.vector_store %arg4[%c0_6, %c0_7], %9 {strides = array<i32>} : memref<24x4xbf16, #tpu.memory_space<vmem>>, vector<24x4xbf16>,
    return
  }
  func.func @transform_0(%arg0: i32) -> (i32, i32) {
    %c0_i32 = arith.constant 0 : i32
    %c0_i32_0 = arith.constant 0 : i32
    %c0_i32_1 = arith.constant 0 : i32
    return %c0_i32, %c0_i32_0 : i32, i32
  }
  func.func @transform_1(%arg0: i32) -> (i32, i32) {
    %c0_i32 = arith.constant 0 : i32
    %c0_i32_0 = arith.constant 0 : i32
    return %c0_i32, %arg0 : i32, i32
  }
  func.func @transform_2(%arg0: i32) -> (i32, i32) {
    %c0_i32 = arith.constant 0 : i32
    %c0_i32_0 = arith.constant 0 : i32
    %c0_i32_1 = arith.constant 0 : i32
    return %c0_i32, %c0_i32_0 : i32, i32
  }
  func.func @transform_3(%arg0: i32) -> (i32, i32) {
    %c0_i32 = arith.constant 0 : i32
    %c0_i32_0 = arith.constant 0 : i32
    return %c0_i32, %arg0 : i32, i32
  }
}

module attributes {stable_mosaic.version = 11 : i64} {
  func.func @_gemm_tail_kernel(%arg0: i32, %arg1: memref<24x216xbf16, #tpu.memory_space<vmem>>, %arg2: memref<216x4xbf16, #tpu.memory_space<vmem>>, %arg3: memref<24x1xf32, #tpu.memory_space<vmem>>, %arg4: memref<24x24xbf16, #tpu.memory_space<vmem>>, %arg5: memref<24x4xf32, #tpu.memory_space<vmem>>, %arg6: memref<24x4xbf16, #tpu.memory_space<vmem>>) attributes {dimension_semantics = [#tpu.dimension_semantics<parallel>], iteration_bounds = array<i64: 1>, scalar_prefetch = 0 : i64, scratch_operands = 0 : i64, tpu.core_type = #tpu.core_type<tc>, window_params = [{pipeline_mode = #tpu.pipeline_mode<synchronous>, transform_indices = @transform_0, window_bounds = array<i64: 24, 216>}, {transform_indices = @transform_1, window_bounds = array<i64: 216, 4>}, {pipeline_mode = #tpu.pipeline_mode<synchronous>, transform_indices = @transform_2, window_bounds = array<i64: 24, 1>}, {pipeline_mode = #tpu.pipeline_mode<synchronous>, transform_indices = @transform_3, window_bounds = array<i64: 24, 24>}, {transform_indices = @transform_4, window_bounds = array<i64: 24, 4>}, {transform_indices = @transform_5, window_bounds = array<i64: 24, 4>}]} {
    %c0 = arith.constant 0 : index
    %c0_0 = arith.constant 0 : index
    %0 = vector.load %arg1[%c0, %c0_0] : memref<24x216xbf16, #tpu.memory_space<vmem>>, vector<24x216xbf16>
    %c0_1 = arith.constant 0 : index
    %c0_2 = arith.constant 0 : index
    %1 = vector.load %arg2[%c0_1, %c0_2] : memref<216x4xbf16, #tpu.memory_space<vmem>>, vector<216x4xbf16>
    %cst = arith.constant dense<0.000000e+00> : vector<24x4xf32>
    %2 = tpu.matmul %0, %1, %cst {dimension_numbers = #tpu.dot_dimension_numbers<[1], [0], [0], [1], [0, 0, 1, 1], [], []>} : vector<24x216xbf16>, vector<216x4xbf16>, vector<24x4xf32> -> vector<24x4xf32>
    %c0_3 = arith.constant 0 : index
    %c0_4 = arith.constant 0 : index
    %3 = vector.load %arg3[%c0_3, %c0_4] : memref<24x1xf32, #tpu.memory_space<vmem>>, vector<24x1xf32>
    %4 = vector.broadcast %3 : vector<24x1xf32> to vector<24x4xf32>
    %5 = arith.addf %2, %4 : vector<24x4xf32>
    %cst_5 = arith.constant 0.00999999977 : f32
    %6 = vector.broadcast %cst_5 : f32 to vector<24x4xf32>
    %7 = arith.mulf %6, %5 : vector<24x4xf32>
    %8 = arith.maximumf %5, %7 : vector<24x4xf32>
    %c0_6 = arith.constant 0 : index
    %c0_7 = arith.constant 0 : index
    %9 = vector.load %arg4[%c0_6, %c0_7] : memref<24x24xbf16, #tpu.memory_space<vmem>>, vector<24x24xbf16>
    %10 = arith.truncf %8 : vector<24x4xf32> to vector<24x4xbf16>
    %cst_8 = arith.constant dense<0.000000e+00> : vector<24x4xf32>
    %11 = tpu.matmul %9, %10, %cst_8 {dimension_numbers = #tpu.dot_dimension_numbers<[1], [0], [0], [1], [0, 0, 1, 1], [], []>} : vector<24x24xbf16>, vector<24x4xbf16>, vector<24x4xf32> -> vector<24x4xf32>
    %c0_9 = arith.constant 0 : index
    %c0_10 = arith.constant 0 : index
    %12 = vector.load %arg5[%c0_9, %c0_10] : memref<24x4xf32, #tpu.memory_space<vmem>>, vector<24x4xf32>
    %13 = arith.addf %11, %12 : vector<24x4xf32>
    %14 = arith.truncf %13 : vector<24x4xf32> to vector<24x4xbf16>
    %c0_11 = arith.constant 0 : index
    %c0_12 = arith.constant 0 : index
    %15 = vector.load %arg6[%c0_11, %c0_12] : memref<24x4xbf16, #tpu.memory_space<vmem>>, vector<24x4xbf16>
    tpu.vector_store %arg6[%c0_11, %c0_12], %14 {strides = array<i32>} : memref<24x4xbf16, #tpu.memory_space<vmem>>, vector<24x4xbf16>,
    return
  }
  func.func @transform_0(%arg0: i32) -> (i32, i32) {
    %c0_i32 = arith.constant 0 : i32
    %c0_i32_0 = arith.constant 0 : i32
    %c0_i32_1 = arith.constant 0 : i32
    return %c0_i32, %c0_i32_0 : i32, i32
  }
  func.func @transform_1(%arg0: i32) -> (i32, i32) {
    %c0_i32 = arith.constant 0 : i32
    %c0_i32_0 = arith.constant 0 : i32
    return %c0_i32, %arg0 : i32, i32
  }
  func.func @transform_2(%arg0: i32) -> (i32, i32) {
    %c0_i32 = arith.constant 0 : i32
    %c0_i32_0 = arith.constant 0 : i32
    %c0_i32_1 = arith.constant 0 : i32
    return %c0_i32, %c0_i32_0 : i32, i32
  }
  func.func @transform_3(%arg0: i32) -> (i32, i32) {
    %c0_i32 = arith.constant 0 : i32
    %c0_i32_0 = arith.constant 0 : i32
    %c0_i32_1 = arith.constant 0 : i32
    return %c0_i32, %c0_i32_0 : i32, i32
  }
  func.func @transform_4(%arg0: i32) -> (i32, i32) {
    %c0_i32 = arith.constant 0 : i32
    %c0_i32_0 = arith.constant 0 : i32
    return %c0_i32, %arg0 : i32, i32
  }
  func.func @transform_5(%arg0: i32) -> (i32, i32) {
    %c0_i32 = arith.constant 0 : i32
    %c0_i32_0 = arith.constant 0 : i32
    return %c0_i32, %arg0 : i32, i32
  }
}

module attributes {stable_mosaic.version = 11 : i64} {
  func.func @_gemm_tail_kernel(%arg0: i32, %arg1: memref<24x216xbf16, #tpu.memory_space<vmem>>, %arg2: memref<216x4xbf16, #tpu.memory_space<vmem>>, %arg3: memref<24x1xf32, #tpu.memory_space<vmem>>, %arg4: memref<24x24xbf16, #tpu.memory_space<vmem>>, %arg5: memref<24x4xbf16, #tpu.memory_space<vmem>>, %arg6: memref<24x4xbf16, #tpu.memory_space<vmem>>) attributes {dimension_semantics = [#tpu.dimension_semantics<parallel>], iteration_bounds = array<i64: 1>, scalar_prefetch = 0 : i64, scratch_operands = 0 : i64, tpu.core_type = #tpu.core_type<tc>, window_params = [{pipeline_mode = #tpu.pipeline_mode<synchronous>, transform_indices = @transform_0, window_bounds = array<i64: 24, 216>}, {transform_indices = @transform_1, window_bounds = array<i64: 216, 4>}, {pipeline_mode = #tpu.pipeline_mode<synchronous>, transform_indices = @transform_2, window_bounds = array<i64: 24, 1>}, {pipeline_mode = #tpu.pipeline_mode<synchronous>, transform_indices = @transform_3, window_bounds = array<i64: 24, 24>}, {transform_indices = @transform_4, window_bounds = array<i64: 24, 4>}, {transform_indices = @transform_5, window_bounds = array<i64: 24, 4>}]} {
    %c0 = arith.constant 0 : index
    %c0_0 = arith.constant 0 : index
    %0 = vector.load %arg1[%c0, %c0_0] : memref<24x216xbf16, #tpu.memory_space<vmem>>, vector<24x216xbf16>
    %c0_1 = arith.constant 0 : index
    %c0_2 = arith.constant 0 : index
    %1 = vector.load %arg2[%c0_1, %c0_2] : memref<216x4xbf16, #tpu.memory_space<vmem>>, vector<216x4xbf16>
    %cst = arith.constant dense<0.000000e+00> : vector<24x4xf32>
    %2 = tpu.matmul %0, %1, %cst {dimension_numbers = #tpu.dot_dimension_numbers<[1], [0], [0], [1], [0, 0, 1, 1], [], []>} : vector<24x216xbf16>, vector<216x4xbf16>, vector<24x4xf32> -> vector<24x4xf32>
    %c0_3 = arith.constant 0 : index
    %c0_4 = arith.constant 0 : index
    %3 = vector.load %arg3[%c0_3, %c0_4] : memref<24x1xf32, #tpu.memory_space<vmem>>, vector<24x1xf32>
    %4 = vector.broadcast %3 : vector<24x1xf32> to vector<24x4xf32>
    %5 = arith.addf %2, %4 : vector<24x4xf32>
    %cst_5 = arith.constant 0.00999999977 : f32
    %6 = vector.broadcast %cst_5 : f32 to vector<24x4xf32>
    %7 = arith.mulf %6, %5 : vector<24x4xf32>
    %8 = arith.maximumf %5, %7 : vector<24x4xf32>
    %c0_6 = arith.constant 0 : index
    %c0_7 = arith.constant 0 : index
    %9 = vector.load %arg4[%c0_6, %c0_7] : memref<24x24xbf16, #tpu.memory_space<vmem>>, vector<24x24xbf16>
    %10 = arith.truncf %8 : vector<24x4xf32> to vector<24x4xbf16>
    %cst_8 = arith.constant dense<0.000000e+00> : vector<24x4xf32>
    %11 = tpu.matmul %9, %10, %cst_8 {dimension_numbers = #tpu.dot_dimension_numbers<[1], [0], [0], [1], [0, 0, 1, 1], [], []>} : vector<24x24xbf16>, vector<24x4xbf16>, vector<24x4xf32> -> vector<24x4xf32>
    %c0_9 = arith.constant 0 : index
    %c0_10 = arith.constant 0 : index
    %12 = vector.load %arg5[%c0_9, %c0_10] : memref<24x4xbf16, #tpu.memory_space<vmem>>, vector<24x4xbf16>
    %13 = arith.extf %12 : vector<24x4xbf16> to vector<24x4xf32>
    %14 = arith.addf %11, %13 : vector<24x4xf32>
    %15 = arith.truncf %14 : vector<24x4xf32> to vector<24x4xbf16>
    %c0_11 = arith.constant 0 : index
    %c0_12 = arith.constant 0 : index
    %16 = vector.load %arg6[%c0_11, %c0_12] : memref<24x4xbf16, #tpu.memory_space<vmem>>, vector<24x4xbf16>
    tpu.vector_store %arg6[%c0_11, %c0_12], %15 {strides = array<i32>} : memref<24x4xbf16, #tpu.memory_space<vmem>>, vector<24x4xbf16>,
    return
  }
  func.func @transform_0(%arg0: i32) -> (i32, i32) {
    %c0_i32 = arith.constant 0 : i32
    %c0_i32_0 = arith.constant 0 : i32
    %c0_i32_1 = arith.constant 0 : i32
    return %c0_i32, %c0_i32_0 : i32, i32
  }
  func.func @transform_1(%arg0: i32) -> (i32, i32) {
    %c0_i32 = arith.constant 0 : i32
    %c0_i32_0 = arith.constant 0 : i32
    return %c0_i32, %arg0 : i32, i32
  }
  func.func @transform_2(%arg0: i32) -> (i32, i32) {
    %c0_i32 = arith.constant 0 : i32
    %c0_i32_0 = arith.constant 0 : i32
    %c0_i32_1 = arith.constant 0 : i32
    return %c0_i32, %c0_i32_0 : i32, i32
  }
  func.func @transform_3(%arg0: i32) -> (i32, i32) {
    %c0_i32 = arith.constant 0 : i32
    %c0_i32_0 = arith.constant 0 : i32
    %c0_i32_1 = arith.constant 0 : i32
    return %c0_i32, %c0_i32_0 : i32, i32
  }
  func.func @transform_4(%arg0: i32) -> (i32, i32) {
    %c0_i32 = arith.constant 0 : i32
    %c0_i32_0 = arith.constant 0 : i32
    return %c0_i32, %arg0 : i32, i32
  }
  func.func @transform_5(%arg0: i32) -> (i32, i32) {
    %c0_i32 = arith.constant 0 : i32
    %c0_i32_0 = arith.constant 0 : i32
    return %c0_i32, %arg0 : i32, i32
  }
}

module attributes {stable_mosaic.version = 11 : i64} {
  func.func @_gemm_bias_act_kernel(%arg0: i32, %arg1: memref<128x648xbf16, #tpu.memory_space<vmem>>, %arg2: memref<648x4xbf16, #tpu.memory_space<vmem>>, %arg3: memref<128x1xf32, #tpu.memory_space<vmem>>, %arg4: memref<128x4xbf16, #tpu.memory_space<vmem>>) attributes {dimension_semantics = [#tpu.dimension_semantics<parallel>], iteration_bounds = array<i64: 1>, scalar_prefetch = 0 : i64, scratch_operands = 0 : i64, tpu.core_type = #tpu.core_type<tc>, window_params = [{pipeline_mode = #tpu.pipeline_mode<synchronous>, transform_indices = @transform_0, window_bounds = array<i64: 128, 648>}, {transform_indices = @transform_1, window_bounds = array<i64: 648, 4>}, {pipeline_mode = #tpu.pipeline_mode<synchronous>, transform_indices = @transform_2, window_bounds = array<i64: 128, 1>}, {transform_indices = @transform_3, window_bounds = array<i64: 128, 4>}]} {
    %c0 = arith.constant 0 : index
    %c0_0 = arith.constant 0 : index
    %0 = vector.load %arg1[%c0, %c0_0] : memref<128x648xbf16, #tpu.memory_space<vmem>>, vector<128x648xbf16>
    %c0_1 = arith.constant 0 : index
    %c0_2 = arith.constant 0 : index
    %1 = vector.load %arg2[%c0_1, %c0_2] : memref<648x4xbf16, #tpu.memory_space<vmem>>, vector<648x4xbf16>
    %cst = arith.constant dense<0.000000e+00> : vector<128x4xf32>
    %2 = tpu.matmul %0, %1, %cst {dimension_numbers = #tpu.dot_dimension_numbers<[1], [0], [0], [1], [0, 0, 1, 1], [], []>} : vector<128x648xbf16>, vector<648x4xbf16>, vector<128x4xf32> -> vector<128x4xf32>
    %c0_3 = arith.constant 0 : index
    %c0_4 = arith.constant 0 : index
    %3 = vector.load %arg3[%c0_3, %c0_4] : memref<128x1xf32, #tpu.memory_space<vmem>>, vector<128x1xf32>
    %4 = vector.broadcast %3 : vector<128x1xf32> to vector<128x4xf32>
    %5 = arith.addf %2, %4 : vector<128x4xf32>
    %cst_5 = arith.constant 0.00999999977 : f32
    %6 = vector.broadcast %cst_5 : f32 to vector<128x4xf32>
    %7 = arith.mulf %6, %5 : vector<128x4xf32>
    %8 = arith.maximumf %5, %7 : vector<128x4xf32>
    %9 = arith.truncf %8 : vector<128x4xf32> to vector<128x4xbf16>
    %c0_6 = arith.constant 0 : index
    %c0_7 = arith.constant 0 : index
    %10 = vector.load %arg4[%c0_6, %c0_7] : memref<128x4xbf16, #tpu.memory_space<vmem>>, vector<128x4xbf16>
    tpu.vector_store %arg4[%c0_6, %c0_7], %9 {strides = array<i32>} : memref<128x4xbf16, #tpu.memory_space<vmem>>, vector<128x4xbf16>,
    return
  }
  func.func @transform_0(%arg0: i32) -> (i32, i32) {
    %c0_i32 = arith.constant 0 : i32
    %c0_i32_0 = arith.constant 0 : i32
    %c0_i32_1 = arith.constant 0 : i32
    return %c0_i32, %c0_i32_0 : i32, i32
  }
  func.func @transform_1(%arg0: i32) -> (i32, i32) {
    %c0_i32 = arith.constant 0 : i32
    %c0_i32_0 = arith.constant 0 : i32
    return %c0_i32, %arg0 : i32, i32
  }
  func.func @transform_2(%arg0: i32) -> (i32, i32) {
    %c0_i32 = arith.constant 0 : i32
    %c0_i32_0 = arith.constant 0 : i32
    %c0_i32_1 = arith.constant 0 : i32
    return %c0_i32, %c0_i32_0 : i32, i32
  }
  func.func @transform_3(%arg0: i32) -> (i32, i32) {
    %c0_i32 = arith.constant 0 : i32
    %c0_i32_0 = arith.constant 0 : i32
    return %c0_i32, %arg0 : i32, i32
  }
}

module attributes {stable_mosaic.version = 11 : i64} {
  func.func @_concat_1x1_kernel(%arg0: i32, %arg1: memref<16x16xbf16, #tpu.memory_space<vmem>>, %arg2: memref<16x32xbf16, #tpu.memory_space<vmem>>, %arg3: memref<16x16xbf16, #tpu.memory_space<vmem>>, %arg4: memref<16x32xbf16, #tpu.memory_space<vmem>>, %arg5: memref<16x1xf32, #tpu.memory_space<vmem>>, %arg6: memref<16x32xbf16, #tpu.memory_space<vmem>>) attributes {dimension_semantics = [#tpu.dimension_semantics<parallel>], iteration_bounds = array<i64: 1>, scalar_prefetch = 0 : i64, scratch_operands = 0 : i64, tpu.core_type = #tpu.core_type<tc>, window_params = [{pipeline_mode = #tpu.pipeline_mode<synchronous>, transform_indices = @transform_0, window_bounds = array<i64: 16, 16>}, {transform_indices = @transform_1, window_bounds = array<i64: 16, 32>}, {pipeline_mode = #tpu.pipeline_mode<synchronous>, transform_indices = @transform_2, window_bounds = array<i64: 16, 16>}, {transform_indices = @transform_3, window_bounds = array<i64: 16, 32>}, {pipeline_mode = #tpu.pipeline_mode<synchronous>, transform_indices = @transform_4, window_bounds = array<i64: 16, 1>}, {transform_indices = @transform_5, window_bounds = array<i64: 16, 32>}]} {
    %c0 = arith.constant 0 : index
    %c0_0 = arith.constant 0 : index
    %0 = vector.load %arg1[%c0, %c0_0] : memref<16x16xbf16, #tpu.memory_space<vmem>>, vector<16x16xbf16>
    %c0_1 = arith.constant 0 : index
    %c0_2 = arith.constant 0 : index
    %1 = vector.load %arg2[%c0_1, %c0_2] : memref<16x32xbf16, #tpu.memory_space<vmem>>, vector<16x32xbf16>
    %cst = arith.constant dense<0.000000e+00> : vector<16x32xf32>
    %2 = tpu.matmul %0, %1, %cst {dimension_numbers = #tpu.dot_dimension_numbers<[1], [0], [0], [1], [0, 0, 1, 1], [], []>} : vector<16x16xbf16>, vector<16x32xbf16>, vector<16x32xf32> -> vector<16x32xf32>
    %c0_3 = arith.constant 0 : index
    %c0_4 = arith.constant 0 : index
    %3 = vector.load %arg3[%c0_3, %c0_4] : memref<16x16xbf16, #tpu.memory_space<vmem>>, vector<16x16xbf16>
    %c0_5 = arith.constant 0 : index
    %c0_6 = arith.constant 0 : index
    %4 = vector.load %arg4[%c0_5, %c0_6] : memref<16x32xbf16, #tpu.memory_space<vmem>>, vector<16x32xbf16>
    %cst_7 = arith.constant dense<0.000000e+00> : vector<16x32xf32>
    %5 = tpu.matmul %3, %4, %cst_7 {dimension_numbers = #tpu.dot_dimension_numbers<[1], [0], [0], [1], [0, 0, 1, 1], [], []>} : vector<16x16xbf16>, vector<16x32xbf16>, vector<16x32xf32> -> vector<16x32xf32>
    %6 = arith.addf %2, %5 : vector<16x32xf32>
    %c0_8 = arith.constant 0 : index
    %c0_9 = arith.constant 0 : index
    %7 = vector.load %arg5[%c0_8, %c0_9] : memref<16x1xf32, #tpu.memory_space<vmem>>, vector<16x1xf32>
    %8 = vector.broadcast %7 : vector<16x1xf32> to vector<16x32xf32>
    %9 = arith.addf %6, %8 : vector<16x32xf32>
    %cst_10 = arith.constant 0.00999999977 : f32
    %10 = vector.broadcast %cst_10 : f32 to vector<16x32xf32>
    %11 = arith.mulf %10, %9 : vector<16x32xf32>
    %12 = arith.maximumf %9, %11 : vector<16x32xf32>
    %13 = arith.truncf %12 : vector<16x32xf32> to vector<16x32xbf16>
    %c0_11 = arith.constant 0 : index
    %c0_12 = arith.constant 0 : index
    %14 = vector.load %arg6[%c0_11, %c0_12] : memref<16x32xbf16, #tpu.memory_space<vmem>>, vector<16x32xbf16>
    tpu.vector_store %arg6[%c0_11, %c0_12], %13 {strides = array<i32>} : memref<16x32xbf16, #tpu.memory_space<vmem>>, vector<16x32xbf16>,
    return
  }
  func.func @transform_0(%arg0: i32) -> (i32, i32) {
    %c0_i32 = arith.constant 0 : i32
    %c0_i32_0 = arith.constant 0 : i32
    %c0_i32_1 = arith.constant 0 : i32
    return %c0_i32, %c0_i32_0 : i32, i32
  }
  func.func @transform_1(%arg0: i32) -> (i32, i32) {
    %c0_i32 = arith.constant 0 : i32
    %c0_i32_0 = arith.constant 0 : i32
    return %c0_i32, %arg0 : i32, i32
  }
  func.func @transform_2(%arg0: i32) -> (i32, i32) {
    %c0_i32 = arith.constant 0 : i32
    %c0_i32_0 = arith.constant 0 : i32
    %c0_i32_1 = arith.constant 0 : i32
    return %c0_i32, %c0_i32_0 : i32, i32
  }
  func.func @transform_3(%arg0: i32) -> (i32, i32) {
    %c0_i32 = arith.constant 0 : i32
    %c0_i32_0 = arith.constant 0 : i32
    return %c0_i32, %arg0 : i32, i32
  }
  func.func @transform_4(%arg0: i32) -> (i32, i32) {
    %c0_i32 = arith.constant 0 : i32
    %c0_i32_0 = arith.constant 0 : i32
    %c0_i32_1 = arith.constant 0 : i32
    return %c0_i32, %c0_i32_0 : i32, i32
  }
  func.func @transform_5(%arg0: i32) -> (i32, i32) {
    %c0_i32 = arith.constant 0 : i32
    %c0_i32_0 = arith.constant 0 : i32
    return %c0_i32, %arg0 : i32, i32
  }
}

module attributes {stable_mosaic.version = 11 : i64} {
  func.func @_gemm_bias_act_kernel(%arg0: i32, %arg1: memref<16x144xbf16, #tpu.memory_space<vmem>>, %arg2: memref<144x32xbf16, #tpu.memory_space<vmem>>, %arg3: memref<16x1xf32, #tpu.memory_space<vmem>>, %arg4: memref<16x32xbf16, #tpu.memory_space<vmem>>) attributes {dimension_semantics = [#tpu.dimension_semantics<parallel>], iteration_bounds = array<i64: 1>, scalar_prefetch = 0 : i64, scratch_operands = 0 : i64, tpu.core_type = #tpu.core_type<tc>, window_params = [{pipeline_mode = #tpu.pipeline_mode<synchronous>, transform_indices = @transform_0, window_bounds = array<i64: 16, 144>}, {transform_indices = @transform_1, window_bounds = array<i64: 144, 32>}, {pipeline_mode = #tpu.pipeline_mode<synchronous>, transform_indices = @transform_2, window_bounds = array<i64: 16, 1>}, {transform_indices = @transform_3, window_bounds = array<i64: 16, 32>}]} {
    %c0 = arith.constant 0 : index
    %c0_0 = arith.constant 0 : index
    %0 = vector.load %arg1[%c0, %c0_0] : memref<16x144xbf16, #tpu.memory_space<vmem>>, vector<16x144xbf16>
    %c0_1 = arith.constant 0 : index
    %c0_2 = arith.constant 0 : index
    %1 = vector.load %arg2[%c0_1, %c0_2] : memref<144x32xbf16, #tpu.memory_space<vmem>>, vector<144x32xbf16>
    %cst = arith.constant dense<0.000000e+00> : vector<16x32xf32>
    %2 = tpu.matmul %0, %1, %cst {dimension_numbers = #tpu.dot_dimension_numbers<[1], [0], [0], [1], [0, 0, 1, 1], [], []>} : vector<16x144xbf16>, vector<144x32xbf16>, vector<16x32xf32> -> vector<16x32xf32>
    %c0_3 = arith.constant 0 : index
    %c0_4 = arith.constant 0 : index
    %3 = vector.load %arg3[%c0_3, %c0_4] : memref<16x1xf32, #tpu.memory_space<vmem>>, vector<16x1xf32>
    %4 = vector.broadcast %3 : vector<16x1xf32> to vector<16x32xf32>
    %5 = arith.addf %2, %4 : vector<16x32xf32>
    %cst_5 = arith.constant 0.00999999977 : f32
    %6 = vector.broadcast %cst_5 : f32 to vector<16x32xf32>
    %7 = arith.mulf %6, %5 : vector<16x32xf32>
    %8 = arith.maximumf %5, %7 : vector<16x32xf32>
    %9 = arith.truncf %8 : vector<16x32xf32> to vector<16x32xbf16>
    %c0_6 = arith.constant 0 : index
    %c0_7 = arith.constant 0 : index
    %10 = vector.load %arg4[%c0_6, %c0_7] : memref<16x32xbf16, #tpu.memory_space<vmem>>, vector<16x32xbf16>
    tpu.vector_store %arg4[%c0_6, %c0_7], %9 {strides = array<i32>} : memref<16x32xbf16, #tpu.memory_space<vmem>>, vector<16x32xbf16>,
    return
  }
  func.func @transform_0(%arg0: i32) -> (i32, i32) {
    %c0_i32 = arith.constant 0 : i32
    %c0_i32_0 = arith.constant 0 : i32
    %c0_i32_1 = arith.constant 0 : i32
    return %c0_i32, %c0_i32_0 : i32, i32
  }
  func.func @transform_1(%arg0: i32) -> (i32, i32) {
    %c0_i32 = arith.constant 0 : i32
    %c0_i32_0 = arith.constant 0 : i32
    return %c0_i32, %arg0 : i32, i32
  }
  func.func @transform_2(%arg0: i32) -> (i32, i32) {
    %c0_i32 = arith.constant 0 : i32
    %c0_i32_0 = arith.constant 0 : i32
    %c0_i32_1 = arith.constant 0 : i32
    return %c0_i32, %c0_i32_0 : i32, i32
  }
  func.func @transform_3(%arg0: i32) -> (i32, i32) {
    %c0_i32 = arith.constant 0 : i32
    %c0_i32_0 = arith.constant 0 : i32
    return %c0_i32, %arg0 : i32, i32
  }
}

module attributes {stable_mosaic.version = 11 : i64} {
  func.func @_gemm_tail_kernel(%arg0: i32, %arg1: memref<16x144xbf16, #tpu.memory_space<vmem>>, %arg2: memref<144x32xbf16, #tpu.memory_space<vmem>>, %arg3: memref<16x1xf32, #tpu.memory_space<vmem>>, %arg4: memref<16x16xbf16, #tpu.memory_space<vmem>>, %arg5: memref<16x32xf32, #tpu.memory_space<vmem>>, %arg6: memref<16x32xbf16, #tpu.memory_space<vmem>>) attributes {dimension_semantics = [#tpu.dimension_semantics<parallel>], iteration_bounds = array<i64: 1>, scalar_prefetch = 0 : i64, scratch_operands = 0 : i64, tpu.core_type = #tpu.core_type<tc>, window_params = [{pipeline_mode = #tpu.pipeline_mode<synchronous>, transform_indices = @transform_0, window_bounds = array<i64: 16, 144>}, {transform_indices = @transform_1, window_bounds = array<i64: 144, 32>}, {pipeline_mode = #tpu.pipeline_mode<synchronous>, transform_indices = @transform_2, window_bounds = array<i64: 16, 1>}, {pipeline_mode = #tpu.pipeline_mode<synchronous>, transform_indices = @transform_3, window_bounds = array<i64: 16, 16>}, {transform_indices = @transform_4, window_bounds = array<i64: 16, 32>}, {transform_indices = @transform_5, window_bounds = array<i64: 16, 32>}]} {
    %c0 = arith.constant 0 : index
    %c0_0 = arith.constant 0 : index
    %0 = vector.load %arg1[%c0, %c0_0] : memref<16x144xbf16, #tpu.memory_space<vmem>>, vector<16x144xbf16>
    %c0_1 = arith.constant 0 : index
    %c0_2 = arith.constant 0 : index
    %1 = vector.load %arg2[%c0_1, %c0_2] : memref<144x32xbf16, #tpu.memory_space<vmem>>, vector<144x32xbf16>
    %cst = arith.constant dense<0.000000e+00> : vector<16x32xf32>
    %2 = tpu.matmul %0, %1, %cst {dimension_numbers = #tpu.dot_dimension_numbers<[1], [0], [0], [1], [0, 0, 1, 1], [], []>} : vector<16x144xbf16>, vector<144x32xbf16>, vector<16x32xf32> -> vector<16x32xf32>
    %c0_3 = arith.constant 0 : index
    %c0_4 = arith.constant 0 : index
    %3 = vector.load %arg3[%c0_3, %c0_4] : memref<16x1xf32, #tpu.memory_space<vmem>>, vector<16x1xf32>
    %4 = vector.broadcast %3 : vector<16x1xf32> to vector<16x32xf32>
    %5 = arith.addf %2, %4 : vector<16x32xf32>
    %cst_5 = arith.constant 0.00999999977 : f32
    %6 = vector.broadcast %cst_5 : f32 to vector<16x32xf32>
    %7 = arith.mulf %6, %5 : vector<16x32xf32>
    %8 = arith.maximumf %5, %7 : vector<16x32xf32>
    %c0_6 = arith.constant 0 : index
    %c0_7 = arith.constant 0 : index
    %9 = vector.load %arg4[%c0_6, %c0_7] : memref<16x16xbf16, #tpu.memory_space<vmem>>, vector<16x16xbf16>
    %10 = arith.truncf %8 : vector<16x32xf32> to vector<16x32xbf16>
    %cst_8 = arith.constant dense<0.000000e+00> : vector<16x32xf32>
    %11 = tpu.matmul %9, %10, %cst_8 {dimension_numbers = #tpu.dot_dimension_numbers<[1], [0], [0], [1], [0, 0, 1, 1], [], []>} : vector<16x16xbf16>, vector<16x32xbf16>, vector<16x32xf32> -> vector<16x32xf32>
    %c0_9 = arith.constant 0 : index
    %c0_10 = arith.constant 0 : index
    %12 = vector.load %arg5[%c0_9, %c0_10] : memref<16x32xf32, #tpu.memory_space<vmem>>, vector<16x32xf32>
    %13 = arith.addf %11, %12 : vector<16x32xf32>
    %14 = arith.truncf %13 : vector<16x32xf32> to vector<16x32xbf16>
    %c0_11 = arith.constant 0 : index
    %c0_12 = arith.constant 0 : index
    %15 = vector.load %arg6[%c0_11, %c0_12] : memref<16x32xbf16, #tpu.memory_space<vmem>>, vector<16x32xbf16>
    tpu.vector_store %arg6[%c0_11, %c0_12], %14 {strides = array<i32>} : memref<16x32xbf16, #tpu.memory_space<vmem>>, vector<16x32xbf16>,
    return
  }
  func.func @transform_0(%arg0: i32) -> (i32, i32) {
    %c0_i32 = arith.constant 0 : i32
    %c0_i32_0 = arith.constant 0 : i32
    %c0_i32_1 = arith.constant 0 : i32
    return %c0_i32, %c0_i32_0 : i32, i32
  }
  func.func @transform_1(%arg0: i32) -> (i32, i32) {
    %c0_i32 = arith.constant 0 : i32
    %c0_i32_0 = arith.constant 0 : i32
    return %c0_i32, %arg0 : i32, i32
  }
  func.func @transform_2(%arg0: i32) -> (i32, i32) {
    %c0_i32 = arith.constant 0 : i32
    %c0_i32_0 = arith.constant 0 : i32
    %c0_i32_1 = arith.constant 0 : i32
    return %c0_i32, %c0_i32_0 : i32, i32
  }
  func.func @transform_3(%arg0: i32) -> (i32, i32) {
    %c0_i32 = arith.constant 0 : i32
    %c0_i32_0 = arith.constant 0 : i32
    %c0_i32_1 = arith.constant 0 : i32
    return %c0_i32, %c0_i32_0 : i32, i32
  }
  func.func @transform_4(%arg0: i32) -> (i32, i32) {
    %c0_i32 = arith.constant 0 : i32
    %c0_i32_0 = arith.constant 0 : i32
    return %c0_i32, %arg0 : i32, i32
  }
  func.func @transform_5(%arg0: i32) -> (i32, i32) {
    %c0_i32 = arith.constant 0 : i32
    %c0_i32_0 = arith.constant 0 : i32
    return %c0_i32, %arg0 : i32, i32
  }
}

module attributes {stable_mosaic.version = 11 : i64} {
  func.func @_gemm_tail_kernel(%arg0: i32, %arg1: memref<16x144xbf16, #tpu.memory_space<vmem>>, %arg2: memref<144x32xbf16, #tpu.memory_space<vmem>>, %arg3: memref<16x1xf32, #tpu.memory_space<vmem>>, %arg4: memref<16x16xbf16, #tpu.memory_space<vmem>>, %arg5: memref<16x32xbf16, #tpu.memory_space<vmem>>, %arg6: memref<16x32xbf16, #tpu.memory_space<vmem>>) attributes {dimension_semantics = [#tpu.dimension_semantics<parallel>], iteration_bounds = array<i64: 1>, scalar_prefetch = 0 : i64, scratch_operands = 0 : i64, tpu.core_type = #tpu.core_type<tc>, window_params = [{pipeline_mode = #tpu.pipeline_mode<synchronous>, transform_indices = @transform_0, window_bounds = array<i64: 16, 144>}, {transform_indices = @transform_1, window_bounds = array<i64: 144, 32>}, {pipeline_mode = #tpu.pipeline_mode<synchronous>, transform_indices = @transform_2, window_bounds = array<i64: 16, 1>}, {pipeline_mode = #tpu.pipeline_mode<synchronous>, transform_indices = @transform_3, window_bounds = array<i64: 16, 16>}, {transform_indices = @transform_4, window_bounds = array<i64: 16, 32>}, {transform_indices = @transform_5, window_bounds = array<i64: 16, 32>}]} {
    %c0 = arith.constant 0 : index
    %c0_0 = arith.constant 0 : index
    %0 = vector.load %arg1[%c0, %c0_0] : memref<16x144xbf16, #tpu.memory_space<vmem>>, vector<16x144xbf16>
    %c0_1 = arith.constant 0 : index
    %c0_2 = arith.constant 0 : index
    %1 = vector.load %arg2[%c0_1, %c0_2] : memref<144x32xbf16, #tpu.memory_space<vmem>>, vector<144x32xbf16>
    %cst = arith.constant dense<0.000000e+00> : vector<16x32xf32>
    %2 = tpu.matmul %0, %1, %cst {dimension_numbers = #tpu.dot_dimension_numbers<[1], [0], [0], [1], [0, 0, 1, 1], [], []>} : vector<16x144xbf16>, vector<144x32xbf16>, vector<16x32xf32> -> vector<16x32xf32>
    %c0_3 = arith.constant 0 : index
    %c0_4 = arith.constant 0 : index
    %3 = vector.load %arg3[%c0_3, %c0_4] : memref<16x1xf32, #tpu.memory_space<vmem>>, vector<16x1xf32>
    %4 = vector.broadcast %3 : vector<16x1xf32> to vector<16x32xf32>
    %5 = arith.addf %2, %4 : vector<16x32xf32>
    %cst_5 = arith.constant 0.00999999977 : f32
    %6 = vector.broadcast %cst_5 : f32 to vector<16x32xf32>
    %7 = arith.mulf %6, %5 : vector<16x32xf32>
    %8 = arith.maximumf %5, %7 : vector<16x32xf32>
    %c0_6 = arith.constant 0 : index
    %c0_7 = arith.constant 0 : index
    %9 = vector.load %arg4[%c0_6, %c0_7] : memref<16x16xbf16, #tpu.memory_space<vmem>>, vector<16x16xbf16>
    %10 = arith.truncf %8 : vector<16x32xf32> to vector<16x32xbf16>
    %cst_8 = arith.constant dense<0.000000e+00> : vector<16x32xf32>
    %11 = tpu.matmul %9, %10, %cst_8 {dimension_numbers = #tpu.dot_dimension_numbers<[1], [0], [0], [1], [0, 0, 1, 1], [], []>} : vector<16x16xbf16>, vector<16x32xbf16>, vector<16x32xf32> -> vector<16x32xf32>
    %c0_9 = arith.constant 0 : index
    %c0_10 = arith.constant 0 : index
    %12 = vector.load %arg5[%c0_9, %c0_10] : memref<16x32xbf16, #tpu.memory_space<vmem>>, vector<16x32xbf16>
    %13 = arith.extf %12 : vector<16x32xbf16> to vector<16x32xf32>
    %14 = arith.addf %11, %13 : vector<16x32xf32>
    %15 = arith.truncf %14 : vector<16x32xf32> to vector<16x32xbf16>
    %c0_11 = arith.constant 0 : index
    %c0_12 = arith.constant 0 : index
    %16 = vector.load %arg6[%c0_11, %c0_12] : memref<16x32xbf16, #tpu.memory_space<vmem>>, vector<16x32xbf16>
    tpu.vector_store %arg6[%c0_11, %c0_12], %15 {strides = array<i32>} : memref<16x32xbf16, #tpu.memory_space<vmem>>, vector<16x32xbf16>,
    return
  }
  func.func @transform_0(%arg0: i32) -> (i32, i32) {
    %c0_i32 = arith.constant 0 : i32
    %c0_i32_0 = arith.constant 0 : i32
    %c0_i32_1 = arith.constant 0 : i32
    return %c0_i32, %c0_i32_0 : i32, i32
  }
  func.func @transform_1(%arg0: i32) -> (i32, i32) {
    %c0_i32 = arith.constant 0 : i32
    %c0_i32_0 = arith.constant 0 : i32
    return %c0_i32, %arg0 : i32, i32
  }
  func.func @transform_2(%arg0: i32) -> (i32, i32) {
    %c0_i32 = arith.constant 0 : i32
    %c0_i32_0 = arith.constant 0 : i32
    %c0_i32_1 = arith.constant 0 : i32
    return %c0_i32, %c0_i32_0 : i32, i32
  }
  func.func @transform_3(%arg0: i32) -> (i32, i32) {
    %c0_i32 = arith.constant 0 : i32
    %c0_i32_0 = arith.constant 0 : i32
    %c0_i32_1 = arith.constant 0 : i32
    return %c0_i32, %c0_i32_0 : i32, i32
  }
  func.func @transform_4(%arg0: i32) -> (i32, i32) {
    %c0_i32 = arith.constant 0 : i32
    %c0_i32_0 = arith.constant 0 : i32
    return %c0_i32, %arg0 : i32, i32
  }
  func.func @transform_5(%arg0: i32) -> (i32, i32) {
    %c0_i32 = arith.constant 0 : i32
    %c0_i32_0 = arith.constant 0 : i32
    return %c0_i32, %arg0 : i32, i32
  }
}

module attributes {stable_mosaic.version = 11 : i64} {
  func.func @_gemm_bias_act_kernel(%arg0: i32, %arg1: memref<64x432xbf16, #tpu.memory_space<vmem>>, %arg2: memref<432x32xbf16, #tpu.memory_space<vmem>>, %arg3: memref<64x1xf32, #tpu.memory_space<vmem>>, %arg4: memref<64x32xbf16, #tpu.memory_space<vmem>>) attributes {dimension_semantics = [#tpu.dimension_semantics<parallel>], iteration_bounds = array<i64: 1>, scalar_prefetch = 0 : i64, scratch_operands = 0 : i64, tpu.core_type = #tpu.core_type<tc>, window_params = [{pipeline_mode = #tpu.pipeline_mode<synchronous>, transform_indices = @transform_0, window_bounds = array<i64: 64, 432>}, {transform_indices = @transform_1, window_bounds = array<i64: 432, 32>}, {pipeline_mode = #tpu.pipeline_mode<synchronous>, transform_indices = @transform_2, window_bounds = array<i64: 64, 1>}, {transform_indices = @transform_3, window_bounds = array<i64: 64, 32>}]} {
    %c0 = arith.constant 0 : index
    %c0_0 = arith.constant 0 : index
    %0 = vector.load %arg1[%c0, %c0_0] : memref<64x432xbf16, #tpu.memory_space<vmem>>, vector<64x432xbf16>
    %c0_1 = arith.constant 0 : index
    %c0_2 = arith.constant 0 : index
    %1 = vector.load %arg2[%c0_1, %c0_2] : memref<432x32xbf16, #tpu.memory_space<vmem>>, vector<432x32xbf16>
    %cst = arith.constant dense<0.000000e+00> : vector<64x32xf32>
    %2 = tpu.matmul %0, %1, %cst {dimension_numbers = #tpu.dot_dimension_numbers<[1], [0], [0], [1], [0, 0, 1, 1], [], []>} : vector<64x432xbf16>, vector<432x32xbf16>, vector<64x32xf32> -> vector<64x32xf32>
    %c0_3 = arith.constant 0 : index
    %c0_4 = arith.constant 0 : index
    %3 = vector.load %arg3[%c0_3, %c0_4] : memref<64x1xf32, #tpu.memory_space<vmem>>, vector<64x1xf32>
    %4 = vector.broadcast %3 : vector<64x1xf32> to vector<64x32xf32>
    %5 = arith.addf %2, %4 : vector<64x32xf32>
    %cst_5 = arith.constant 0.00999999977 : f32
    %6 = vector.broadcast %cst_5 : f32 to vector<64x32xf32>
    %7 = arith.mulf %6, %5 : vector<64x32xf32>
    %8 = arith.maximumf %5, %7 : vector<64x32xf32>
    %9 = arith.truncf %8 : vector<64x32xf32> to vector<64x32xbf16>
    %c0_6 = arith.constant 0 : index
    %c0_7 = arith.constant 0 : index
    %10 = vector.load %arg4[%c0_6, %c0_7] : memref<64x32xbf16, #tpu.memory_space<vmem>>, vector<64x32xbf16>
    tpu.vector_store %arg4[%c0_6, %c0_7], %9 {strides = array<i32>} : memref<64x32xbf16, #tpu.memory_space<vmem>>, vector<64x32xbf16>,
    return
  }
  func.func @transform_0(%arg0: i32) -> (i32, i32) {
    %c0_i32 = arith.constant 0 : i32
    %c0_i32_0 = arith.constant 0 : i32
    %c0_i32_1 = arith.constant 0 : i32
    return %c0_i32, %c0_i32_0 : i32, i32
  }
  func.func @transform_1(%arg0: i32) -> (i32, i32) {
    %c0_i32 = arith.constant 0 : i32
    %c0_i32_0 = arith.constant 0 : i32
    return %c0_i32, %arg0 : i32, i32
  }
  func.func @transform_2(%arg0: i32) -> (i32, i32) {
    %c0_i32 = arith.constant 0 : i32
    %c0_i32_0 = arith.constant 0 : i32
    %c0_i32_1 = arith.constant 0 : i32
    return %c0_i32, %c0_i32_0 : i32, i32
  }
  func.func @transform_3(%arg0: i32) -> (i32, i32) {
    %c0_i32 = arith.constant 0 : i32
    %c0_i32_0 = arith.constant 0 : i32
    return %c0_i32, %arg0 : i32, i32
  }
}

module attributes {stable_mosaic.version = 11 : i64} {
  func.func @_concat_1x1_kernel(%arg0: i32, %arg1: memref<8x8xbf16, #tpu.memory_space<vmem>>, %arg2: memref<8x256xbf16, #tpu.memory_space<vmem>>, %arg3: memref<8x8xbf16, #tpu.memory_space<vmem>>, %arg4: memref<8x256xbf16, #tpu.memory_space<vmem>>, %arg5: memref<8x1xf32, #tpu.memory_space<vmem>>, %arg6: memref<8x256xbf16, #tpu.memory_space<vmem>>) attributes {dimension_semantics = [#tpu.dimension_semantics<parallel>], iteration_bounds = array<i64: 1>, scalar_prefetch = 0 : i64, scratch_operands = 0 : i64, tpu.core_type = #tpu.core_type<tc>, window_params = [{pipeline_mode = #tpu.pipeline_mode<synchronous>, transform_indices = @transform_0, window_bounds = array<i64: 8, 8>}, {transform_indices = @transform_1, window_bounds = array<i64: 8, 256>}, {pipeline_mode = #tpu.pipeline_mode<synchronous>, transform_indices = @transform_2, window_bounds = array<i64: 8, 8>}, {transform_indices = @transform_3, window_bounds = array<i64: 8, 256>}, {pipeline_mode = #tpu.pipeline_mode<synchronous>, transform_indices = @transform_4, window_bounds = array<i64: 8, 1>}, {transform_indices = @transform_5, window_bounds = array<i64: 8, 256>}]} {
    %c0 = arith.constant 0 : index
    %c0_0 = arith.constant 0 : index
    %0 = vector.load %arg1[%c0, %c0_0] : memref<8x8xbf16, #tpu.memory_space<vmem>>, vector<8x8xbf16>
    %c0_1 = arith.constant 0 : index
    %c0_2 = arith.constant 0 : index
    %1 = vector.load %arg2[%c0_1, %c0_2] : memref<8x256xbf16, #tpu.memory_space<vmem>>, vector<8x256xbf16>
    %cst = arith.constant dense<0.000000e+00> : vector<8x256xf32>
    %2 = tpu.matmul %0, %1, %cst {dimension_numbers = #tpu.dot_dimension_numbers<[1], [0], [0], [1], [0, 0, 1, 1], [], []>} : vector<8x8xbf16>, vector<8x256xbf16>, vector<8x256xf32> -> vector<8x256xf32>
    %c0_3 = arith.constant 0 : index
    %c0_4 = arith.constant 0 : index
    %3 = vector.load %arg3[%c0_3, %c0_4] : memref<8x8xbf16, #tpu.memory_space<vmem>>, vector<8x8xbf16>
    %c0_5 = arith.constant 0 : index
    %c0_6 = arith.constant 0 : index
    %4 = vector.load %arg4[%c0_5, %c0_6] : memref<8x256xbf16, #tpu.memory_space<vmem>>, vector<8x256xbf16>
    %cst_7 = arith.constant dense<0.000000e+00> : vector<8x256xf32>
    %5 = tpu.matmul %3, %4, %cst_7 {dimension_numbers = #tpu.dot_dimension_numbers<[1], [0], [0], [1], [0, 0, 1, 1], [], []>} : vector<8x8xbf16>, vector<8x256xbf16>, vector<8x256xf32> -> vector<8x256xf32>
    %6 = arith.addf %2, %5 : vector<8x256xf32>
    %c0_8 = arith.constant 0 : index
    %c0_9 = arith.constant 0 : index
    %7 = vector.load %arg5[%c0_8, %c0_9] : memref<8x1xf32, #tpu.memory_space<vmem>>, vector<8x1xf32>
    %8 = vector.broadcast %7 : vector<8x1xf32> to vector<8x256xf32>
    %9 = arith.addf %6, %8 : vector<8x256xf32>
    %cst_10 = arith.constant 0.00999999977 : f32
    %10 = vector.broadcast %cst_10 : f32 to vector<8x256xf32>
    %11 = arith.mulf %10, %9 : vector<8x256xf32>
    %12 = arith.maximumf %9, %11 : vector<8x256xf32>
    %13 = arith.truncf %12 : vector<8x256xf32> to vector<8x256xbf16>
    %c0_11 = arith.constant 0 : index
    %c0_12 = arith.constant 0 : index
    %14 = vector.load %arg6[%c0_11, %c0_12] : memref<8x256xbf16, #tpu.memory_space<vmem>>, vector<8x256xbf16>
    tpu.vector_store %arg6[%c0_11, %c0_12], %13 {strides = array<i32>} : memref<8x256xbf16, #tpu.memory_space<vmem>>, vector<8x256xbf16>,
    return
  }
  func.func @transform_0(%arg0: i32) -> (i32, i32) {
    %c0_i32 = arith.constant 0 : i32
    %c0_i32_0 = arith.constant 0 : i32
    %c0_i32_1 = arith.constant 0 : i32
    return %c0_i32, %c0_i32_0 : i32, i32
  }
  func.func @transform_1(%arg0: i32) -> (i32, i32) {
    %c0_i32 = arith.constant 0 : i32
    %c0_i32_0 = arith.constant 0 : i32
    return %c0_i32, %arg0 : i32, i32
  }
  func.func @transform_2(%arg0: i32) -> (i32, i32) {
    %c0_i32 = arith.constant 0 : i32
    %c0_i32_0 = arith.constant 0 : i32
    %c0_i32_1 = arith.constant 0 : i32
    return %c0_i32, %c0_i32_0 : i32, i32
  }
  func.func @transform_3(%arg0: i32) -> (i32, i32) {
    %c0_i32 = arith.constant 0 : i32
    %c0_i32_0 = arith.constant 0 : i32
    return %c0_i32, %arg0 : i32, i32
  }
  func.func @transform_4(%arg0: i32) -> (i32, i32) {
    %c0_i32 = arith.constant 0 : i32
    %c0_i32_0 = arith.constant 0 : i32
    %c0_i32_1 = arith.constant 0 : i32
    return %c0_i32, %c0_i32_0 : i32, i32
  }
  func.func @transform_5(%arg0: i32) -> (i32, i32) {
    %c0_i32 = arith.constant 0 : i32
    %c0_i32_0 = arith.constant 0 : i32
    return %c0_i32, %arg0 : i32, i32
  }
}

module attributes {stable_mosaic.version = 11 : i64} {
  func.func @_gemm_bias_act_kernel(%arg0: i32, %arg1: memref<8x72xbf16, #tpu.memory_space<vmem>>, %arg2: memref<72x256xbf16, #tpu.memory_space<vmem>>, %arg3: memref<8x1xf32, #tpu.memory_space<vmem>>, %arg4: memref<8x256xbf16, #tpu.memory_space<vmem>>) attributes {dimension_semantics = [#tpu.dimension_semantics<parallel>], iteration_bounds = array<i64: 1>, scalar_prefetch = 0 : i64, scratch_operands = 0 : i64, tpu.core_type = #tpu.core_type<tc>, window_params = [{pipeline_mode = #tpu.pipeline_mode<synchronous>, transform_indices = @transform_0, window_bounds = array<i64: 8, 72>}, {transform_indices = @transform_1, window_bounds = array<i64: 72, 256>}, {pipeline_mode = #tpu.pipeline_mode<synchronous>, transform_indices = @transform_2, window_bounds = array<i64: 8, 1>}, {transform_indices = @transform_3, window_bounds = array<i64: 8, 256>}]} {
    %c0 = arith.constant 0 : index
    %c0_0 = arith.constant 0 : index
    %0 = vector.load %arg1[%c0, %c0_0] : memref<8x72xbf16, #tpu.memory_space<vmem>>, vector<8x72xbf16>
    %c0_1 = arith.constant 0 : index
    %c0_2 = arith.constant 0 : index
    %1 = vector.load %arg2[%c0_1, %c0_2] : memref<72x256xbf16, #tpu.memory_space<vmem>>, vector<72x256xbf16>
    %cst = arith.constant dense<0.000000e+00> : vector<8x256xf32>
    %2 = tpu.matmul %0, %1, %cst {dimension_numbers = #tpu.dot_dimension_numbers<[1], [0], [0], [1], [0, 0, 1, 1], [], []>} : vector<8x72xbf16>, vector<72x256xbf16>, vector<8x256xf32> -> vector<8x256xf32>
    %c0_3 = arith.constant 0 : index
    %c0_4 = arith.constant 0 : index
    %3 = vector.load %arg3[%c0_3, %c0_4] : memref<8x1xf32, #tpu.memory_space<vmem>>, vector<8x1xf32>
    %4 = vector.broadcast %3 : vector<8x1xf32> to vector<8x256xf32>
    %5 = arith.addf %2, %4 : vector<8x256xf32>
    %cst_5 = arith.constant 0.00999999977 : f32
    %6 = vector.broadcast %cst_5 : f32 to vector<8x256xf32>
    %7 = arith.mulf %6, %5 : vector<8x256xf32>
    %8 = arith.maximumf %5, %7 : vector<8x256xf32>
    %9 = arith.truncf %8 : vector<8x256xf32> to vector<8x256xbf16>
    %c0_6 = arith.constant 0 : index
    %c0_7 = arith.constant 0 : index
    %10 = vector.load %arg4[%c0_6, %c0_7] : memref<8x256xbf16, #tpu.memory_space<vmem>>, vector<8x256xbf16>
    tpu.vector_store %arg4[%c0_6, %c0_7], %9 {strides = array<i32>} : memref<8x256xbf16, #tpu.memory_space<vmem>>, vector<8x256xbf16>,
    return
  }
  func.func @transform_0(%arg0: i32) -> (i32, i32) {
    %c0_i32 = arith.constant 0 : i32
    %c0_i32_0 = arith.constant 0 : i32
    %c0_i32_1 = arith.constant 0 : i32
    return %c0_i32, %c0_i32_0 : i32, i32
  }
  func.func @transform_1(%arg0: i32) -> (i32, i32) {
    %c0_i32 = arith.constant 0 : i32
    %c0_i32_0 = arith.constant 0 : i32
    return %c0_i32, %arg0 : i32, i32
  }
  func.func @transform_2(%arg0: i32) -> (i32, i32) {
    %c0_i32 = arith.constant 0 : i32
    %c0_i32_0 = arith.constant 0 : i32
    %c0_i32_1 = arith.constant 0 : i32
    return %c0_i32, %c0_i32_0 : i32, i32
  }
  func.func @transform_3(%arg0: i32) -> (i32, i32) {
    %c0_i32 = arith.constant 0 : i32
    %c0_i32_0 = arith.constant 0 : i32
    return %c0_i32, %arg0 : i32, i32
  }
}

module attributes {stable_mosaic.version = 11 : i64} {
  func.func @_gemm_tail_kernel(%arg0: i32, %arg1: memref<8x72xbf16, #tpu.memory_space<vmem>>, %arg2: memref<72x256xbf16, #tpu.memory_space<vmem>>, %arg3: memref<8x1xf32, #tpu.memory_space<vmem>>, %arg4: memref<8x8xbf16, #tpu.memory_space<vmem>>, %arg5: memref<8x256xf32, #tpu.memory_space<vmem>>, %arg6: memref<8x256xbf16, #tpu.memory_space<vmem>>) attributes {dimension_semantics = [#tpu.dimension_semantics<parallel>], iteration_bounds = array<i64: 1>, scalar_prefetch = 0 : i64, scratch_operands = 0 : i64, tpu.core_type = #tpu.core_type<tc>, window_params = [{pipeline_mode = #tpu.pipeline_mode<synchronous>, transform_indices = @transform_0, window_bounds = array<i64: 8, 72>}, {transform_indices = @transform_1, window_bounds = array<i64: 72, 256>}, {pipeline_mode = #tpu.pipeline_mode<synchronous>, transform_indices = @transform_2, window_bounds = array<i64: 8, 1>}, {pipeline_mode = #tpu.pipeline_mode<synchronous>, transform_indices = @transform_3, window_bounds = array<i64: 8, 8>}, {transform_indices = @transform_4, window_bounds = array<i64: 8, 256>}, {transform_indices = @transform_5, window_bounds = array<i64: 8, 256>}]} {
    %c0 = arith.constant 0 : index
    %c0_0 = arith.constant 0 : index
    %0 = vector.load %arg1[%c0, %c0_0] : memref<8x72xbf16, #tpu.memory_space<vmem>>, vector<8x72xbf16>
    %c0_1 = arith.constant 0 : index
    %c0_2 = arith.constant 0 : index
    %1 = vector.load %arg2[%c0_1, %c0_2] : memref<72x256xbf16, #tpu.memory_space<vmem>>, vector<72x256xbf16>
    %cst = arith.constant dense<0.000000e+00> : vector<8x256xf32>
    %2 = tpu.matmul %0, %1, %cst {dimension_numbers = #tpu.dot_dimension_numbers<[1], [0], [0], [1], [0, 0, 1, 1], [], []>} : vector<8x72xbf16>, vector<72x256xbf16>, vector<8x256xf32> -> vector<8x256xf32>
    %c0_3 = arith.constant 0 : index
    %c0_4 = arith.constant 0 : index
    %3 = vector.load %arg3[%c0_3, %c0_4] : memref<8x1xf32, #tpu.memory_space<vmem>>, vector<8x1xf32>
    %4 = vector.broadcast %3 : vector<8x1xf32> to vector<8x256xf32>
    %5 = arith.addf %2, %4 : vector<8x256xf32>
    %cst_5 = arith.constant 0.00999999977 : f32
    %6 = vector.broadcast %cst_5 : f32 to vector<8x256xf32>
    %7 = arith.mulf %6, %5 : vector<8x256xf32>
    %8 = arith.maximumf %5, %7 : vector<8x256xf32>
    %c0_6 = arith.constant 0 : index
    %c0_7 = arith.constant 0 : index
    %9 = vector.load %arg4[%c0_6, %c0_7] : memref<8x8xbf16, #tpu.memory_space<vmem>>, vector<8x8xbf16>
    %10 = arith.truncf %8 : vector<8x256xf32> to vector<8x256xbf16>
    %cst_8 = arith.constant dense<0.000000e+00> : vector<8x256xf32>
    %11 = tpu.matmul %9, %10, %cst_8 {dimension_numbers = #tpu.dot_dimension_numbers<[1], [0], [0], [1], [0, 0, 1, 1], [], []>} : vector<8x8xbf16>, vector<8x256xbf16>, vector<8x256xf32> -> vector<8x256xf32>
    %c0_9 = arith.constant 0 : index
    %c0_10 = arith.constant 0 : index
    %12 = vector.load %arg5[%c0_9, %c0_10] : memref<8x256xf32, #tpu.memory_space<vmem>>, vector<8x256xf32>
    %13 = arith.addf %11, %12 : vector<8x256xf32>
    %14 = arith.truncf %13 : vector<8x256xf32> to vector<8x256xbf16>
    %c0_11 = arith.constant 0 : index
    %c0_12 = arith.constant 0 : index
    %15 = vector.load %arg6[%c0_11, %c0_12] : memref<8x256xbf16, #tpu.memory_space<vmem>>, vector<8x256xbf16>
    tpu.vector_store %arg6[%c0_11, %c0_12], %14 {strides = array<i32>} : memref<8x256xbf16, #tpu.memory_space<vmem>>, vector<8x256xbf16>,
    return
  }
  func.func @transform_0(%arg0: i32) -> (i32, i32) {
    %c0_i32 = arith.constant 0 : i32
    %c0_i32_0 = arith.constant 0 : i32
    %c0_i32_1 = arith.constant 0 : i32
    return %c0_i32, %c0_i32_0 : i32, i32
  }
  func.func @transform_1(%arg0: i32) -> (i32, i32) {
    %c0_i32 = arith.constant 0 : i32
    %c0_i32_0 = arith.constant 0 : i32
    return %c0_i32, %arg0 : i32, i32
  }
  func.func @transform_2(%arg0: i32) -> (i32, i32) {
    %c0_i32 = arith.constant 0 : i32
    %c0_i32_0 = arith.constant 0 : i32
    %c0_i32_1 = arith.constant 0 : i32
    return %c0_i32, %c0_i32_0 : i32, i32
  }
  func.func @transform_3(%arg0: i32) -> (i32, i32) {
    %c0_i32 = arith.constant 0 : i32
    %c0_i32_0 = arith.constant 0 : i32
    %c0_i32_1 = arith.constant 0 : i32
    return %c0_i32, %c0_i32_0 : i32, i32
  }
  func.func @transform_4(%arg0: i32) -> (i32, i32) {
    %c0_i32 = arith.constant 0 : i32
    %c0_i32_0 = arith.constant 0 : i32
    return %c0_i32, %arg0 : i32, i32
  }
  func.func @transform_5(%arg0: i32) -> (i32, i32) {
    %c0_i32 = arith.constant 0 : i32
    %c0_i32_0 = arith.constant 0 : i32
    return %c0_i32, %arg0 : i32, i32
  }
}

module attributes {stable_mosaic.version = 11 : i64} {
  func.func @_gemm_tail_kernel(%arg0: i32, %arg1: memref<8x72xbf16, #tpu.memory_space<vmem>>, %arg2: memref<72x256xbf16, #tpu.memory_space<vmem>>, %arg3: memref<8x1xf32, #tpu.memory_space<vmem>>, %arg4: memref<8x8xbf16, #tpu.memory_space<vmem>>, %arg5: memref<8x256xbf16, #tpu.memory_space<vmem>>, %arg6: memref<8x256xbf16, #tpu.memory_space<vmem>>) attributes {dimension_semantics = [#tpu.dimension_semantics<parallel>], iteration_bounds = array<i64: 1>, scalar_prefetch = 0 : i64, scratch_operands = 0 : i64, tpu.core_type = #tpu.core_type<tc>, window_params = [{pipeline_mode = #tpu.pipeline_mode<synchronous>, transform_indices = @transform_0, window_bounds = array<i64: 8, 72>}, {transform_indices = @transform_1, window_bounds = array<i64: 72, 256>}, {pipeline_mode = #tpu.pipeline_mode<synchronous>, transform_indices = @transform_2, window_bounds = array<i64: 8, 1>}, {pipeline_mode = #tpu.pipeline_mode<synchronous>, transform_indices = @transform_3, window_bounds = array<i64: 8, 8>}, {transform_indices = @transform_4, window_bounds = array<i64: 8, 256>}, {transform_indices = @transform_5, window_bounds = array<i64: 8, 256>}]} {
    %c0 = arith.constant 0 : index
    %c0_0 = arith.constant 0 : index
    %0 = vector.load %arg1[%c0, %c0_0] : memref<8x72xbf16, #tpu.memory_space<vmem>>, vector<8x72xbf16>
    %c0_1 = arith.constant 0 : index
    %c0_2 = arith.constant 0 : index
    %1 = vector.load %arg2[%c0_1, %c0_2] : memref<72x256xbf16, #tpu.memory_space<vmem>>, vector<72x256xbf16>
    %cst = arith.constant dense<0.000000e+00> : vector<8x256xf32>
    %2 = tpu.matmul %0, %1, %cst {dimension_numbers = #tpu.dot_dimension_numbers<[1], [0], [0], [1], [0, 0, 1, 1], [], []>} : vector<8x72xbf16>, vector<72x256xbf16>, vector<8x256xf32> -> vector<8x256xf32>
    %c0_3 = arith.constant 0 : index
    %c0_4 = arith.constant 0 : index
    %3 = vector.load %arg3[%c0_3, %c0_4] : memref<8x1xf32, #tpu.memory_space<vmem>>, vector<8x1xf32>
    %4 = vector.broadcast %3 : vector<8x1xf32> to vector<8x256xf32>
    %5 = arith.addf %2, %4 : vector<8x256xf32>
    %cst_5 = arith.constant 0.00999999977 : f32
    %6 = vector.broadcast %cst_5 : f32 to vector<8x256xf32>
    %7 = arith.mulf %6, %5 : vector<8x256xf32>
    %8 = arith.maximumf %5, %7 : vector<8x256xf32>
    %c0_6 = arith.constant 0 : index
    %c0_7 = arith.constant 0 : index
    %9 = vector.load %arg4[%c0_6, %c0_7] : memref<8x8xbf16, #tpu.memory_space<vmem>>, vector<8x8xbf16>
    %10 = arith.truncf %8 : vector<8x256xf32> to vector<8x256xbf16>
    %cst_8 = arith.constant dense<0.000000e+00> : vector<8x256xf32>
    %11 = tpu.matmul %9, %10, %cst_8 {dimension_numbers = #tpu.dot_dimension_numbers<[1], [0], [0], [1], [0, 0, 1, 1], [], []>} : vector<8x8xbf16>, vector<8x256xbf16>, vector<8x256xf32> -> vector<8x256xf32>
    %c0_9 = arith.constant 0 : index
    %c0_10 = arith.constant 0 : index
    %12 = vector.load %arg5[%c0_9, %c0_10] : memref<8x256xbf16, #tpu.memory_space<vmem>>, vector<8x256xbf16>
    %13 = arith.extf %12 : vector<8x256xbf16> to vector<8x256xf32>
    %14 = arith.addf %11, %13 : vector<8x256xf32>
    %15 = arith.truncf %14 : vector<8x256xf32> to vector<8x256xbf16>
    %c0_11 = arith.constant 0 : index
    %c0_12 = arith.constant 0 : index
    %16 = vector.load %arg6[%c0_11, %c0_12] : memref<8x256xbf16, #tpu.memory_space<vmem>>, vector<8x256xbf16>
    tpu.vector_store %arg6[%c0_11, %c0_12], %15 {strides = array<i32>} : memref<8x256xbf16, #tpu.memory_space<vmem>>, vector<8x256xbf16>,
    return
  }
  func.func @transform_0(%arg0: i32) -> (i32, i32) {
    %c0_i32 = arith.constant 0 : i32
    %c0_i32_0 = arith.constant 0 : i32
    %c0_i32_1 = arith.constant 0 : i32
    return %c0_i32, %c0_i32_0 : i32, i32
  }
  func.func @transform_1(%arg0: i32) -> (i32, i32) {
    %c0_i32 = arith.constant 0 : i32
    %c0_i32_0 = arith.constant 0 : i32
    return %c0_i32, %arg0 : i32, i32
  }
  func.func @transform_2(%arg0: i32) -> (i32, i32) {
    %c0_i32 = arith.constant 0 : i32
    %c0_i32_0 = arith.constant 0 : i32
    %c0_i32_1 = arith.constant 0 : i32
    return %c0_i32, %c0_i32_0 : i32, i32
  }
  func.func @transform_3(%arg0: i32) -> (i32, i32) {
    %c0_i32 = arith.constant 0 : i32
    %c0_i32_0 = arith.constant 0 : i32
    %c0_i32_1 = arith.constant 0 : i32
    return %c0_i32, %c0_i32_0 : i32, i32
  }
  func.func @transform_4(%arg0: i32) -> (i32, i32) {
    %c0_i32 = arith.constant 0 : i32
    %c0_i32_0 = arith.constant 0 : i32
    return %c0_i32, %arg0 : i32, i32
  }
  func.func @transform_5(%arg0: i32) -> (i32, i32) {
    %c0_i32 = arith.constant 0 : i32
    %c0_i32_0 = arith.constant 0 : i32
    return %c0_i32, %arg0 : i32, i32
  }
}

module attributes {stable_mosaic.version = 11 : i64} {
  func.func @_gemm_bias_act_kernel(%arg0: i32, %arg1: memref<8x216xbf16, #tpu.memory_space<vmem>>, %arg2: memref<216x256xbf16, #tpu.memory_space<vmem>>, %arg3: memref<8x1xf32, #tpu.memory_space<vmem>>, %arg4: memref<8x256xf32, #tpu.memory_space<vmem>>) attributes {dimension_semantics = [#tpu.dimension_semantics<parallel>], iteration_bounds = array<i64: 1>, scalar_prefetch = 0 : i64, scratch_operands = 0 : i64, tpu.core_type = #tpu.core_type<tc>, window_params = [{pipeline_mode = #tpu.pipeline_mode<synchronous>, transform_indices = @transform_0, window_bounds = array<i64: 8, 216>}, {transform_indices = @transform_1, window_bounds = array<i64: 216, 256>}, {pipeline_mode = #tpu.pipeline_mode<synchronous>, transform_indices = @transform_2, window_bounds = array<i64: 8, 1>}, {transform_indices = @transform_3, window_bounds = array<i64: 8, 256>}]} {
    %c0 = arith.constant 0 : index
    %c0_0 = arith.constant 0 : index
    %0 = vector.load %arg1[%c0, %c0_0] : memref<8x216xbf16, #tpu.memory_space<vmem>>, vector<8x216xbf16>
    %c0_1 = arith.constant 0 : index
    %c0_2 = arith.constant 0 : index
    %1 = vector.load %arg2[%c0_1, %c0_2] : memref<216x256xbf16, #tpu.memory_space<vmem>>, vector<216x256xbf16>
    %cst = arith.constant dense<0.000000e+00> : vector<8x256xf32>
    %2 = tpu.matmul %0, %1, %cst {dimension_numbers = #tpu.dot_dimension_numbers<[1], [0], [0], [1], [0, 0, 1, 1], [], []>} : vector<8x216xbf16>, vector<216x256xbf16>, vector<8x256xf32> -> vector<8x256xf32>
    %c0_3 = arith.constant 0 : index
    %c0_4 = arith.constant 0 : index
    %3 = vector.load %arg3[%c0_3, %c0_4] : memref<8x1xf32, #tpu.memory_space<vmem>>, vector<8x1xf32>
    %4 = vector.broadcast %3 : vector<8x1xf32> to vector<8x256xf32>
    %5 = arith.addf %2, %4 : vector<8x256xf32>
    %c0_5 = arith.constant 0 : index
    %c0_6 = arith.constant 0 : index
    %6 = vector.load %arg4[%c0_5, %c0_6] : memref<8x256xf32, #tpu.memory_space<vmem>>, vector<8x256xf32>
    tpu.vector_store %arg4[%c0_5, %c0_6], %5 {strides = array<i32>} : memref<8x256xf32, #tpu.memory_space<vmem>>, vector<8x256xf32>,
    return
  }
  func.func @transform_0(%arg0: i32) -> (i32, i32) {
    %c0_i32 = arith.constant 0 : i32
    %c0_i32_0 = arith.constant 0 : i32
    %c0_i32_1 = arith.constant 0 : i32
    return %c0_i32, %c0_i32_0 : i32, i32
  }
  func.func @transform_1(%arg0: i32) -> (i32, i32) {
    %c0_i32 = arith.constant 0 : i32
    %c0_i32_0 = arith.constant 0 : i32
    return %c0_i32, %arg0 : i32, i32
  }
  func.func @transform_2(%arg0: i32) -> (i32, i32) {
    %c0_i32 = arith.constant 0 : i32
    %c0_i32_0 = arith.constant 0 : i32
    %c0_i32_1 = arith.constant 0 : i32
    return %c0_i32, %c0_i32_0 : i32, i32
  }
  func.func @transform_3(%arg0: i32) -> (i32, i32) {
    %c0_i32 = arith.constant 0 : i32
    %c0_i32_0 = arith.constant 0 : i32
    return %c0_i32, %arg0 : i32, i32
  }
}

</mosaic_0001>

<bundles_post_ra>
// kernel: hourglass2_forward.24
= control target key start
LH: loop header
LB: loop body
LE: loop exit
PB: predicated region body
PF: predicated region fallthrough
CT: control target
= control target key end

     0   :  { %vm108_vm0 = vcmask 1045504   ;;  %v214_v1 = vmov 0   ;;  %vm104_vm1 = vcmask 883712   ;;  %s286_s1 = inlined_call_operand.vmem [shape: bf16[108,256], index: 1, kind: input, shape index: {}]   ;;  %s287_s2 = inlined_call_operand.vmem [shape: f32[8,1], index: 2, kind: input, shape index: {}]   ;;  %s288_s0 = inlined_call_operand.vmem [shape: bf16[8,108], index: 0, kind: input, shape index: {}]   ;;  %s289_s3 = inlined_call_operand.vmem [shape: bf16[8,256], index: 3, kind: output, shape index: {}]  }
   0x1   :  { %v193_v0 = vld [vmem:[%s286_s1 + $0x64] ss:$8 sps:$4 sm:$0x3f]   ;;  %147 = vmatprep.mubr.bf16.mxu0 %v214_v1  ;;  %192 = vset.pattern.permute.xlu0 %v214_v1  ;;  %v195_v2 = vld [vmem:[%s286_s1 + $0x60] ss:$8 sps:$4 sm:$0x3f]  }
   0x2   :  { %187 = vmatprep.subr.msk.bf16.mxu0 %vm108_vm0, %v193_v0  ;;  %v196_v3 = vld [vmem:[%s286_s1 + $0x54] ss:$8 sps:$4 sm:$0xff]   ;;  %v110_v4 = vsel %vm108_vm0, %v195_v2, 0  ;;  %v198_v5 = vld [vmem:[%s286_s1 + $0x50] ss:$8 sps:$4 sm:$0xff]   ;;  %v30_v9 = vld [vmem:[%s287_s2] sm:$0xff] }
   0x3   :  { %118 = vmatpush1.bf16.msra.mxu0 %v110_v4  ;;  %v199_v6 = vld [vmem:[%s286_s1 + $0x44] ss:$8 sps:$4 sm:$0xff]   ;;  %v201_v7 = vld [vmem:[%s286_s1 + $0x40] ss:$8 sps:$4 sm:$0xff]   ;;  %v202_v8 = vld [vmem:[%s286_s1 + $0x34] ss:$8 sps:$4 sm:$0xff]   ;;  %33 = vperm.xlu0 %192, %v30_v9  }
   0x4   :  { %119 = vmatprep.subr.bf16.mxu0 %v196_v3  ;;  %v204_v10 = vld [vmem:[%s286_s1 + $0x30] ss:$8 sps:$4 sm:$0xff]   ;;  %v205_v11 = vld [vmem:[%s286_s1 + $0x24] ss:$8 sps:$4 sm:$0xff]   ;;  %v207_v12 = vld [vmem:[%s286_s1 + $0x20] ss:$8 sps:$4 sm:$0xff]  }
   0x5   :  { %v208_v13 = vld [vmem:[%s286_s1 + $0x14] ss:$8 sps:$4 sm:$0xff]   ;;  %v210_v14 = vld [vmem:[%s286_s1 + $0x10] ss:$8 sps:$4 sm:$0xff]   ;;  %v211_v15 = vld [vmem:[%s286_s1 + $0x4] ss:$8 sps:$4 sm:$0xff]  }
   0x6   :  { %v213_v16 = vld [vmem:[%s286_s1] ss:$8 sps:$4 sm:$0xff]  }
   0x7   :  { %120 = vmatpush1.bf16.msra.mxu0 %v198_v5  ;;  %v15_v17 = vld [vmem:[%s288_s0] sm:$0xf] }
   0x8   :  { %121 = vmatprep.subr.bf16.mxu0 %v199_v6 }
   0xb   :  { %122 = vmatpush1.bf16.msra.mxu0 %v201_v7 }
   0xc   :  { %123 = vmatprep.subr.bf16.mxu0 %v202_v8 }
   0xf   :  { %124 = vmatpush1.bf16.msra.mxu0 %v204_v10 }
  0x10   :  { %125 = vmatprep.subr.bf16.mxu0 %v205_v11 }
  0x13   :  { %126 = vmatpush1.bf16.msra.mxu0 %v207_v12 }
  0x14   :  { %127 = vmatprep.subr.bf16.mxu0 %v208_v13 }
  0x17   :  { %128 = vmatpush1.bf16.msra.mxu0 %v210_v14 }
  0x18   :  { %129 = vmatprep.subr.bf16.mxu0 %v211_v15 }
  0x1b   :  { %130 = vmatpush1.bf16.msra.mxu0 %v213_v16 }
  0x1e   :  { %188 = vmatmul.mubr.msk.bf16.vlgmr.msra.gmra.mxu0 %vm104_vm1, %v15_v17 }
  0x7e   :  { %v34_v18 = vpop.permute.xlu0 %33 }
  0xde   :  { %v149_v19 = vpop.f32.mrf.mxu0 }
  0xdf   :  { %v150_v20 = vadd.f32 %v149_v19, %v34_v18 }
  0xe0   :  { %v151_v21 = vpop.f32.mrf.mxu0 }
  0xe1   :  { %v156_v22 = vmul.f32 0.01, %v150_v20  ;;  %v152_v23 = vadd.f32 %v151_v21, %v34_v18 }
  0xe2   :  { %v153_v24 = vpop.f32.mrf.mxu0 }
  0xe3   :  { %v157_v25 = vmul.f32 0.01, %v152_v23  ;;  %v158_v27 = vmax.f32 %v150_v20, %v156_v22 }
  0xe4   :  { %v154_v26 = vpop.f32.mrf.mxu0 }
  0xe5   :  { %v159_v28 = vmax.f32 %v152_v23, %v157_v25 }
  0xe7   :  { %v190_v29 = vpack.c.bf16 %v159_v28, %v158_v27 }
  0xe9   :  { %168 = vst [vmem:[%s289_s3] sm:$0xff] %v190_v29 }

// kernel: hourglass2_forward.25
= control target key start
LH: loop header
LB: loop body
LE: loop exit
PB: predicated region body
PF: predicated region fallthrough
CT: control target
= control target key end

     0   :  { %v338_v1 = vmov 0   ;;  %vm190_vm0 = vcmask 719872   ;;  %vm194_vm1 = vcmask 1043456   ;;  %s449_s1 = inlined_call_operand.vmem [shape: bf16[216,256], index: 1, kind: input, shape index: {}]   ;;  %s450_s0 = inlined_call_operand.vmem [shape: bf16[8,216], index: 0, kind: input, shape index: {}]   ;;  %s451_s2 = inlined_call_operand.vmem [shape: f32[8,1], index: 2, kind: input, shape index: {}]   ;;  %s452_s3 = inlined_call_operand.vmem [shape: bf16[8,256], index: 3, kind: output, shape index: {}]  }
   0x1   :  { %v295_v0 = vld [vmem:[%s449_s1 + $0x74] ss:$8 sps:$4 sm:$0xff]   ;;  %294 = vset.pattern.permute.xlu0 %v338_v1  ;;  %v297_v2 = vld [vmem:[%s449_s1 + $0x70] ss:$8 sps:$4 sm:$0xff]   ;;  %v298_v3 = vld [vmem:[%s449_s1 + $0x64] ss:$8 sps:$4 sm:$0xff]  }
   0x2   :  { %201 = vmatprep.subr.bf16.mxu0 %v295_v0  ;;  %v300_v4 = vld [vmem:[%s449_s1 + $0x60] ss:$8 sps:$4 sm:$0xff]   ;;  %v301_v5 = vld [vmem:[%s449_s1 + $0x54] ss:$8 sps:$4 sm:$0xff]   ;;  %v303_v6 = vld [vmem:[%s449_s1 + $0x50] ss:$8 sps:$4 sm:$0xff]  }
   0x3   :  { %202 = vmatpush1.bf16.msra.mxu0 %v297_v2  ;;  %v304_v7 = vld [vmem:[%s449_s1 + $0x44] ss:$8 sps:$4 sm:$0xff]   ;;  %v306_v8 = vld [vmem:[%s449_s1 + $0x40] ss:$8 sps:$4 sm:$0xff]   ;;  %v307_v9 = vld [vmem:[%s449_s1 + $0x34] ss:$8 sps:$4 sm:$0xff]  }
   0x4   :  { %203 = vmatprep.subr.bf16.mxu0 %v298_v3  ;;  %v309_v10 = vld [vmem:[%s449_s1 + $0x30] ss:$8 sps:$4 sm:$0xff]   ;;  %v310_v11 = vld [vmem:[%s449_s1 + $0x24] ss:$8 sps:$4 sm:$0xff]   ;;  %v312_v15 = vld [vmem:[%s449_s1 + $0x20] ss:$8 sps:$4 sm:$0xff]  }
   0x5   :  { %v15_v12 = vld [vmem:[%s450_s0] sm:$0xff]  ;;  %v313_v16 = vld [vmem:[%s449_s1 + $0x14] ss:$8 sps:$4 sm:$0xff]   ;;  %v315_v17 = vld [vmem:[%s449_s1 + $0x10] ss:$8 sps:$4 sm:$0xff]  }
   0x6   :  { %v260_v13 = vcombine.high %v15_v12, %v15_v12  ;;  %v43_v14 = vld [vmem:[%s451_s2] sm:$0xff]  ;;  %v42_v19 = vld [vmem:[%s449_s1 + $0xd0] sm:$0xff]  ;;  %v259_v34 = vcombine.low %v15_v12, %v15_v12 }
   0x7   :  { %204 = vmatpush1.bf16.msra.mxu0 %v300_v4  ;;  %46 = vperm.xlu0 %294, %v43_v14   ;;  %v316_v18 = vld [vmem:[%s449_s1 + $0x4] ss:$8 sps:$4 sm:$0xff]   ;;  %v318_v20 = vld [vmem:[%s449_s1] ss:$8 sps:$4 sm:$0xff]   ;;  %v288_v21 = vcombine.high %v42_v19, %v42_v19  ;;  %v287_v22 = vcombine.low %v42_v19, %v42_v19  ;;  %v324_v26 = vld [vmem:[%s449_s1 + $0xb4] ss:$8 sps:$4 sm:$0xff]  }
   0x8   :  { %205 = vmatprep.subr.bf16.mxu0 %v301_v5  ;;  %290 = vmatprep.mubr.msk.bf16.mxu0 %vm190_vm0, %v260_v13  ;;  %v321_v24 = vld [vmem:[%s449_s1 + $0xc4] ss:$8 sps:$4 sm:$0xff]   ;;  %v323_v25 = vld [vmem:[%s449_s1 + $0xc0] ss:$8 sps:$4 sm:$0xff]   ;;  %v326_v27 = vld [vmem:[%s449_s1 + $0xb0] ss:$8 sps:$4 sm:$0xff]  }
   0x9   :  { %v196_v23 = vsel %vm194_vm1, %v287_v22, 0  ;;  %v327_v28 = vld [vmem:[%s449_s1 + $0xa4] ss:$8 sps:$4 sm:$0xff]   ;;  %v329_v29 = vld [vmem:[%s449_s1 + $0xa0] ss:$8 sps:$4 sm:$0xff]  }
   0xa   :  { %v330_v30 = vld [vmem:[%s449_s1 + $0x94] ss:$8 sps:$4 sm:$0xff]   ;;  %v332_v31 = vld [vmem:[%s449_s1 + $0x90] ss:$8 sps:$4 sm:$0xff]   ;;  %v333_v32 = vld [vmem:[%s449_s1 + $0x84] ss:$8 sps:$4 sm:$0xff]  }
   0xb   :  { %206 = vmatpush1.bf16.msra.mxu0 %v303_v6  ;;  %v335_v33 = vld [vmem:[%s449_s1 + $0x80] ss:$8 sps:$4 sm:$0xff]  }
   0xc   :  { %207 = vmatprep.subr.bf16.mxu0 %v304_v7 }
   0xf   :  { %208 = vmatpush1.bf16.msra.mxu0 %v306_v8 }
  0x10   :  { %209 = vmatprep.subr.bf16.mxu0 %v307_v9 }
  0x13   :  { %210 = vmatpush1.bf16.msra.mxu0 %v309_v10 }
  0x14   :  { %211 = vmatprep.subr.bf16.mxu0 %v310_v11 }
  0x17   :  { %212 = vmatpush1.bf16.msra.mxu0 %v312_v15 }
  0x18   :  { %213 = vmatprep.subr.bf16.mxu0 %v313_v16 }
  0x1b   :  { %214 = vmatpush1.bf16.msra.mxu0 %v315_v17 }
  0x1c   :  { %215 = vmatprep.subr.bf16.mxu0 %v316_v18 }
  0x1f   :  { %216 = vmatpush1.bf16.msra.mxu0 %v318_v20 }
  0x20   :  { %289 = vmatprep.subr.msk.bf16.mxu0 %vm194_vm1, %v288_v21 }
  0x23   :  { %222 = vmatpush2.bf16.msra.mxu0 %v196_v23 }
  0x24   :  { %223 = vmatprep.subr.bf16.mxu0 %v321_v24 }
  0x27   :  { %224 = vmatpush2.bf16.msra.mxu0 %v323_v25 }
  0x28   :  { %225 = vmatprep.subr.bf16.mxu0 %v324_v26 }
  0x2b   :  { %226 = vmatpush2.bf16.msra.mxu0 %v326_v27 }
  0x2c   :  { %227 = vmatprep.subr.bf16.mxu0 %v327_v28 }
  0x2f   :  { %228 = vmatpush2.bf16.msra.mxu0 %v329_v29 }
  0x30   :  { %229 = vmatprep.subr.bf16.mxu0 %v330_v30 }
  0x33   :  { %230 = vmatpush2.bf16.msra.mxu0 %v332_v31 }
  0x34   :  { %231 = vmatprep.subr.bf16.mxu0 %v333_v32 }
  0x37   :  { %232 = vmatpush2.bf16.msra.mxu0 %v335_v33 }
  0x3a   :  { %234 = vmatmul.mubr.bf16.vlgmr.msra.gmra.mxu0 %v259_v34 }
  0x82   :  { %v47_v35 = vpop.permute.xlu0 %46 }
  0xfa   :  { %v235_v36 = vpop.f32.mrf.mxu0 }
  0xfb   :  { %v236_v37 = vadd.f32 %v235_v36, %v47_v35 }
  0xfc   :  { %v237_v38 = vpop.f32.mrf.mxu0 }
  0xfd   :  { %v242_v39 = vmul.f32 0.01, %v236_v37  ;;  %v238_v40 = vadd.f32 %v237_v38, %v47_v35 }
  0xfe   :  { %v239_v41 = vpop.f32.mrf.mxu0 }
  0xff   :  { %v243_v42 = vmul.f32 0.01, %v238_v40  ;;  %v244_v44 = vmax.f32 %v236_v37, %v242_v39 }
 0x100   :  { %v240_v43 = vpop.f32.mrf.mxu0 }
 0x101   :  { %v245_v45 = vmax.f32 %v238_v40, %v243_v42 }
 0x103   :  { %v292_v46 = vpack.c.bf16 %v245_v45, %v244_v44 }
 0x105   :  { %254 = vst [vmem:[%s452_s3] sm:$0xff] %v292_v46 }

// kernel: hourglass2_forward.26
= control target key start
LH: loop header
LB: loop body
LE: loop exit
PB: predicated region body
PF: predicated region fallthrough
CT: control target
= control target key end

     0   :  { %v254_v0 = vmov 0   ;;  %vm146_vm0 = vcmask 719872   ;;  %vm150_vm1 = vcmask 1043456   ;;  %vm207_vm2 = vcmask 257024   ;;  %s335_s1 = inlined_call_operand.vmem [shape: bf16[216,32], index: 1, kind: input, shape index: {}]   ;;  %s336_s0 = inlined_call_operand.vmem [shape: bf16[16,216], index: 0, kind: input, shape index: {}]   ;;  %s337_s2 = inlined_call_operand.vmem [shape: f32[16,1], index: 2, kind: input, shape index: {}]   ;;  %s338_s3 = inlined_call_operand.vmem [shape: bf16[16,32], index: 3, kind: output, shape index: {}]  }
   0x1   :  { %154 = vmatprep.subr.bf16.mxu0 %v254_v0  ;;  %v237_v1 = vld [vmem:[%s335_s1 + $0x38] sm:$0xff]   ;;  %236 = vset.pattern.permute.xlu0 %v254_v0  ;;  %v238_v2 = vld [vmem:[%s335_s1 + $0x30] sm:$0xff]   ;;  %v239_v3 = vld [vmem:[%s335_s1 + $0x28] sm:$0xff]  }
   0x2   :  { %155 = vmatpush1.bf16.msra.mxu0 %v237_v1  ;;  %v240_v4 = vld [vmem:[%s335_s1 + $0x20] sm:$0xff]   ;;  %v241_v5 = vld [vmem:[%s335_s1 + $0x18] sm:$0xff]   ;;  %v45_v8 = vld [vmem:[%s337_s2 + $0x8] sm:$0xff] }
   0x3   :  { %156 = vmatprep.subr.bf16.mxu0 %v254_v0  ;;  %v253_v6 = vld [vmem:[%s336_s0 + $0x4] ss:$8 sps:$4 sm:$0xff]   ;;  %v242_v9 = vld [vmem:[%s335_s1 + $0x10] sm:$0xff]   ;;  %v245_v12 = vld [vmem:[%s335_s1 + $0x68] ss:$0 sps:$4 sm:$0xff]  }
   0x4   :  { %v44_v7 = vld [vmem:[%s337_s2] sm:$0xff]  ;;  %230 = vmatprep.mubr.msk.bf16.mxu0 %vm146_vm0, %v253_v6  ;;  %v243_v10 = vld [vmem:[%s335_s1 + $0x8] sm:$0xff]   ;;  %v152_v13 = vsel %vm150_vm1, %v245_v12, 0  ;;  %v247_v15 = vld [vmem:[%s335_s1 + $0x58] sm:$0xff]  }
   0x5   :  { %48 = vperm.xlu0 %236, %v44_v7   ;;  %v244_v11 = vld [vmem:[%s335_s1] sm:$0xff]   ;;  %v248_v16 = vld [vmem:[%s335_s1 + $0x50] sm:$0xff]   ;;  %v249_v17 = vld [vmem:[%s335_s1 + $0x48] sm:$0xff]  }
   0x6   :  { %157 = vmatpush1.bf16.msra.mxu0 %v238_v2  ;;  %v246_v14 = vld [vmem:[%s335_s1 + $0x60] sm:$0xff]  }
   0x7   :  { %158 = vmatprep.subr.bf16.mxu0 %v254_v0  ;;  %v250_v18 = vld [vmem:[%s335_s1 + $0x40] sm:$0xff]  }
   0x8   :  { %v251_v19 = vld [vmem:[%s336_s0] ss:$8 sps:$4 sm:$0xff]  }
   0x9   :  { %53 = vperm.xlu0 %236, %v45_v8  }
   0xa   :  { %159 = vmatpush1.bf16.msra.mxu0 %v239_v3 }
   0xb   :  { %160 = vmatprep.subr.bf16.mxu0 %v254_v0 }
   0xe   :  { %161 = vmatpush1.bf16.msra.mxu0 %v240_v4 }
   0xf   :  { %162 = vmatprep.subr.bf16.mxu0 %v254_v0 }
  0x12   :  { %163 = vmatpush1.bf16.msra.mxu0 %v241_v5 }
  0x13   :  { %164 = vmatprep.subr.bf16.mxu0 %v254_v0 }
  0x16   :  { %165 = vmatpush1.bf16.msra.mxu0 %v242_v9 }
  0x17   :  { %166 = vmatprep.subr.bf16.mxu0 %v254_v0 }
  0x1a   :  { %167 = vmatpush1.bf16.msra.mxu0 %v243_v10 }
  0x1b   :  { %168 = vmatprep.subr.bf16.mxu0 %v254_v0 }
  0x1e   :  { %169 = vmatpush1.bf16.msra.mxu0 %v244_v11 }
  0x1f   :  { %174 = vmatprep.subr.bf16.mxu0 %v254_v0 }
  0x22   :  { %175 = vmatpush2.bf16.msra.mxu0 %v152_v13 }
  0x23   :  { %176 = vmatprep.subr.bf16.mxu0 %v254_v0 }
  0x26   :  { %177 = vmatpush2.bf16.msra.mxu0 %v246_v14 }
  0x27   :  { %178 = vmatprep.subr.bf16.mxu0 %v254_v0 }
  0x2a   :  { %179 = vmatpush2.bf16.msra.mxu0 %v247_v15 }
  0x2b   :  { %180 = vmatprep.subr.bf16.mxu0 %v254_v0 }
  0x2e   :  { %181 = vmatpush2.bf16.msra.mxu0 %v248_v16 }
  0x2f   :  { %182 = vmatprep.subr.bf16.mxu0 %v254_v0 }
  0x32   :  { %183 = vmatpush2.bf16.msra.mxu0 %v249_v17 }
  0x33   :  { %184 = vmatprep.subr.bf16.mxu0 %v254_v0 }
  0x36   :  { %185 = vmatpush2.bf16.msra.mxu0 %v250_v18 }
  0x39   :  { %187 = vmatmul.mubr.bf16.vlgmr.msra.gmra.mxu0 %v251_v19 }
  0x80   :  { %v49_v20 = vpop.permute.xlu0 %48 }
  0x84   :  { %v54_v25 = vpop.permute.xlu0 %53 }
  0xf9   :  { %v188_v21 = vpop.f32.mrf.mxu0 }
  0xfa   :  { %v189_v22 = vadd.f32 %v188_v21, %v49_v20 }
  0xfb   :  { %v190_v23 = vpop.f32.mrf.mxu0 }
  0xfc   :  { %v195_v24 = vmul.f32 0.01, %v189_v22 }
  0xfd   :  { %v191_v26 = vpop.f32.mrf.mxu0 }
  0xfe   :  { %v197_v27 = vmax.f32 %v189_v22, %v195_v24  ;;  %v192_v28 = vadd.f32 %v191_v26, %v54_v25 }
  0xff   :  { %v193_v29 = vpop.f32.mrf.mxu0 }
 0x100   :  { %v233_v30 = vpack.c.bf16 %v197_v27, %v197_v27  ;;  %v196_v31 = vmul.f32 0.01, %v192_v28 }
 0x102   :  { %208 = vst.msk [vmem:[%s338_s3] sm:$0xf] %vm207_vm2, %v233_v30  ;;  %v198_v32 = vmax.f32 %v192_v28, %v196_v31 }
 0x104   :  { %v234_v33 = vpack.c.bf16 %v198_v32, %v198_v32 }
 0x106   :  { %209 = vst.msk [vmem:[%s338_s3 + $0x4] sm:$0xf] %vm207_vm2, %v234_v33 }

// kernel: hourglass2_forward.28
= control target key start
LH: loop header
LB: loop body
LE: loop exit
PB: predicated region body
PF: predicated region fallthrough
CT: control target
= control target key end

     0   :  { %v528_v0 = vmov 0   ;;  %vm287_vm0 = vcmask 392192   ;;  %vm409_vm1 = vcmask 27648   ;;  %s684_s1 = inlined_call_operand.vmem [shape: bf16[432,4], index: 1, kind: input, shape index: {}]   ;;  %s685_s0 = inlined_call_operand.vmem [shape: bf16[24,432], index: 0, kind: input, shape index: {}]   ;;  %s686_s2 = inlined_call_operand.vmem [shape: f32[24,1], index: 2, kind: input, shape index: {}]   ;;  %s687_s3 = inlined_call_operand.vmem [shape: bf16[24,4], index: 3, kind: output, shape index: {}]  }
   0x1   :  { %342 = vmatprep.subr.bf16.mxu1 %v528_v0  ;;  %v491_v1 = vld [vmem:[%s684_s1 + $0x78] sm:$0xff]   ;;  %489 = vset.pattern.permute.xlu0 %v528_v0  ;;  %v494_v4 = vld [vmem:[%s684_s1 + $0x70] sm:$0xff]   ;;  %v497_v7 = vld [vmem:[%s684_s1 + $0x68] sm:$0xff]  }
   0x2   :  { %v492_v2 = vld [vmem:[%s684_s1 + $0xb8] sm:$0xff]   ;;  %490 = vset.pattern.permute.xlu1 %v528_v0  ;;  %460 = vmatprep.subr.bf16.mxu0 %v491_v1  ;;  %v495_v5 = vld [vmem:[%s684_s1 + $0xb0] sm:$0xff]   ;;  %v498_v8 = vld [vmem:[%s684_s1 + $0xa8] sm:$0xff]  }
   0x3   :  { %v493_v3 = vld [vmem:[%s684_s1 + $0x38] sm:$0xff]   ;;  %343 = vmatpush1.bf16.msra.mxu1 %v492_v2  ;;  %v496_v6 = vld [vmem:[%s684_s1 + $0x30] sm:$0xff]   ;;  %v499_v9 = vld [vmem:[%s684_s1 + $0x28] sm:$0xff]  }
   0x4   :  { %461 = vmatpush3.bf16.msra.mxu0 %v493_v3  ;;  %344 = vmatprep.subr.bf16.mxu1 %v528_v0  ;;  %v500_v10 = vld [vmem:[%s684_s1 + $0x60] sm:$0xff]   ;;  %v503_v13 = vld [vmem:[%s684_s1 + $0x58] sm:$0xff]   ;;  %v506_v16 = vld [vmem:[%s684_s1 + $0x50] sm:$0xff]  }
   0x5   :  { %462 = vmatprep.subr.bf16.mxu0 %v494_v4  ;;  %v501_v11 = vld [vmem:[%s684_s1 + $0xa0] sm:$0xff]   ;;  %v504_v14 = vld [vmem:[%s684_s1 + $0x98] sm:$0xff]   ;;  %v507_v17 = vld [vmem:[%s684_s1 + $0x90] sm:$0xff]  }
   0x6   :  { %v502_v12 = vld [vmem:[%s684_s1 + $0x20] sm:$0xff]   ;;  %v505_v15 = vld [vmem:[%s684_s1 + $0x18] sm:$0xff]   ;;  %v508_v18 = vld [vmem:[%s684_s1 + $0x10] sm:$0xff]  }
   0x7   :  { %345 = vmatpush1.bf16.msra.mxu1 %v495_v5  ;;  %v509_v19 = vld [vmem:[%s684_s1 + $0x48] sm:$0xff]   ;;  %v512_v22 = vld [vmem:[%s684_s1 + $0x40] sm:$0xff]   ;;  %v518_v30 = vld [vmem:[%s684_s1 + $0xd0] sm:$0xff]  }
   0x8   :  { %463 = vmatpush3.bf16.msra.mxu0 %v496_v6  ;;  %346 = vmatprep.subr.bf16.mxu1 %v528_v0  ;;  %v510_v20 = vld [vmem:[%s684_s1 + $0x88] sm:$0xff]   ;;  %v517_v23 = vld [vmem:[%s685_s0 + $0x4] ss:$16 sps:$4 sm:$0xff]   ;;  %v515_v29 = vld [vmem:[%s685_s0] ss:$16 sps:$4 sm:$0xff]  }
   0x9   :  { %464 = vmatprep.subr.bf16.mxu0 %v497_v7  ;;  %v511_v21 = vld [vmem:[%s684_s1 + $0x8] sm:$0xff]   ;;  %v513_v24 = vld [vmem:[%s684_s1 + $0x80] sm:$0xff]   ;;  %326 = vmatprep.mubr.bf16.mxu0 %v517_v23  ;;  %v77_v31 = vld [vmem:[%s686_s2 + $0x10] sm:$0xff] }
   0xa   :  { %v514_v25 = vld [vmem:[%s684_s1] sm:$0xff]   ;;  %v525_v27 = vld [vmem:[%s685_s0 + $0xc] ss:$16 sps:$4 sm:$0xff]   ;;  %90 = vperm.xlu1 %490, %v77_v31   ;;  %v523_v38 = vld [vmem:[%s685_s0 + $0x8] ss:$16 sps:$4 sm:$0xff]  }
   0xb   :  { %347 = vmatpush1.bf16.msra.mxu1 %v498_v8  ;;  %v19_v26 = vld [vmem:[%s685_s0 + $0x20] sm:$0xff]  ;;  %452 = vmatprep.mubr.msk.bf16.mxu1 %vm287_vm0, %v525_v27  ;;  %v76_v33 = vld [vmem:[%s686_s2 + $0x8] sm:$0xff] }
   0xc   :  { %465 = vmatpush3.bf16.msra.mxu0 %v499_v9  ;;  %348 = vmatprep.subr.bf16.mxu1 %v528_v0  ;;  %v75_v28 = vld [vmem:[%s686_s2] sm:$0xff]  ;;  %v422_v32 = vcombine.high %v19_v26, %v19_v26  ;;  %v519_v34 = vld [vmem:[%s684_s1 + $0xc8] sm:$0xff]   ;;  %v421_v35 = vcombine.low %v19_v26, %v19_v26 }
   0xd   :  { %466 = vmatprep.subr.bf16.mxu0 %v500_v10  ;;  %80 = vperm.xlu0 %489, %v75_v28   ;;  %v522_v36 = vld [vmem:[%s684_s1 + $0xc0] sm:$0xff]   ;;  %v20_v37 = vld [vmem:[%s685_s0 + $0x28] sm:$0xff] }
   0xe   :  { %v424_v39 = vcombine.high %v20_v37, %v20_v37  ;;  %v423_v40 = vcombine.low %v20_v37, %v20_v37 }
   0xf   :  { %349 = vmatpush1.bf16.msra.mxu1 %v501_v11 }
  0x10   :  { %467 = vmatpush3.bf16.msra.mxu0 %v502_v12  ;;  %350 = vmatprep.subr.bf16.mxu1 %v528_v0 }
  0x11   :  { %468 = vmatprep.subr.bf16.mxu0 %v503_v13  ;;  %85 = vperm.xlu0 %489, %v76_v33  }
  0x13   :  { %351 = vmatpush1.bf16.msra.mxu1 %v504_v14 }
  0x14   :  { %469 = vmatpush3.bf16.msra.mxu0 %v505_v15  ;;  %352 = vmatprep.subr.bf16.mxu1 %v528_v0 }
  0x15   :  { %470 = vmatprep.subr.bf16.mxu0 %v506_v16 }
  0x17   :  { %353 = vmatpush1.bf16.msra.mxu1 %v507_v17 }
  0x18   :  { %471 = vmatpush3.bf16.msra.mxu0 %v508_v18  ;;  %354 = vmatprep.subr.bf16.mxu1 %v528_v0 }
  0x19   :  { %472 = vmatprep.subr.bf16.mxu0 %v509_v19 }
  0x1b   :  { %355 = vmatpush1.bf16.msra.mxu1 %v510_v20 }
  0x1c   :  { %473 = vmatpush3.bf16.msra.mxu0 %v511_v21  ;;  %356 = vmatprep.subr.bf16.mxu1 %v528_v0 }
  0x1d   :  { %474 = vmatprep.subr.bf16.mxu0 %v512_v22 }
  0x1f   :  { %357 = vmatpush1.bf16.msra.mxu1 %v513_v24 }
  0x20   :  { %475 = vmatpush3.bf16.msra.mxu0 %v514_v25  ;;  %368 = vmatprep.subr.bf16.mxu1 %v528_v0 }
  0x23   :  { %327 = vmatmul.mubr.bf16.vlgmr.msra.gmra.mxu0 %v515_v29  ;;  %369 = vmatpush2.bf16.msra.mxu1 %v518_v30 }
  0x24   :  { %370 = vmatprep.subr.bf16.mxu1 %v528_v0  ;;  %334 = vmatprep.mubr.bf16.mxu0 %v422_v32 }
  0x27   :  { %371 = vmatpush2.bf16.msra.mxu1 %v519_v34 }
  0x28   :  { %372 = vmatprep.subr.bf16.mxu1 %v528_v0 }
  0x2b   :  { %335 = vmatmul.mubr.bf16.gmra.mxu0 %v421_v35  ;;  %373 = vmatpush2.bf16.msra.mxu1 %v522_v36 }
  0x2e   :  { %375 = vmatmul.mubr.bf16.vlgmr.msra.gmra.mxu1 %v523_v38 }
  0x2f   :  { %453 = vmatprep.mubr.msk.bf16.mxu1 %vm287_vm0, %v424_v39 }
  0x36   :  { %383 = vmatmul.mubr.bf16.gmra.mxu1 %v423_v40 }
  0x85   :  { %v91_v60 = vpop.permute.xlu1 %90 }
  0x88   :  { %v81_v44 = vpop.permute.xlu0 %80 }
  0x8c   :  { %v86_v51 = vpop.permute.xlu0 %85 }
  0xe3   :  { %v476_v41 = vpop.f32.mrf.mxu0 }
  0xe5   :  { %v477_v42 = vpop.f32.mrf.mxu0 }
  0xe6   :  { %v478_v45 = vadd.f32 %v477_v42, %v476_v41 }
  0xe7   :  { %v479_v43 = vpop.f32.mrf.mxu0 }
  0xe8   :  { %v329_v48 = vadd.f32 %v478_v45, %v81_v44 }
  0xe9   :  { %v480_v46 = vpop.f32.mrf.mxu0 }
  0xea   :  { %v481_v49 = vadd.f32 %v480_v46, %v479_v43 }
  0xeb   :  { %v482_v47 = vpop.f32.mrf.mxu0 }
  0xec   :  { %v332_v56 = vadd.f32 %v481_v49, %v86_v51 }
  0xed   :  { %v483_v50 = vpop.f32.mrf.mxu0 }
  0xee   :  { %v376_v52 = vpop.f32.mrf.mxu1  ;;  %v484_v57 = vadd.f32 %v483_v50, %v482_v47 }
  0xef   :  { %v377_v53 = vadd.f32 %v376_v52, %v329_v48  ;;  %v485_v54 = vpop.f32.mrf.mxu0 }
  0xf0   :  { %v378_v55 = vpop.f32.mrf.mxu1  ;;  %v337_v2 = vadd.f32 %v484_v57, %v91_v60 }
  0xf1   :  { %v390_v58 = vmul.f32 0.01, %v377_v53  ;;  %v486_v59 = vpop.f32.mrf.mxu0 }
  0xf2   :  { %v379_v61 = vpop.f32.mrf.mxu1 }
  0xf3   :  { %v393_v62 = vmax.f32 %v377_v53, %v390_v58  ;;  %v380_v63 = vadd.f32 %v379_v61, %v332_v56 }
  0xf4   :  { %v381_v0 = vpop.f32.mrf.mxu1 }
  0xf5   :  { %v457_v1 = vpack.c.bf16 %v393_v62, %v393_v62  ;;  %v391_v3 = vmul.f32 0.01, %v380_v63 }
  0xf6   :  { %v384_v4 = vpop.f32.mrf.mxu1 }
  0xf7   :  { %410 = vst.msk [vmem:[%s687_s3] sm:$0xf] %vm409_vm1, %v457_v1  ;;  %v394_v5 = vmax.f32 %v380_v63, %v391_v3  ;;  %v385_v6 = vadd.f32 %v384_v4, %v337_v2 }
  0xf8   :  { %v386_v7 = vpop.f32.mrf.mxu1 }
  0xf9   :  { %v458_v8 = vpack.c.bf16 %v394_v5, %v394_v5  ;;  %v392_v9 = vmul.f32 0.01, %v385_v6 }
  0xfa   :  { %v387_v10 = vpop.f32.mrf.mxu1 }
  0xfb   :  { %411 = vst.msk [vmem:[%s687_s3 + $0x4] sm:$0xf] %vm409_vm1, %v458_v8  ;;  %v395_v11 = vmax.f32 %v385_v6, %v392_v9 }
  0xfc   :  { %v388_v12 = vpop.f32.mrf.mxu1 }
  0xfd   :  { %v459_v13 = vpack.c.bf16 %v395_v11, %v395_v11 }
  0xff   :  { %412 = vst.msk [vmem:[%s687_s3 + $0x8] sm:$0xf] %vm409_vm1, %v459_v13 }

// kernel: hourglass2_forward.27
= control target key start
LH: loop header
LB: loop body
LE: loop exit
PB: predicated region body
PF: predicated region fallthrough
CT: control target
= control target key end

     0   :  { %v464_v0 = vmov 0   ;;  %vm266_vm0 = vcmask 392192   ;;  %vm364_vm1 = vcmask 257024   ;;  %s602_s1 = inlined_call_operand.vmem [shape: bf16[432,32], index: 1, kind: input, shape index: {}]   ;;  %s603_s0 = inlined_call_operand.vmem [shape: bf16[16,432], index: 0, kind: input, shape index: {}]   ;;  %s604_s2 = inlined_call_operand.vmem [shape: f32[16,1], index: 2, kind: input, shape index: {}]   ;;  %s605_s3 = inlined_call_operand.vmem [shape: bf16[16,32], index: 3, kind: output, shape index: {}]  }
   0x1   :  { %311 = vmatprep.subr.bf16.mxu1 %v464_v0  ;;  %v431_v1 = vld [vmem:[%s602_s1 + $0x78] sm:$0xff]   ;;  %430 = vset.pattern.permute.xlu0 %v464_v0  ;;  %v434_v4 = vld [vmem:[%s602_s1 + $0x70] sm:$0xff]   ;;  %v437_v7 = vld [vmem:[%s602_s1 + $0x68] sm:$0xff]  }
   0x2   :  { %v432_v2 = vld [vmem:[%s602_s1 + $0xb8] sm:$0xff]   ;;  %407 = vmatprep.subr.bf16.mxu0 %v431_v1  ;;  %v435_v5 = vld [vmem:[%s602_s1 + $0xb0] sm:$0xff]   ;;  %v438_v8 = vld [vmem:[%s602_s1 + $0xa8] sm:$0xff]  }
   0x3   :  { %v433_v3 = vld [vmem:[%s602_s1 + $0x38] sm:$0xff]   ;;  %312 = vmatpush1.bf16.msra.mxu1 %v432_v2  ;;  %v436_v6 = vld [vmem:[%s602_s1 + $0x30] sm:$0xff]   ;;  %v439_v9 = vld [vmem:[%s602_s1 + $0x28] sm:$0xff]  }
   0x4   :  { %408 = vmatpush3.bf16.msra.mxu0 %v433_v3  ;;  %313 = vmatprep.subr.bf16.mxu1 %v464_v0  ;;  %v440_v10 = vld [vmem:[%s602_s1 + $0x60] sm:$0xff]   ;;  %v443_v13 = vld [vmem:[%s602_s1 + $0x58] sm:$0xff]   ;;  %v446_v16 = vld [vmem:[%s602_s1 + $0x50] sm:$0xff]  }
   0x5   :  { %409 = vmatprep.subr.bf16.mxu0 %v434_v4  ;;  %v441_v11 = vld [vmem:[%s602_s1 + $0xa0] sm:$0xff]   ;;  %v444_v14 = vld [vmem:[%s602_s1 + $0x98] sm:$0xff]   ;;  %v447_v17 = vld [vmem:[%s602_s1 + $0x90] sm:$0xff]  }
   0x6   :  { %v442_v12 = vld [vmem:[%s602_s1 + $0x20] sm:$0xff]   ;;  %v445_v15 = vld [vmem:[%s602_s1 + $0x18] sm:$0xff]   ;;  %v448_v18 = vld [vmem:[%s602_s1 + $0x10] sm:$0xff]  }
   0x7   :  { %314 = vmatpush1.bf16.msra.mxu1 %v435_v5  ;;  %v449_v19 = vld [vmem:[%s602_s1 + $0x48] sm:$0xff]   ;;  %v452_v22 = vld [vmem:[%s602_s1 + $0x40] sm:$0xff]   ;;  %v458_v29 = vld [vmem:[%s602_s1 + $0xd0] sm:$0xff]  }
   0x8   :  { %410 = vmatpush3.bf16.msra.mxu0 %v436_v6  ;;  %315 = vmatprep.subr.bf16.mxu1 %v464_v0  ;;  %v450_v20 = vld [vmem:[%s602_s1 + $0x88] sm:$0xff]   ;;  %v457_v23 = vld [vmem:[%s603_s0 + $0x4] ss:$16 sps:$4 sm:$0xff]   ;;  %v455_v28 = vld [vmem:[%s603_s0] ss:$16 sps:$4 sm:$0xff]  }
   0x9   :  { %411 = vmatprep.subr.bf16.mxu0 %v437_v7  ;;  %v451_v21 = vld [vmem:[%s602_s1 + $0x8] sm:$0xff]   ;;  %v453_v24 = vld [vmem:[%s602_s1 + $0x80] sm:$0xff]   ;;  %302 = vmatprep.mubr.bf16.mxu0 %v457_v23 }
   0xa   :  { %v454_v25 = vld [vmem:[%s602_s1] sm:$0xff]   ;;  %v463_v26 = vld [vmem:[%s603_s0 + $0xc] ss:$16 sps:$4 sm:$0xff]   ;;  %v461_v33 = vld [vmem:[%s603_s0 + $0x8] ss:$16 sps:$4 sm:$0xff]  }
   0xb   :  { %316 = vmatpush1.bf16.msra.mxu1 %v438_v8  ;;  %v73_v27 = vld [vmem:[%s604_s2] sm:$0xff]  ;;  %402 = vmatprep.mubr.msk.bf16.mxu1 %vm266_vm0, %v463_v26  ;;  %v74_v30 = vld [vmem:[%s604_s2 + $0x8] sm:$0xff] }
   0xc   :  { %412 = vmatpush3.bf16.msra.mxu0 %v439_v9  ;;  %317 = vmatprep.subr.bf16.mxu1 %v464_v0  ;;  %v459_v31 = vld [vmem:[%s602_s1 + $0xc8] sm:$0xff]   ;;  %v460_v32 = vld [vmem:[%s602_s1 + $0xc0] sm:$0xff]  }
   0xd   :  { %413 = vmatprep.subr.bf16.mxu0 %v440_v10  ;;  %77 = vperm.xlu0 %430, %v73_v27  }
   0xf   :  { %318 = vmatpush1.bf16.msra.mxu1 %v441_v11 }
  0x10   :  { %414 = vmatpush3.bf16.msra.mxu0 %v442_v12  ;;  %319 = vmatprep.subr.bf16.mxu1 %v464_v0 }
  0x11   :  { %415 = vmatprep.subr.bf16.mxu0 %v443_v13  ;;  %82 = vperm.xlu0 %430, %v74_v30  }
  0x13   :  { %320 = vmatpush1.bf16.msra.mxu1 %v444_v14 }
  0x14   :  { %416 = vmatpush3.bf16.msra.mxu0 %v445_v15  ;;  %321 = vmatprep.subr.bf16.mxu1 %v464_v0 }
  0x15   :  { %417 = vmatprep.subr.bf16.mxu0 %v446_v16 }
  0x17   :  { %322 = vmatpush1.bf16.msra.mxu1 %v447_v17 }
  0x18   :  { %418 = vmatpush3.bf16.msra.mxu0 %v448_v18  ;;  %323 = vmatprep.subr.bf16.mxu1 %v464_v0 }
  0x19   :  { %419 = vmatprep.subr.bf16.mxu0 %v449_v19 }
  0x1b   :  { %324 = vmatpush1.bf16.msra.mxu1 %v450_v20 }
  0x1c   :  { %420 = vmatpush3.bf16.msra.mxu0 %v451_v21  ;;  %325 = vmatprep.subr.bf16.mxu1 %v464_v0 }
  0x1d   :  { %421 = vmatprep.subr.bf16.mxu0 %v452_v22 }
  0x1f   :  { %326 = vmatpush1.bf16.msra.mxu1 %v453_v24 }
  0x20   :  { %422 = vmatpush3.bf16.msra.mxu0 %v454_v25  ;;  %337 = vmatprep.subr.bf16.mxu1 %v464_v0 }
  0x23   :  { %303 = vmatmul.mubr.bf16.vlgmr.msra.gmra.mxu0 %v455_v28  ;;  %338 = vmatpush2.bf16.msra.mxu1 %v458_v29 }
  0x24   :  { %339 = vmatprep.subr.bf16.mxu1 %v464_v0 }
  0x27   :  { %340 = vmatpush2.bf16.msra.mxu1 %v459_v31 }
  0x28   :  { %341 = vmatprep.subr.bf16.mxu1 %v464_v0 }
  0x2b   :  { %342 = vmatpush2.bf16.msra.mxu1 %v460_v32 }
  0x2e   :  { %344 = vmatmul.mubr.bf16.vlgmr.msra.gmra.mxu1 %v461_v33 }
  0x88   :  { %v78_v37 = vpop.permute.xlu0 %77 }
  0x8c   :  { %v83_v42 = vpop.permute.xlu0 %82 }
  0xe3   :  { %v423_v34 = vpop.f32.mrf.mxu0 }
  0xe5   :  { %v424_v35 = vpop.f32.mrf.mxu0 }
  0xe6   :  { %v425_v38 = vadd.f32 %v424_v35, %v423_v34 }
  0xe7   :  { %v426_v36 = vpop.f32.mrf.mxu0 }
  0xe8   :  { %v305_v40 = vadd.f32 %v425_v38, %v78_v37 }
  0xe9   :  { %v427_v39 = vpop.f32.mrf.mxu0 }
  0xea   :  { %v428_v41 = vadd.f32 %v427_v39, %v426_v36 }
  0xec   :  { %v308_v46 = vadd.f32 %v428_v41, %v83_v42 }
  0xee   :  { %v345_v43 = vpop.f32.mrf.mxu1 }
  0xef   :  { %v346_v44 = vadd.f32 %v345_v43, %v305_v40 }
  0xf0   :  { %v347_v45 = vpop.f32.mrf.mxu1 }
  0xf1   :  { %v352_v47 = vmul.f32 0.01, %v346_v44 }
  0xf2   :  { %v348_v48 = vpop.f32.mrf.mxu1 }
  0xf3   :  { %v354_v49 = vmax.f32 %v346_v44, %v352_v47  ;;  %v349_v50 = vadd.f32 %v348_v48, %v308_v46 }
  0xf4   :  { %v350_v51 = vpop.f32.mrf.mxu1 }
  0xf5   :  { %v405_v52 = vpack.c.bf16 %v354_v49, %v354_v49  ;;  %v353_v53 = vmul.f32 0.01, %v349_v50 }
  0xf7   :  { %365 = vst.msk [vmem:[%s605_s3] sm:$0xf] %vm364_vm1, %v405_v52  ;;  %v355_v54 = vmax.f32 %v349_v50, %v353_v53 }
  0xf9   :  { %v406_v55 = vpack.c.bf16 %v355_v54, %v355_v54 }
  0xfb   :  { %366 = vst.msk [vmem:[%s605_s3 + $0x4] sm:$0xf] %vm364_vm1, %v406_v55 }

// kernel: hourglass2_forward.31
= control target key start
LH: loop header
LB: loop body
LE: loop exit
PB: predicated region body
PF: predicated region fallthrough
CT: control target
= control target key end

     0   :  { %v321_v0 = vmov 0   ;;  %vm159_vm0 = vcmask 719872   ;;  %vm166_vm1 = vcmask 1043456   ;;  %vm237_vm2 = vcmask 27648   ;;  %s443_s1 = inlined_call_operand.vmem [shape: bf16[216,4], index: 1, kind: input, shape index: {}]   ;;  %s444_s0 = inlined_call_operand.vmem [shape: bf16[24,216], index: 0, kind: input, shape index: {}]   ;;  %s445_s2 = inlined_call_operand.vmem [shape: f32[24,1], index: 2, kind: input, shape index: {}]   ;;  %s446_s3 = inlined_call_operand.vmem [shape: bf16[24,4], index: 3, kind: output, shape index: {}]  }
   0x1   :  { %170 = vmatprep.subr.bf16.mxu0 %v321_v0  ;;  %271 = vmatprep.subr.bf16.mxu1 %v321_v0  ;;  %v302_v1 = vld [vmem:[%s443_s1 + $0x38] sm:$0xff]   ;;  %v303_v2 = vld [vmem:[%s443_s1 + $0x30] sm:$0xff]   ;;  %v304_v3 = vld [vmem:[%s443_s1 + $0x28] sm:$0xff]  }
   0x2   :  { %300 = vset.pattern.permute.xlu0 %v321_v0  ;;  %301 = vset.pattern.permute.xlu1 %v321_v0  ;;  %v305_v4 = vld [vmem:[%s443_s1 + $0x20] sm:$0xff]   ;;  %v306_v5 = vld [vmem:[%s443_s1 + $0x18] sm:$0xff]   ;;  %v17_v7 = vld [vmem:[%s444_s0 + $0x10] sm:$0xff] }
   0x3   :  { %171 = vmatpush1.bf16.msra.mxu0 %v302_v1  ;;  %285 = vmatpush1.bf16.msra.mxu1 %v302_v1  ;;  %v318_v6 = vld [vmem:[%s444_s0 + $0x4] ss:$8 sps:$4 sm:$0xff]   ;;  %v248_v9 = vcombine.high %v17_v7, %v17_v7  ;;  %v47_v10 = vld [vmem:[%s445_s2 + $0x10] sm:$0xff]  ;;  %v310_v15 = vld [vmem:[%s443_s1 + $0x68] ss:$0 sps:$4 sm:$0xff]   ;;  %v247_v23 = vcombine.low %v17_v7, %v17_v7 }
   0x4   :  { %172 = vmatprep.subr.bf16.mxu0 %v321_v0  ;;  %272 = vmatprep.subr.bf16.mxu1 %v321_v0  ;;  %v45_v8 = vld [vmem:[%s445_s2] sm:$0xff]  ;;  %v46_v11 = vld [vmem:[%s445_s2 + $0x8] sm:$0xff]  ;;  %v307_v12 = vld [vmem:[%s443_s1 + $0x10] sm:$0xff]   ;;  %v168_v16 = vsel %vm166_vm1, %v310_v15, 0 }
   0x5   :  { %263 = vmatprep.mubr.msk.bf16.mxu0 %vm159_vm0, %v318_v6  ;;  %50 = vperm.xlu0 %300, %v45_v8   ;;  %v308_v13 = vld [vmem:[%s443_s1 + $0x8] sm:$0xff]   ;;  %v309_v14 = vld [vmem:[%s443_s1] sm:$0xff]   ;;  %v312_v18 = vld [vmem:[%s443_s1 + $0x58] sm:$0xff]  }
   0x6   :  { %60 = vperm.xlu1 %301, %v47_v10   ;;  %264 = vmatprep.mubr.msk.bf16.mxu1 %vm159_vm0, %v248_v9  ;;  %v311_v17 = vld [vmem:[%s443_s1 + $0x60] sm:$0xff]   ;;  %v313_v19 = vld [vmem:[%s443_s1 + $0x50] sm:$0xff]   ;;  %v314_v20 = vld [vmem:[%s443_s1 + $0x48] sm:$0xff]  }
   0x7   :  { %173 = vmatpush1.bf16.msra.mxu0 %v303_v2  ;;  %286 = vmatpush1.bf16.msra.mxu1 %v303_v2  ;;  %v315_v21 = vld [vmem:[%s443_s1 + $0x40] sm:$0xff]  }
   0x8   :  { %174 = vmatprep.subr.bf16.mxu0 %v321_v0  ;;  %273 = vmatprep.subr.bf16.mxu1 %v321_v0  ;;  %v316_v22 = vld [vmem:[%s444_s0] ss:$8 sps:$4 sm:$0xff]  }
   0x9   :  { %55 = vperm.xlu0 %300, %v46_v11  }
   0xb   :  { %175 = vmatpush1.bf16.msra.mxu0 %v304_v3  ;;  %287 = vmatpush1.bf16.msra.mxu1 %v304_v3 }
   0xc   :  { %176 = vmatprep.subr.bf16.mxu0 %v321_v0  ;;  %274 = vmatprep.subr.bf16.mxu1 %v321_v0 }
   0xf   :  { %177 = vmatpush1.bf16.msra.mxu0 %v305_v4  ;;  %288 = vmatpush1.bf16.msra.mxu1 %v305_v4 }
  0x10   :  { %178 = vmatprep.subr.bf16.mxu0 %v321_v0  ;;  %275 = vmatprep.subr.bf16.mxu1 %v321_v0 }
  0x13   :  { %179 = vmatpush1.bf16.msra.mxu0 %v306_v5  ;;  %289 = vmatpush1.bf16.msra.mxu1 %v306_v5 }
  0x14   :  { %180 = vmatprep.subr.bf16.mxu0 %v321_v0  ;;  %276 = vmatprep.subr.bf16.mxu1 %v321_v0 }
  0x17   :  { %181 = vmatpush1.bf16.msra.mxu0 %v307_v12  ;;  %290 = vmatpush1.bf16.msra.mxu1 %v307_v12 }
  0x18   :  { %182 = vmatprep.subr.bf16.mxu0 %v321_v0  ;;  %277 = vmatprep.subr.bf16.mxu1 %v321_v0 }
  0x1b   :  { %183 = vmatpush1.bf16.msra.mxu0 %v308_v13  ;;  %291 = vmatpush1.bf16.msra.mxu1 %v308_v13 }
  0x1c   :  { %184 = vmatprep.subr.bf16.mxu0 %v321_v0  ;;  %278 = vmatprep.subr.bf16.mxu1 %v321_v0 }
  0x1f   :  { %185 = vmatpush1.bf16.msra.mxu0 %v309_v14  ;;  %292 = vmatpush1.bf16.msra.mxu1 %v309_v14 }
  0x20   :  { %190 = vmatprep.subr.bf16.mxu0 %v321_v0  ;;  %279 = vmatprep.subr.bf16.mxu1 %v321_v0 }
  0x23   :  { %191 = vmatpush2.bf16.msra.mxu0 %v168_v16  ;;  %293 = vmatpush2.bf16.msra.mxu1 %v168_v16 }
  0x24   :  { %192 = vmatprep.subr.bf16.mxu0 %v321_v0  ;;  %280 = vmatprep.subr.bf16.mxu1 %v321_v0 }
  0x27   :  { %193 = vmatpush2.bf16.msra.mxu0 %v311_v17  ;;  %294 = vmatpush2.bf16.msra.mxu1 %v311_v17 }
  0x28   :  { %194 = vmatprep.subr.bf16.mxu0 %v321_v0  ;;  %281 = vmatprep.subr.bf16.mxu1 %v321_v0 }
  0x2b   :  { %195 = vmatpush2.bf16.msra.mxu0 %v312_v18  ;;  %295 = vmatpush2.bf16.msra.mxu1 %v312_v18 }
  0x2c   :  { %196 = vmatprep.subr.bf16.mxu0 %v321_v0  ;;  %282 = vmatprep.subr.bf16.mxu1 %v321_v0 }
  0x2f   :  { %197 = vmatpush2.bf16.msra.mxu0 %v313_v19  ;;  %296 = vmatpush2.bf16.msra.mxu1 %v313_v19 }
  0x30   :  { %198 = vmatprep.subr.bf16.mxu0 %v321_v0  ;;  %283 = vmatprep.subr.bf16.mxu1 %v321_v0 }
  0x33   :  { %199 = vmatpush2.bf16.msra.mxu0 %v314_v20  ;;  %297 = vmatpush2.bf16.msra.mxu1 %v314_v20 }
  0x34   :  { %200 = vmatprep.subr.bf16.mxu0 %v321_v0  ;;  %284 = vmatprep.subr.bf16.mxu1 %v321_v0 }
  0x37   :  { %201 = vmatpush2.bf16.msra.mxu0 %v315_v21  ;;  %298 = vmatpush2.bf16.msra.mxu1 %v315_v21 }
  0x3a   :  { %203 = vmatmul.mubr.bf16.vlgmr.msra.gmra.mxu0 %v316_v22  ;;  %211 = vmatmul.mubr.bf16.vlgmr.msra.gmra.mxu1 %v247_v23 }
  0x80   :  { %v51_v24 = vpop.permute.xlu0 %50 }
  0x81   :  { %v61_v25 = vpop.permute.xlu1 %60 }
  0x84   :  { %v56_v32 = vpop.permute.xlu0 %55 }
  0xfa   :  { %v204_v26 = vpop.f32.mrf.mxu0  ;;  %v212_v27 = vpop.f32.mrf.mxu1 }
  0xfb   :  { %v205_v28 = vadd.f32 %v204_v26, %v51_v24  ;;  %v213_v29 = vadd.f32 %v212_v27, %v61_v25 }
  0xfc   :  { %v206_v30 = vpop.f32.mrf.mxu0  ;;  %v214_v31 = vpop.f32.mrf.mxu1 }
  0xfd   :  { %v218_v33 = vmul.f32 0.01, %v205_v28  ;;  %v220_v34 = vmul.f32 0.01, %v213_v29 }
  0xfe   :  { %v207_v35 = vpop.f32.mrf.mxu0  ;;  %v215_v36 = vpop.f32.mrf.mxu1 }
  0xff   :  { %v221_v37 = vmax.f32 %v205_v28, %v218_v33  ;;  %v223_v38 = vmax.f32 %v213_v29, %v220_v34  ;;  %v208_v39 = vadd.f32 %v207_v35, %v56_v32 }
 0x100   :  { %v209_v40 = vpop.f32.mrf.mxu0  ;;  %v216_v41 = vpop.f32.mrf.mxu1 }
 0x101   :  { %v268_v42 = vpack.c.bf16 %v221_v37, %v221_v37  ;;  %v270_v43 = vpack.c.bf16 %v223_v38, %v223_v38  ;;  %v219_v44 = vmul.f32 0.01, %v208_v39 }
 0x103   :  { %238 = vst.msk [vmem:[%s446_s3] sm:$0xf] %vm237_vm2, %v268_v42  ;;  %240 = vst.msk [vmem:[%s446_s3 + $0x8] sm:$0xf] %vm237_vm2, %v270_v43  ;;  %v222_v45 = vmax.f32 %v208_v39, %v219_v44 }
 0x105   :  { %v269_v46 = vpack.c.bf16 %v222_v45, %v222_v45 }
 0x107   :  { %239 = vst.msk [vmem:[%s446_s3 + $0x4] sm:$0xf] %vm237_vm2, %v269_v46 }

// kernel: hourglass2_forward.30
= control target key start
LH: loop header
LB: loop body
LE: loop exit
PB: predicated region body
PF: predicated region fallthrough
CT: control target
= control target key end

     0   :  { %v392_v0 = vmov 0   ;;  %vm165_vm0 = vcmask 719872   ;;  %vm172_vm1 = vcmask 1043456   ;;  %vm246_vm2 = vcmask 195584   ;;  %s514_s1 = inlined_call_operand.vmem [shape: bf16[216,4], index: 1, kind: input, shape index: {}]   ;;  %s515_s0 = inlined_call_operand.vmem [shape: bf16[24,216], index: 0, kind: input, shape index: {}]   ;;  %s516_s2 = inlined_call_operand.vmem [shape: f32[24,1], index: 2, kind: input, shape index: {}]   ;;  %s517_s3 = inlined_call_operand.vmem [shape: bf16[24,24], index: 3, kind: input, shape index: {}]   ;;  %s518_s4 = inlined_call_operand.vmem [shape: f32[24,4], index: 4, kind: input, shape index: {}]   ;;  %s519_s5 = inlined_call_operand.vmem [shape: bf16[24,4], index: 5, kind: output, shape index: {}]  }
   0x1   :  { %176 = vmatprep.subr.bf16.mxu0 %v392_v0  ;;  %v371_v1 = vld [vmem:[%s514_s1 + $0x38] sm:$0xff]   ;;  %369 = vset.pattern.permute.xlu0 %v392_v0  ;;  %v372_v2 = vld [vmem:[%s514_s1 + $0x30] sm:$0xff]   ;;  %v373_v3 = vld [vmem:[%s514_s1 + $0x28] sm:$0xff]   ;;  %vm317_vm3 = vcmask 27648  }
   0x2   :  { %370 = vset.pattern.permute.xlu1 %v392_v0  ;;  %177 = vmatpush1.bf16.msra.mxu0 %v371_v1  ;;  %v374_v4 = vld [vmem:[%s514_s1 + $0x20] sm:$0xff]   ;;  %v375_v5 = vld [vmem:[%s514_s1 + $0x18] sm:$0xff]   ;;  %v53_v7 = vld [vmem:[%s516_s2 + $0x10] sm:$0xff] }
   0x3   :  { %178 = vmatprep.subr.bf16.mxu0 %v392_v0  ;;  %v387_v6 = vld [vmem:[%s515_s0 + $0x4] ss:$8 sps:$4 sm:$0xff]   ;;  %66 = vperm.xlu0 %369, %v53_v7   ;;  %v376_v10 = vld [vmem:[%s514_s1 + $0x10] sm:$0xff]   ;;  %v379_v13 = vld [vmem:[%s514_s1 + $0x68] ss:$0 sps:$4 sm:$0xff]  }
   0x4   :  { %v52_v8 = vld [vmem:[%s516_s2 + $0x8] sm:$0xff]  ;;  %343 = vmatprep.mubr.msk.bf16.mxu0 %vm165_vm0, %v387_v6  ;;  %v51_v9 = vld [vmem:[%s516_s2] sm:$0xff]  ;;  %v174_v14 = vsel %vm172_vm1, %v379_v13, 0  ;;  %v381_v16 = vld [vmem:[%s514_s1 + $0x58] sm:$0xff]  }
   0x5   :  { %61 = vperm.xlu1 %370, %v52_v8   ;;  %v377_v11 = vld [vmem:[%s514_s1 + $0x8] sm:$0xff]   ;;  %v378_v12 = vld [vmem:[%s514_s1] sm:$0xff]   ;;  %v382_v17 = vld [vmem:[%s514_s1 + $0x50] sm:$0xff]  }
   0x6   :  { %179 = vmatpush1.bf16.msra.mxu0 %v372_v2  ;;  %v380_v15 = vld [vmem:[%s514_s1 + $0x60] sm:$0xff]   ;;  %v383_v18 = vld [vmem:[%s514_s1 + $0x48] sm:$0xff]   ;;  %v23_v20 = vld [vmem:[%s515_s0 + $0x10] sm:$0xff] }
   0x7   :  { %180 = vmatprep.subr.bf16.mxu0 %v392_v0  ;;  %56 = vperm.xlu0 %369, %v51_v9   ;;  %v384_v19 = vld [vmem:[%s514_s1 + $0x40] sm:$0xff]   ;;  %v328_v22 = vcombine.high %v23_v20, %v23_v20  ;;  %v327_v23 = vcombine.low %v23_v20, %v23_v20  ;;  %v391_v48 = vld [vmem:[%s517_s3 + $0x8] ss:$0 sps:$4 sm:$0xff]   ;;  %v237_v49 = vld [vmem:[%s518_s4 + $0x10] sm:$0xff] }
   0x8   :  { %v385_v21 = vld [vmem:[%s515_s0] ss:$8 sps:$4 sm:$0xff]  }
   0x9   :  { %v390_v24 = vld [vmem:[%s517_s3] sm:$0xff]   ;;  %v236_v57 = vld [vmem:[%s518_s4 + $0x8] sm:$0xff] }
   0xa   :  { %181 = vmatpush1.bf16.msra.mxu0 %v373_v3  ;;  %363 = vmatprep.mubr.msk.bf16.mxu1 %vm246_vm2, %v390_v24  ;;  %v235_v51 = vld [vmem:[%s518_s4] sm:$0xff] }
   0xb   :  { %182 = vmatprep.subr.bf16.mxu0 %v392_v0 }
   0xe   :  { %183 = vmatpush1.bf16.msra.mxu0 %v374_v4 }
   0xf   :  { %184 = vmatprep.subr.bf16.mxu0 %v392_v0 }
  0x12   :  { %185 = vmatpush1.bf16.msra.mxu0 %v375_v5 }
  0x13   :  { %186 = vmatprep.subr.bf16.mxu0 %v392_v0 }
  0x16   :  { %187 = vmatpush1.bf16.msra.mxu0 %v376_v10 }
  0x17   :  { %188 = vmatprep.subr.bf16.mxu0 %v392_v0 }
  0x1a   :  { %189 = vmatpush1.bf16.msra.mxu0 %v377_v11 }
  0x1b   :  { %190 = vmatprep.subr.bf16.mxu0 %v392_v0 }
  0x1e   :  { %191 = vmatpush1.bf16.msra.mxu0 %v378_v12 }
  0x1f   :  { %196 = vmatprep.subr.bf16.mxu0 %v392_v0 }
  0x22   :  { %197 = vmatpush2.bf16.msra.mxu0 %v174_v14 }
  0x23   :  { %198 = vmatprep.subr.bf16.mxu0 %v392_v0 }
  0x26   :  { %199 = vmatpush2.bf16.msra.mxu0 %v380_v15 }
  0x27   :  { %200 = vmatprep.subr.bf16.mxu0 %v392_v0 }
  0x2a   :  { %201 = vmatpush2.bf16.msra.mxu0 %v381_v16 }
  0x2b   :  { %202 = vmatprep.subr.bf16.mxu0 %v392_v0 }
  0x2e   :  { %203 = vmatpush2.bf16.msra.mxu0 %v382_v17 }
  0x2f   :  { %204 = vmatprep.subr.bf16.mxu0 %v392_v0 }
  0x32   :  { %205 = vmatpush2.bf16.msra.mxu0 %v383_v18 }
  0x33   :  { %206 = vmatprep.subr.bf16.mxu0 %v392_v0 }
  0x36   :  { %207 = vmatpush2.bf16.msra.mxu0 %v384_v19 }
  0x39   :  { %209 = vmatmul.mubr.bf16.vlgmr.msra.gmra.mxu0 %v385_v21 }
  0x3a   :  { %344 = vmatprep.mubr.msk.bf16.mxu0 %vm165_vm0, %v328_v22 }
  0x41   :  { %217 = vmatmul.mubr.bf16.gmra.mxu0 %v327_v23 }
  0x7e   :  { %v67_v25 = vpop.permute.xlu0 %66 }
  0x80   :  { %v62_v28 = vpop.permute.xlu1 %61 }
  0x82   :  { %v57_v29 = vpop.permute.xlu0 %56 }
  0xf9   :  { %v210_v26 = vpop.f32.mrf.mxu0 }
  0xfa   :  { %v211_v33 = vadd.f32 %v210_v26, %v57_v29 }
  0xfb   :  { %v212_v27 = vpop.f32.mrf.mxu0 }
  0xfc   :  { %v224_v38 = vmul.f32 0.01, %v211_v33 }
  0xfd   :  { %v213_v30 = vpop.f32.mrf.mxu0 }
  0xfe   :  { %v214_v31 = vadd.f32 %v213_v30, %v62_v28  ;;  %v227_v44 = vmax.f32 %v211_v33, %v224_v38 }
  0xff   :  { %v215_v32 = vpop.f32.mrf.mxu0 }
 0x100   :  { %v225_v35 = vmul.f32 0.01, %v214_v31 }
 0x101   :  { %v218_v34 = vpop.f32.mrf.mxu0 }
 0x102   :  { %v219_v36 = vadd.f32 %v218_v34, %v67_v25  ;;  %v228_v41 = vmax.f32 %v214_v31, %v225_v35 }
 0x103   :  { %v220_v37 = vpop.f32.mrf.mxu0 }
 0x104   :  { %v226_v39 = vmul.f32 0.01, %v219_v36  ;;  %v233_v47 = vpack.c.bf16 %v228_v41, %v227_v44 }
 0x105   :  { %v221_v40 = vpop.f32.mrf.mxu0 }
 0x106   :  { %v229_v42 = vmax.f32 %v219_v36, %v226_v39 }
 0x107   :  { %v222_v43 = vpop.f32.mrf.mxu0 }
 0x108   :  { %v234_v45 = vpack.c.bf16 %v229_v42, %v229_v42 }
 0x10a   :  { %367 = vmatprep.subr.msk.bf16.mxu1 %vm172_vm1, %v234_v45  ;;  %v254_v46 = vsel %vm172_vm1, %v234_v45, 0 }
 0x10b   :  { %360 = vmatpush3.bf16.msra.mxu1 %v254_v46 }
 0x10c   :  { %361 = vmatprep.subr.bf16.mxu1 %v233_v47 }
 0x10f   :  { %362 = vmatpush3.bf16.msra.mxu1 %v233_v47 }
 0x112   :  { %364 = vmatmul.mubr.msk.bf16.vlgmr.msra.gmra.mxu1 %vm246_vm2, %v391_v48 }
 0x1d2   :  { %v365_v50 = vpop.f32.mrf.mxu1 }
 0x1d3   :  { %v299_v52 = vadd.f32 %v365_v50, %v237_v49 }
 0x1d4   :  { %v290_v53 = vpop.f32.mrf.mxu1 }
 0x1d5   :  { %v354_v54 = vpack.c.bf16 %v299_v52, %v299_v52  ;;  %v291_v55 = vadd.f32 %v290_v53, %v235_v51 }
 0x1d6   :  { %v366_v56 = vpop.f32.mrf.mxu1 }
 0x1d7   :  { %320 = vst.msk [vmem:[%s519_s5 + $0x8] sm:$0xf] %vm317_vm3, %v354_v54  ;;  %v352_v58 = vpack.c.bf16 %v291_v55, %v291_v55 }
 0x1d8   :  { %v293_v59 = vpop.f32.mrf.mxu1 }
 0x1d9   :  { %318 = vst.msk [vmem:[%s519_s5] sm:$0xf] %vm317_vm3, %v352_v58  ;;  %v294_v60 = vadd.f32 %v293_v59, %v236_v57 }
 0x1db   :  { %v353_v61 = vpack.c.bf16 %v294_v60, %v294_v60 }
 0x1dd   :  { %319 = vst.msk [vmem:[%s519_s5 + $0x4] sm:$0xf] %vm317_vm3, %v353_v61 }

// kernel: hourglass2_forward.29
= control target key start
LH: loop header
LB: loop body
LE: loop exit
PB: predicated region body
PF: predicated region fallthrough
CT: control target
= control target key end

     0   :  { %v791_v1 = vmov 0   ;;  %vm415_vm0 = vcmask 64512   ;;  %vm422_vm1 = vcmask 1043456   ;;  %vm589_vm2 = vcmask 27648   ;;  %s1000_s1 = inlined_call_operand.vmem [shape: bf16[648,4], index: 1, kind: input, shape index: {}]   ;;  %s1001_s0 = inlined_call_operand.vmem [shape: bf16[24,648], index: 0, kind: input, shape index: {}]   ;;  %s1002_s2 = inlined_call_operand.vmem [shape: f32[24,1], index: 2, kind: input, shape index: {}]   ;;  %s1003_s3 = inlined_call_operand.vmem [shape: bf16[24,4], index: 3, kind: output, shape index: {}]  }
   0x1   :  { %v735_v0 = vld [vmem:[%s1000_s1 + $0x78] sm:$0xff]   ;;  %733 = vset.pattern.permute.xlu0 %v791_v1  ;;  %734 = vset.pattern.permute.xlu1 %v791_v1  ;;  %v739_v5 = vld [vmem:[%s1000_s1 + $0x70] sm:$0xff]   ;;  %v743_v9 = vld [vmem:[%s1000_s1 + $0x68] sm:$0xff]  }
   0x2   :  { %v736_v2 = vld [vmem:[%s1000_s1 + $0xf8] sm:$0xff]   ;;  %658 = vmatprep.subr.bf16.mxu0 %v735_v0  ;;  %v740_v6 = vld [vmem:[%s1000_s1 + $0xf0] sm:$0xff]   ;;  %v744_v10 = vld [vmem:[%s1000_s1 + $0xe8] sm:$0xff]  }
   0x3   :  { %v737_v3 = vld [vmem:[%s1000_s1 + $0x38] sm:$0xff]   ;;  %686 = vmatprep.subr.bf16.mxu1 %v736_v2  ;;  %v741_v7 = vld [vmem:[%s1000_s1 + $0x30] sm:$0xff]   ;;  %v745_v11 = vld [vmem:[%s1000_s1 + $0x28] sm:$0xff]  }
   0x4   :  { %v738_v4 = vld [vmem:[%s1000_s1 + $0xb8] sm:$0xff]   ;;  %659 = vmatpush3.bf16.msra.mxu0 %v737_v3  ;;  %v742_v8 = vld [vmem:[%s1000_s1 + $0xb0] sm:$0xff]   ;;  %v746_v12 = vld [vmem:[%s1000_s1 + $0xa8] sm:$0xff]  }
   0x5   :  { %687 = vmatpush3.bf16.msra.mxu1 %v738_v4  ;;  %660 = vmatprep.subr.bf16.mxu0 %v739_v5  ;;  %v747_v13 = vld [vmem:[%s1000_s1 + $0x60] sm:$0xff]   ;;  %v751_v17 = vld [vmem:[%s1000_s1 + $0x58] sm:$0xff]   ;;  %v755_v21 = vld [vmem:[%s1000_s1 + $0x50] sm:$0xff]  }
   0x6   :  { %688 = vmatprep.subr.bf16.mxu1 %v740_v6  ;;  %v748_v14 = vld [vmem:[%s1000_s1 + $0xe0] sm:$0xff]   ;;  %v752_v18 = vld [vmem:[%s1000_s1 + $0xd8] sm:$0xff]   ;;  %v756_v22 = vld [vmem:[%s1000_s1 + $0xd0] sm:$0xff]  }
   0x7   :  { %v749_v15 = vld [vmem:[%s1000_s1 + $0x20] sm:$0xff]   ;;  %v753_v19 = vld [vmem:[%s1000_s1 + $0x18] sm:$0xff]   ;;  %v757_v23 = vld [vmem:[%s1000_s1 + $0x10] sm:$0xff]  }
   0x8   :  { %661 = vmatpush3.bf16.msra.mxu0 %v741_v7  ;;  %v750_v16 = vld [vmem:[%s1000_s1 + $0xa0] sm:$0xff]   ;;  %v754_v20 = vld [vmem:[%s1000_s1 + $0x98] sm:$0xff]   ;;  %v758_v24 = vld [vmem:[%s1000_s1 + $0x90] sm:$0xff]  }
   0x9   :  { %689 = vmatpush3.bf16.msra.mxu1 %v742_v8  ;;  %662 = vmatprep.subr.bf16.mxu0 %v743_v9  ;;  %v759_v25 = vld [vmem:[%s1000_s1 + $0x48] sm:$0xff]   ;;  %v763_v29 = vld [vmem:[%s1000_s1 + $0x40] sm:$0xff]   ;;  %v773_v37 = vld [vmem:[%s1000_s1 + $0x138] sm:$0xff]  }
   0xa   :  { %690 = vmatprep.subr.bf16.mxu1 %v744_v10  ;;  %v760_v26 = vld [vmem:[%s1000_s1 + $0xc8] sm:$0xff]   ;;  %v764_v30 = vld [vmem:[%s1000_s1 + $0xc0] sm:$0xff]   ;;  %v774_v38 = vld [vmem:[%s1000_s1 + $0x130] sm:$0xff]  }
   0xb   :  { %v761_v27 = vld [vmem:[%s1000_s1 + $0x8] sm:$0xff]   ;;  %v765_v31 = vld [vmem:[%s1000_s1] sm:$0xff]   ;;  %v21_v39 = vld [vmem:[%s1001_s0 + $0x30] sm:$0xff] }
   0xc   :  { %663 = vmatpush3.bf16.msra.mxu0 %v745_v11  ;;  %v762_v28 = vld [vmem:[%s1000_s1 + $0x88] sm:$0xff]   ;;  %v766_v32 = vld [vmem:[%s1000_s1 + $0x80] sm:$0xff]   ;;  %v604_v41 = vcombine.high %v21_v39, %v21_v39  ;;  %v603_v42 = vcombine.low %v21_v39, %v21_v39  ;;  %v22_v43 = vld [vmem:[%s1001_s0 + $0x38] sm:$0xff] }
   0xd   :  { %691 = vmatpush3.bf16.msra.mxu1 %v746_v12  ;;  %664 = vmatprep.subr.bf16.mxu0 %v747_v13  ;;  %v767_v33 = vld [vmem:[%s1001_s0] ss:$24 sps:$4 sm:$0xff]   ;;  %v769_v34 = vld [vmem:[%s1001_s0 + $0x4] ss:$24 sps:$4 sm:$0xff]   ;;  %v775_v40 = vld [vmem:[%s1000_s1 + $0x128] sm:$0xff]   ;;  %v606_v44 = vcombine.high %v22_v43, %v22_v43  ;;  %v605_v45 = vcombine.low %v22_v43, %v22_v43 }
   0xe   :  { %692 = vmatprep.subr.bf16.mxu1 %v748_v14  ;;  %v770_v35 = vld [vmem:[%s1001_s0 + $0x8] ss:$24 sps:$4 sm:$0xff]   ;;  %v772_v36 = vld [vmem:[%s1001_s0 + $0xc] ss:$24 sps:$4 sm:$0xff]   ;;  %458 = vmatprep.mubr.bf16.mxu0 %v769_v34  ;;  %v107_v51 = vld [vmem:[%s1002_s2 + $0x10] sm:$0xff] }
   0xf   :  { %506 = vmatprep.mubr.bf16.mxu1 %v772_v36  ;;  %v776_v46 = vld [vmem:[%s1000_s1 + $0x120] sm:$0xff]   ;;  %v788_v47 = vld [vmem:[%s1001_s0 + $0x14] ss:$24 sps:$4 sm:$0xff]   ;;  %v777_v52 = vld [vmem:[%s1000_s1 + $0x118] sm:$0xff]   ;;  %120 = vperm.xlu1 %734, %v107_v51  }
  0x10   :  { %665 = vmatpush3.bf16.msra.mxu0 %v749_v15  ;;  %v23_v48 = vld [vmem:[%s1001_s0 + $0x40] sm:$0xff]  ;;  %v106_v53 = vld [vmem:[%s1002_s2 + $0x8] sm:$0xff]  ;;  %v779_v54 = vld [vmem:[%s1000_s1 + $0x110] sm:$0xff]  }
  0x11   :  { %693 = vmatpush3.bf16.msra.mxu1 %v750_v16  ;;  %666 = vmatprep.subr.bf16.mxu0 %v751_v17  ;;  %v105_v49 = vld [vmem:[%s1002_s2] sm:$0xff]  ;;  %v608_v50 = vcombine.high %v23_v48, %v23_v48  ;;  %v782_v55 = vld [vmem:[%s1000_s1 + $0x108] sm:$0xff]   ;;  %v607_v60 = vcombine.low %v23_v48, %v23_v48 }
  0x12   :  { %694 = vmatprep.subr.bf16.mxu1 %v752_v18  ;;  %110 = vperm.xlu0 %733, %v105_v49   ;;  %v784_v56 = vld [vmem:[%s1000_s1 + $0x100] sm:$0xff]   ;;  %v786_v59 = vld [vmem:[%s1001_s0 + $0x10] ss:$24 sps:$4 sm:$0xff]  }
  0x13   :  { %v785_v57 = vld [vmem:[%s1000_s1 + $0x140] ss:$0 sps:$4 sm:$0xff]  }
  0x14   :  { %667 = vmatpush3.bf16.msra.mxu0 %v753_v19  ;;  %v424_v58 = vsel %vm422_vm1, %v785_v57, 0 }
  0x15   :  { %695 = vmatpush3.bf16.msra.mxu1 %v754_v20  ;;  %668 = vmatprep.subr.bf16.mxu0 %v755_v21 }
  0x16   :  { %696 = vmatprep.subr.bf16.mxu1 %v756_v22  ;;  %115 = vperm.xlu0 %733, %v106_v53  }
  0x18   :  { %669 = vmatpush3.bf16.msra.mxu0 %v757_v23 }
  0x19   :  { %697 = vmatpush3.bf16.msra.mxu1 %v758_v24  ;;  %670 = vmatprep.subr.bf16.mxu0 %v759_v25 }
  0x1a   :  { %698 = vmatprep.subr.bf16.mxu1 %v760_v26 }
  0x1c   :  { %671 = vmatpush3.bf16.msra.mxu0 %v761_v27 }
  0x1d   :  { %699 = vmatpush3.bf16.msra.mxu1 %v762_v28  ;;  %672 = vmatprep.subr.bf16.mxu0 %v763_v29 }
  0x1e   :  { %700 = vmatprep.subr.bf16.mxu1 %v764_v30 }
  0x20   :  { %673 = vmatpush3.bf16.msra.mxu0 %v765_v31 }
  0x21   :  { %701 = vmatpush3.bf16.msra.mxu1 %v766_v32  ;;  %522 = vmatprep.subr.bf16.mxu0 %v791_v1 }
  0x22   :  { %714 = vmatprep.subr.bf16.mxu1 %v791_v1 }
  0x23   :  { %459 = vmatmul.mubr.bf16.vlgmr.msra.gmra.mxu0 %v767_v33 }
  0x24   :  { %507 = vmatmul.mubr.bf16.vlgmr.msra.gmra.mxu1 %v770_v35  ;;  %523 = vmatpush1.bf16.msra.mxu0 %v773_v37 }
  0x25   :  { %723 = vmatpush1.bf16.msra.mxu1 %v773_v37  ;;  %524 = vmatprep.subr.bf16.mxu0 %v791_v1 }
  0x26   :  { %715 = vmatprep.subr.bf16.mxu1 %v791_v1  ;;  %466 = vmatprep.mubr.bf16.mxu0 %v604_v41 }
  0x27   :  { %514 = vmatprep.mubr.bf16.mxu1 %v606_v44 }
  0x28   :  { %525 = vmatpush1.bf16.msra.mxu0 %v774_v38 }
  0x29   :  { %724 = vmatpush1.bf16.msra.mxu1 %v774_v38  ;;  %526 = vmatprep.subr.bf16.mxu0 %v791_v1 }
  0x2a   :  { %716 = vmatprep.subr.bf16.mxu1 %v791_v1 }
  0x2b   :  { %467 = vmatmul.mubr.bf16.gmra.mxu0 %v603_v42 }
  0x2c   :  { %527 = vmatpush1.bf16.msra.mxu0 %v775_v40  ;;  %515 = vmatmul.mubr.bf16.gmra.mxu1 %v605_v45 }
  0x2d   :  { %725 = vmatpush1.bf16.msra.mxu1 %v775_v40  ;;  %528 = vmatprep.subr.bf16.mxu0 %v791_v1 }
  0x2e   :  { %717 = vmatprep.subr.bf16.mxu1 %v791_v1  ;;  %650 = vmatprep.mubr.msk.bf16.mxu0 %vm415_vm0, %v788_v47 }
  0x2f   :  { %651 = vmatprep.mubr.msk.bf16.mxu1 %vm415_vm0, %v608_v50 }
  0x30   :  { %529 = vmatpush1.bf16.msra.mxu0 %v776_v46 }
  0x31   :  { %726 = vmatpush1.bf16.msra.mxu1 %v776_v46  ;;  %530 = vmatprep.subr.bf16.mxu0 %v791_v1 }
  0x32   :  { %718 = vmatprep.subr.bf16.mxu1 %v791_v1 }
  0x34   :  { %531 = vmatpush1.bf16.msra.mxu0 %v777_v52 }
  0x35   :  { %727 = vmatpush1.bf16.msra.mxu1 %v777_v52  ;;  %532 = vmatprep.subr.bf16.mxu0 %v791_v1 }
  0x36   :  { %719 = vmatprep.subr.bf16.mxu1 %v791_v1 }
  0x38   :  { %533 = vmatpush1.bf16.msra.mxu0 %v779_v54 }
  0x39   :  { %728 = vmatpush1.bf16.msra.mxu1 %v779_v54  ;;  %534 = vmatprep.subr.bf16.mxu0 %v791_v1 }
  0x3a   :  { %720 = vmatprep.subr.bf16.mxu1 %v791_v1 }
  0x3c   :  { %535 = vmatpush1.bf16.msra.mxu0 %v782_v55 }
  0x3d   :  { %729 = vmatpush1.bf16.msra.mxu1 %v782_v55  ;;  %536 = vmatprep.subr.bf16.mxu0 %v791_v1 }
  0x3e   :  { %721 = vmatprep.subr.bf16.mxu1 %v791_v1 }
  0x40   :  { %537 = vmatpush1.bf16.msra.mxu0 %v784_v56 }
  0x41   :  { %730 = vmatpush1.bf16.msra.mxu1 %v784_v56  ;;  %552 = vmatprep.subr.bf16.mxu0 %v791_v1 }
  0x42   :  { %722 = vmatprep.subr.bf16.mxu1 %v791_v1 }
  0x44   :  { %553 = vmatpush2.bf16.msra.mxu0 %v424_v58 }
  0x45   :  { %731 = vmatpush2.bf16.msra.mxu1 %v424_v58 }
  0x47   :  { %555 = vmatmul.mubr.bf16.vlgmr.msra.gmra.mxu0 %v786_v59 }
  0x48   :  { %563 = vmatmul.mubr.bf16.vlgmr.msra.gmra.mxu1 %v607_v60 }
  0x8a   :  { %v121_v16 = vpop.permute.xlu1 %120 }
  0x8d   :  { %v111_v13 = vpop.permute.xlu0 %110 }
  0x91   :  { %v116_v20 = vpop.permute.xlu0 %115 }
  0xe3   :  { %v674_v61 = vpop.f32.mrf.mxu0 }
  0xe4   :  { %v702_v62 = vpop.f32.mrf.mxu1 }
  0xe5   :  { %v675_v63 = vpop.f32.mrf.mxu0 }
  0xe6   :  { %v703_v0 = vpop.f32.mrf.mxu1  ;;  %v676_v14 = vadd.f32 %v675_v63, %v674_v61 }
  0xe7   :  { %v677_v2 = vpop.f32.mrf.mxu0  ;;  %v704_v17 = vadd.f32 %v703_v0, %v702_v62 }
  0xe8   :  { %v705_v3 = vpop.f32.mrf.mxu1  ;;  %v461_v18 = vadd.f32 %v676_v14, %v111_v13 }
  0xe9   :  { %v678_v4 = vpop.f32.mrf.mxu0 }
  0xea   :  { %v706_v5 = vpop.f32.mrf.mxu1  ;;  %v679_v19 = vadd.f32 %v678_v4, %v677_v2  ;;  %v509_v24 = vadd.f32 %v704_v17, %v461_v18 }
  0xeb   :  { %v680_v6 = vpop.f32.mrf.mxu0  ;;  %v707_v27 = vadd.f32 %v706_v5, %v705_v3 }
  0xec   :  { %v708_v7 = vpop.f32.mrf.mxu1  ;;  %v464_v23 = vadd.f32 %v679_v19, %v116_v20 }
  0xed   :  { %v681_v1 = vpop.f32.mrf.mxu0 }
  0xee   :  { %v709_v8 = vpop.f32.mrf.mxu1  ;;  %v682_v15 = vadd.f32 %v681_v1, %v680_v6  ;;  %v512_v34 = vadd.f32 %v707_v27, %v464_v23 }
  0xef   :  { %v683_v9 = vpop.f32.mrf.mxu0  ;;  %v710_v21 = vadd.f32 %v709_v8, %v708_v7 }
  0xf0   :  { %v711_v10 = vpop.f32.mrf.mxu1  ;;  %v469_v22 = vadd.f32 %v682_v15, %v121_v16 }
  0xf1   :  { %v684_v11 = vpop.f32.mrf.mxu0 }
  0xf2   :  { %v712_v12 = vpop.f32.mrf.mxu1  ;;  %v517_v26 = vadd.f32 %v710_v21, %v469_v22 }
 0x107   :  { %v556_v25 = vpop.f32.mrf.mxu0 }
 0x108   :  { %v557_v28 = vadd.f32 %v556_v25, %v509_v24  ;;  %v564_v29 = vpop.f32.mrf.mxu1 }
 0x109   :  { %v565_v30 = vadd.f32 %v564_v29, %v517_v26  ;;  %v558_v31 = vpop.f32.mrf.mxu0 }
 0x10a   :  { %v570_v32 = vmul.f32 0.01, %v557_v28  ;;  %v566_v33 = vpop.f32.mrf.mxu1 }
 0x10b   :  { %v572_v35 = vmul.f32 0.01, %v565_v30  ;;  %v559_v36 = vpop.f32.mrf.mxu0 }
 0x10c   :  { %v573_v37 = vmax.f32 %v557_v28, %v570_v32  ;;  %v560_v38 = vadd.f32 %v559_v36, %v512_v34  ;;  %v567_v39 = vpop.f32.mrf.mxu1 }
 0x10d   :  { %v575_v40 = vmax.f32 %v565_v30, %v572_v35  ;;  %v561_v41 = vpop.f32.mrf.mxu0 }
 0x10e   :  { %v655_v42 = vpack.c.bf16 %v573_v37, %v573_v37  ;;  %v571_v43 = vmul.f32 0.01, %v560_v38  ;;  %v568_v44 = vpop.f32.mrf.mxu1 }
 0x10f   :  { %v657_v45 = vpack.c.bf16 %v575_v40, %v575_v40 }
 0x110   :  { %590 = vst.msk [vmem:[%s1003_s3] sm:$0xf] %vm589_vm2, %v655_v42  ;;  %v574_v46 = vmax.f32 %v560_v38, %v571_v43 }
 0x111   :  { %592 = vst.msk [vmem:[%s1003_s3 + $0x8] sm:$0xf] %vm589_vm2, %v657_v45 }
 0x112   :  { %v656_v47 = vpack.c.bf16 %v574_v46, %v574_v46 }
 0x114   :  { %591 = vst.msk [vmem:[%s1003_s3 + $0x4] sm:$0xf] %vm589_vm2, %v656_v47 }

// kernel: hourglass2_forward.32
= control target key start
LH: loop header
LB: loop body
LE: loop exit
PB: predicated region body
PF: predicated region fallthrough
CT: control target
= control target key end

     0   :  { %v399_v0 = vmov 0   ;;  %vm165_vm0 = vcmask 719872   ;;  %vm172_vm1 = vcmask 1043456   ;;  %vm249_vm2 = vcmask 195584   ;;  %s518_s1 = inlined_call_operand.vmem [shape: bf16[216,4], index: 1, kind: input, shape index: {}]   ;;  %s519_s0 = inlined_call_operand.vmem [shape: bf16[24,216], index: 0, kind: input, shape index: {}]   ;;  %s520_s2 = inlined_call_operand.vmem [shape: f32[24,1], index: 2, kind: input, shape index: {}]   ;;  %s521_s3 = inlined_call_operand.vmem [shape: bf16[24,24], index: 3, kind: input, shape index: {}]   ;;  %s522_s4 = inlined_call_operand.vmem [shape: bf16[24,4], index: 4, kind: input, shape index: {}]   ;;  %s523_s5 = inlined_call_operand.vmem [shape: bf16[24,4], index: 5, kind: output, shape index: {}]  }
   0x1   :  { %176 = vmatprep.subr.bf16.mxu0 %v399_v0  ;;  %v378_v1 = vld [vmem:[%s518_s1 + $0x38] sm:$0xff]   ;;  %376 = vset.pattern.permute.xlu0 %v399_v0  ;;  %v379_v2 = vld [vmem:[%s518_s1 + $0x30] sm:$0xff]   ;;  %v380_v3 = vld [vmem:[%s518_s1 + $0x28] sm:$0xff]   ;;  %vm320_vm3 = vcmask 27648  }
   0x2   :  { %377 = vset.pattern.permute.xlu1 %v399_v0  ;;  %177 = vmatpush1.bf16.msra.mxu0 %v378_v1  ;;  %v381_v4 = vld [vmem:[%s518_s1 + $0x20] sm:$0xff]   ;;  %v382_v5 = vld [vmem:[%s518_s1 + $0x18] sm:$0xff]   ;;  %v53_v7 = vld [vmem:[%s520_s2 + $0x10] sm:$0xff] }
   0x3   :  { %178 = vmatprep.subr.bf16.mxu0 %v399_v0  ;;  %v394_v6 = vld [vmem:[%s519_s0 + $0x4] ss:$8 sps:$4 sm:$0xff]   ;;  %66 = vperm.xlu0 %376, %v53_v7   ;;  %v383_v10 = vld [vmem:[%s518_s1 + $0x10] sm:$0xff]   ;;  %v386_v13 = vld [vmem:[%s518_s1 + $0x68] ss:$0 sps:$4 sm:$0xff]  }
   0x4   :  { %v52_v8 = vld [vmem:[%s520_s2 + $0x8] sm:$0xff]  ;;  %346 = vmatprep.mubr.msk.bf16.mxu0 %vm165_vm0, %v394_v6  ;;  %v51_v9 = vld [vmem:[%s520_s2] sm:$0xff]  ;;  %v174_v14 = vsel %vm172_vm1, %v386_v13, 0  ;;  %v388_v16 = vld [vmem:[%s518_s1 + $0x58] sm:$0xff]  }
   0x5   :  { %61 = vperm.xlu1 %377, %v52_v8   ;;  %v384_v11 = vld [vmem:[%s518_s1 + $0x8] sm:$0xff]   ;;  %v385_v12 = vld [vmem:[%s518_s1] sm:$0xff]   ;;  %v389_v17 = vld [vmem:[%s518_s1 + $0x50] sm:$0xff]  }
   0x6   :  { %179 = vmatpush1.bf16.msra.mxu0 %v379_v2  ;;  %v387_v15 = vld [vmem:[%s518_s1 + $0x60] sm:$0xff]   ;;  %v390_v18 = vld [vmem:[%s518_s1 + $0x48] sm:$0xff]   ;;  %v23_v20 = vld [vmem:[%s519_s0 + $0x10] sm:$0xff] }
   0x7   :  { %180 = vmatprep.subr.bf16.mxu0 %v399_v0  ;;  %56 = vperm.xlu0 %376, %v51_v9   ;;  %v391_v19 = vld [vmem:[%s518_s1 + $0x40] sm:$0xff]   ;;  %v331_v22 = vcombine.high %v23_v20, %v23_v20  ;;  %v330_v23 = vcombine.low %v23_v20, %v23_v20  ;;  %v398_v48 = vld [vmem:[%s521_s3 + $0x8] ss:$0 sps:$4 sm:$0xff]  }
   0x8   :  { %v392_v21 = vld [vmem:[%s519_s0] ss:$8 sps:$4 sm:$0xff]  }
   0x9   :  { %v397_v24 = vld [vmem:[%s521_s3] sm:$0xff]   ;;  %v237_v49 = vld [vmem:[%s522_s4 + $0x8] sm:$0xf] }
   0xa   :  { %181 = vmatpush1.bf16.msra.mxu0 %v380_v3  ;;  %370 = vmatprep.mubr.msk.bf16.mxu1 %vm249_vm2, %v397_v24  ;;  %v359_v50 = vld [vmem:[%s522_s4] sm:$0xff]   ;;  %v240_v51 = vunpack.c.l.bf16 %v237_v49 }
   0xb   :  { %182 = vmatprep.subr.bf16.mxu0 %v399_v0  ;;  %v360_v52 = vunpack.c.l.bf16 %v359_v50  ;;  %v361_v58 = vunpack.c.h.bf16 %v359_v50 }
   0xe   :  { %183 = vmatpush1.bf16.msra.mxu0 %v381_v4 }
   0xf   :  { %184 = vmatprep.subr.bf16.mxu0 %v399_v0 }
  0x12   :  { %185 = vmatpush1.bf16.msra.mxu0 %v382_v5 }
  0x13   :  { %186 = vmatprep.subr.bf16.mxu0 %v399_v0 }
  0x16   :  { %187 = vmatpush1.bf16.msra.mxu0 %v383_v10 }
  0x17   :  { %188 = vmatprep.subr.bf16.mxu0 %v399_v0 }
  0x1a   :  { %189 = vmatpush1.bf16.msra.mxu0 %v384_v11 }
  0x1b   :  { %190 = vmatprep.subr.bf16.mxu0 %v399_v0 }
  0x1e   :  { %191 = vmatpush1.bf16.msra.mxu0 %v385_v12 }
  0x1f   :  { %196 = vmatprep.subr.bf16.mxu0 %v399_v0 }
  0x22   :  { %197 = vmatpush2.bf16.msra.mxu0 %v174_v14 }
  0x23   :  { %198 = vmatprep.subr.bf16.mxu0 %v399_v0 }
  0x26   :  { %199 = vmatpush2.bf16.msra.mxu0 %v387_v15 }
  0x27   :  { %200 = vmatprep.subr.bf16.mxu0 %v399_v0 }
  0x2a   :  { %201 = vmatpush2.bf16.msra.mxu0 %v388_v16 }
  0x2b   :  { %202 = vmatprep.subr.bf16.mxu0 %v399_v0 }
  0x2e   :  { %203 = vmatpush2.bf16.msra.mxu0 %v389_v17 }
  0x2f   :  { %204 = vmatprep.subr.bf16.mxu0 %v399_v0 }
  0x32   :  { %205 = vmatpush2.bf16.msra.mxu0 %v390_v18 }
  0x33   :  { %206 = vmatprep.subr.bf16.mxu0 %v399_v0 }
  0x36   :  { %207 = vmatpush2.bf16.msra.mxu0 %v391_v19 }
  0x39   :  { %209 = vmatmul.mubr.bf16.vlgmr.msra.gmra.mxu0 %v392_v21 }
  0x3a   :  { %347 = vmatprep.mubr.msk.bf16.mxu0 %vm165_vm0, %v331_v22 }
  0x41   :  { %217 = vmatmul.mubr.bf16.gmra.mxu0 %v330_v23 }
  0x7e   :  { %v67_v25 = vpop.permute.xlu0 %66 }
  0x80   :  { %v62_v28 = vpop.permute.xlu1 %61 }
  0x82   :  { %v57_v29 = vpop.permute.xlu0 %56 }
  0xf9   :  { %v210_v26 = vpop.f32.mrf.mxu0 }
  0xfa   :  { %v211_v33 = vadd.f32 %v210_v26, %v57_v29 }
  0xfb   :  { %v212_v27 = vpop.f32.mrf.mxu0 }
  0xfc   :  { %v224_v38 = vmul.f32 0.01, %v211_v33 }
  0xfd   :  { %v213_v30 = vpop.f32.mrf.mxu0 }
  0xfe   :  { %v214_v31 = vadd.f32 %v213_v30, %v62_v28  ;;  %v227_v44 = vmax.f32 %v211_v33, %v224_v38 }
  0xff   :  { %v215_v32 = vpop.f32.mrf.mxu0 }
 0x100   :  { %v225_v35 = vmul.f32 0.01, %v214_v31 }
 0x101   :  { %v218_v34 = vpop.f32.mrf.mxu0 }
 0x102   :  { %v219_v36 = vadd.f32 %v218_v34, %v67_v25  ;;  %v228_v41 = vmax.f32 %v214_v31, %v225_v35 }
 0x103   :  { %v220_v37 = vpop.f32.mrf.mxu0 }
 0x104   :  { %v226_v39 = vmul.f32 0.01, %v219_v36  ;;  %v233_v47 = vpack.c.bf16 %v228_v41, %v227_v44 }
 0x105   :  { %v221_v40 = vpop.f32.mrf.mxu0 }
 0x106   :  { %v229_v42 = vmax.f32 %v219_v36, %v226_v39 }
 0x107   :  { %v222_v43 = vpop.f32.mrf.mxu0 }
 0x108   :  { %v234_v45 = vpack.c.bf16 %v229_v42, %v229_v42 }
 0x10a   :  { %374 = vmatprep.subr.msk.bf16.mxu1 %vm172_vm1, %v234_v45  ;;  %v257_v46 = vsel %vm172_vm1, %v234_v45, 0 }
 0x10b   :  { %367 = vmatpush3.bf16.msra.mxu1 %v257_v46 }
 0x10c   :  { %368 = vmatprep.subr.bf16.mxu1 %v233_v47 }
 0x10f   :  { %369 = vmatpush3.bf16.msra.mxu1 %v233_v47 }
 0x112   :  { %371 = vmatmul.mubr.msk.bf16.vlgmr.msra.gmra.mxu1 %vm249_vm2, %v398_v48 }
 0x1d2   :  { %v372_v53 = vpop.f32.mrf.mxu1 }
 0x1d3   :  { %v302_v54 = vadd.f32 %v372_v53, %v240_v51 }
 0x1d4   :  { %v293_v55 = vpop.f32.mrf.mxu1 }
 0x1d5   :  { %v357_v56 = vpack.c.bf16 %v302_v54, %v302_v54  ;;  %v294_v57 = vadd.f32 %v360_v52, %v293_v55 }
 0x1d6   :  { %v373_v59 = vpop.f32.mrf.mxu1 }
 0x1d7   :  { %323 = vst.msk [vmem:[%s523_s5 + $0x8] sm:$0xf] %vm320_vm3, %v357_v56  ;;  %v355_v60 = vpack.c.bf16 %v294_v57, %v294_v57 }
 0x1d8   :  { %v296_v61 = vpop.f32.mrf.mxu1 }
 0x1d9   :  { %321 = vst.msk [vmem:[%s523_s5] sm:$0xf] %vm320_vm3, %v355_v60  ;;  %v297_v62 = vadd.f32 %v361_v58, %v296_v61 }
 0x1db   :  { %v356_v63 = vpack.c.bf16 %v297_v62, %v297_v62 }
 0x1dd   :  { %322 = vst.msk [vmem:[%s523_s5 + $0x4] sm:$0xf] %vm320_vm3, %v356_v63 }

// kernel: hourglass2_forward.34
= control target key start
LH: loop header
LB: loop body
LE: loop exit
PB: predicated region body
PF: predicated region fallthrough
CT: control target
= control target key end

     0   :  { %v207_v0 = vmov 0.0   ;;  %vm208_vm0 = vmmov 0   ;;  %vm40_vm1 = vcmask 130048   ;;  %v209_v4 = vmov 0   ;;  %s264_s3 = inlined_call_operand.vmem [shape: bf16[16,32], index: 3, kind: input, shape index: {}]   ;;  %s265_s1 = inlined_call_operand.vmem [shape: bf16[16,32], index: 1, kind: input, shape index: {}]   ;;  %s266_s2 = inlined_call_operand.vmem [shape: bf16[16,16], index: 2, kind: input, shape index: {}]   ;;  %s267_s0 = inlined_call_operand.vmem [shape: bf16[16,16], index: 0, kind: input, shape index: {}]   ;;  %s268_s4 = inlined_call_operand.vmem [shape: f32[16,1], index: 4, kind: input, shape index: {}]   ;;  %s269_s5 = inlined_call_operand.vmem [shape: bf16[16,32], index: 5, kind: output, shape index: {}]  }
   0x1   :  { %187 = vmatprep.subr.bf16.mxu0 %v207_v0  ;;  %193 = vmatprep.subr.bf16.mxu1 %v207_v0  ;;  %v203_v1 = vld [vmem:[%s264_s3] sm:$0xff]   ;;  %v141_v7 = vld [vmem:[%s268_s4 + $0x8] sm:$0xff]  ;;  %vm166_vm2 = vcmask 257024  }
   0x2   :  { %v204_v2 = vld [vmem:[%s265_s1] sm:$0xff]   ;;  %189 = vmatprep.mubr.msk.bf16.mxu0 %vm208_vm0, %v207_v0  ;;  %195 = vmatprep.mubr.msk.bf16.mxu1 %vm208_vm0, %v207_v0 }
   0x3   :  { %188 = vmatpush3.bf16.msra.mxu0 %v203_v1  ;;  %v205_v3 = vld [vmem:[%s266_s2] sm:$0xff]   ;;  %202 = vset.pattern.permute.xlu0 %v209_v4 }
   0x4   :  { %194 = vmatpush3.bf16.msra.mxu1 %v204_v2  ;;  %v206_v5 = vld [vmem:[%s267_s0] sm:$0xff]  }
   0x5   :  { %v140_v6 = vld [vmem:[%s268_s4] sm:$0xff] }
   0x6   :  { %190 = vmatmul.mubr.msk.bf16.vlgmr.msra.gmra.mxu0 %vm40_vm1, %v205_v3  ;;  %144 = vperm.xlu0 %202, %v140_v6  }
   0x7   :  { %196 = vmatmul.mubr.msk.bf16.vlgmr.msra.gmra.mxu1 %vm40_vm1, %v206_v5 }
   0xa   :  { %149 = vperm.xlu0 %202, %v141_v7  }
  0x81   :  { %v145_v9 = vpop.permute.xlu0 %144 }
  0x85   :  { %v150_v20 = vpop.permute.xlu0 %149 }
  0xc6   :  { %v78_v8 = vpop.f32.mrf.mxu0 }
  0xc7   :  { %v133_v10 = vpop.f32.mrf.mxu1 }
  0xc8   :  { %v134_v11 = vadd.f32 %v133_v10, %v78_v8  ;;  %v191_v12 = vpop.f32.mrf.mxu0 }
  0xc9   :  { %v197_v13 = vpop.f32.mrf.mxu1 }
  0xca   :  { %v152_v14 = vadd.f32 %v145_v9, %v134_v11  ;;  %v81_v15 = vpop.f32.mrf.mxu0 }
  0xcb   :  { %v136_v16 = vpop.f32.mrf.mxu1 }
  0xcc   :  { %v154_v17 = vmul.f32 0.01, %v152_v14  ;;  %v137_v18 = vadd.f32 %v136_v16, %v81_v15  ;;  %v192_v19 = vpop.f32.mrf.mxu0 }
  0xcd   :  { %v198_v21 = vpop.f32.mrf.mxu1 }
  0xce   :  { %v156_v22 = vmax.f32 %v152_v14, %v154_v17  ;;  %v153_v23 = vadd.f32 %v150_v20, %v137_v18 }
  0xd0   :  { %v181_v24 = vpack.c.bf16 %v156_v22, %v156_v22  ;;  %v155_v25 = vmul.f32 0.01, %v153_v23 }
  0xd2   :  { %167 = vst.msk [vmem:[%s269_s5] sm:$0xf] %vm166_vm2, %v181_v24  ;;  %v157_v26 = vmax.f32 %v153_v23, %v155_v25 }
  0xd4   :  { %v182_v27 = vpack.c.bf16 %v157_v26, %v157_v26 }
  0xd6   :  { %168 = vst.msk [vmem:[%s269_s5 + $0x4] sm:$0xf] %vm166_vm2, %v182_v27 }

// kernel: hourglass2_forward.38
= control target key start
LH: loop header
LB: loop body
LE: loop exit
PB: predicated region body
PF: predicated region fallthrough
CT: control target
= control target key end

     0   :  { %v204_v0 = vmov 0   ;;  %vm110_vm0 = vcmask 130048   ;;  %vm167_vm1 = vcmask 257024   ;;  %s270_s1 = inlined_call_operand.vmem [shape: bf16[144,32], index: 1, kind: input, shape index: {}]   ;;  %s271_s0 = inlined_call_operand.vmem [shape: bf16[16,144], index: 0, kind: input, shape index: {}]   ;;  %s272_s2 = inlined_call_operand.vmem [shape: f32[16,1], index: 2, kind: input, shape index: {}]   ;;  %s273_s3 = inlined_call_operand.vmem [shape: bf16[16,32], index: 3, kind: output, shape index: {}]  }
   0x1   :  { %114 = vmatprep.subr.bf16.mxu0 %v204_v0  ;;  %v192_v1 = vld [vmem:[%s270_s1 + $0x38] sm:$0xff]   ;;  %191 = vset.pattern.permute.xlu0 %v204_v0  ;;  %v193_v2 = vld [vmem:[%s270_s1 + $0x30] sm:$0xff]   ;;  %v194_v3 = vld [vmem:[%s270_s1 + $0x28] sm:$0xff]  }
   0x2   :  { %115 = vmatpush1.bf16.msra.mxu0 %v192_v1  ;;  %v195_v4 = vld [vmem:[%s270_s1 + $0x20] sm:$0xff]   ;;  %v36_v7 = vld [vmem:[%s272_s2 + $0x8] sm:$0xff]  ;;  %v196_v8 = vld [vmem:[%s270_s1 + $0x18] sm:$0xff]  }
   0x3   :  { %116 = vmatprep.subr.bf16.mxu0 %v204_v0  ;;  %v203_v5 = vld [vmem:[%s271_s0 + $0x4] ss:$8 sps:$4 sm:$0xff]   ;;  %v197_v9 = vld [vmem:[%s270_s1 + $0x10] sm:$0xff]   ;;  %v201_v13 = vld [vmem:[%s271_s0] ss:$8 sps:$4 sm:$0xff]  }
   0x4   :  { %v35_v6 = vld [vmem:[%s272_s2] sm:$0xff]  ;;  %185 = vmatprep.mubr.msk.bf16.mxu0 %vm110_vm0, %v203_v5  ;;  %v198_v10 = vld [vmem:[%s270_s1 + $0x8] sm:$0xff]  }
   0x5   :  { %39 = vperm.xlu0 %191, %v35_v6   ;;  %v199_v11 = vld [vmem:[%s270_s1] sm:$0xff]  }
   0x6   :  { %117 = vmatpush1.bf16.msra.mxu0 %v193_v2  ;;  %v200_v12 = vld [vmem:[%s270_s1 + $0x40] sm:$0xff]  }
   0x7   :  { %118 = vmatprep.subr.bf16.mxu0 %v204_v0 }
   0x9   :  { %44 = vperm.xlu0 %191, %v36_v7  }
   0xa   :  { %119 = vmatpush1.bf16.msra.mxu0 %v194_v3 }
   0xb   :  { %120 = vmatprep.subr.bf16.mxu0 %v204_v0 }
   0xe   :  { %121 = vmatpush1.bf16.msra.mxu0 %v195_v4 }
   0xf   :  { %122 = vmatprep.subr.bf16.mxu0 %v204_v0 }
  0x12   :  { %123 = vmatpush1.bf16.msra.mxu0 %v196_v8 }
  0x13   :  { %124 = vmatprep.subr.bf16.mxu0 %v204_v0 }
  0x16   :  { %125 = vmatpush1.bf16.msra.mxu0 %v197_v9 }
  0x17   :  { %126 = vmatprep.subr.bf16.mxu0 %v204_v0 }
  0x1a   :  { %127 = vmatpush1.bf16.msra.mxu0 %v198_v10 }
  0x1b   :  { %128 = vmatprep.subr.bf16.mxu0 %v204_v0 }
  0x1e   :  { %129 = vmatpush1.bf16.msra.mxu0 %v199_v11 }
  0x1f   :  { %144 = vmatprep.subr.bf16.mxu0 %v204_v0 }
  0x22   :  { %145 = vmatpush2.bf16.msra.mxu0 %v200_v12 }
  0x25   :  { %147 = vmatmul.mubr.bf16.vlgmr.msra.gmra.mxu0 %v201_v13 }
  0x80   :  { %v40_v14 = vpop.permute.xlu0 %39 }
  0x84   :  { %v45_v19 = vpop.permute.xlu0 %44 }
  0xe5   :  { %v148_v15 = vpop.f32.mrf.mxu0 }
  0xe6   :  { %v149_v16 = vadd.f32 %v148_v15, %v40_v14 }
  0xe7   :  { %v150_v17 = vpop.f32.mrf.mxu0 }
  0xe8   :  { %v155_v18 = vmul.f32 0.01, %v149_v16 }
  0xe9   :  { %v151_v20 = vpop.f32.mrf.mxu0 }
  0xea   :  { %v157_v21 = vmax.f32 %v149_v16, %v155_v18  ;;  %v152_v22 = vadd.f32 %v151_v20, %v45_v19 }
  0xeb   :  { %v153_v23 = vpop.f32.mrf.mxu0 }
  0xec   :  { %v188_v24 = vpack.c.bf16 %v157_v21, %v157_v21  ;;  %v156_v25 = vmul.f32 0.01, %v152_v22 }
  0xee   :  { %168 = vst.msk [vmem:[%s273_s3] sm:$0xf] %vm167_vm1, %v188_v24  ;;  %v158_v26 = vmax.f32 %v152_v22, %v156_v25 }
  0xf0   :  { %v189_v27 = vpack.c.bf16 %v158_v26, %v158_v26 }
  0xf2   :  { %169 = vst.msk [vmem:[%s273_s3 + $0x4] sm:$0xf] %vm167_vm1, %v189_v27 }

// kernel: hourglass2_forward.33
= control target key start
LH: loop header
LB: loop body
LE: loop exit
PB: predicated region body
PF: predicated region fallthrough
CT: control target
= control target key end

     0   :  { %v1543_v1 = vmov 0   ;;  %vm740_vm0 = vcmask 1043456   ;;  %vm715_vm1 = vcmask 64512   ;;  %vm1131_vm2 = vcmask 27648   ;;  %s2136_s1 = inlined_call_operand.vmem [shape: bf16[648,4], index: 1, kind: input, shape index: {}]   ;;  %s2137_s0 = inlined_call_operand.vmem [shape: bf16[128,648], index: 0, kind: input, shape index: {}]   ;;  %s2138_s2 = inlined_call_operand.vmem [shape: f32[128,1], index: 2, kind: input, shape index: {}]   ;;  %s2139_s3 = inlined_call_operand.vmem [shape: bf16[128,4], index: 3, kind: output, shape index: {}]  }
   0x1   :  { %v1430_v0 = vld [vmem:[%s2136_s1 + $0x78] sm:$0xff]   ;;  %1428 = vset.pattern.permute.xlu0 %v1543_v1  ;;  %1429 = vset.pattern.permute.xlu1 %v1543_v1  ;;  %v1434_v5 = vld [vmem:[%s2136_s1 + $0x70] sm:$0xff]   ;;  %v1438_v9 = vld [vmem:[%s2136_s1 + $0x68] sm:$0xff]  }
   0x2   :  { %v1431_v2 = vld [vmem:[%s2136_s1 + $0xf8] sm:$0xff]   ;;  %1281 = vmatprep.subr.bf16.mxu0 %v1430_v0  ;;  %v1435_v6 = vld [vmem:[%s2136_s1 + $0xf0] sm:$0xff]   ;;  %v1439_v10 = vld [vmem:[%s2136_s1 + $0xe8] sm:$0xff]  }
   0x3   :  { %v1432_v3 = vld [vmem:[%s2136_s1 + $0x38] sm:$0xff]   ;;  %1345 = vmatprep.subr.bf16.mxu1 %v1431_v2  ;;  %v1436_v7 = vld [vmem:[%s2136_s1 + $0x30] sm:$0xff]   ;;  %v1440_v11 = vld [vmem:[%s2136_s1 + $0x28] sm:$0xff]  }
   0x4   :  { %v1433_v4 = vld [vmem:[%s2136_s1 + $0xb8] sm:$0xff]   ;;  %1282 = vmatpush3.bf16.msra.mxu0 %v1432_v3  ;;  %v1437_v8 = vld [vmem:[%s2136_s1 + $0xb0] sm:$0xff]   ;;  %v1441_v12 = vld [vmem:[%s2136_s1 + $0xa8] sm:$0xff]  }
   0x5   :  { %1346 = vmatpush3.bf16.msra.mxu1 %v1433_v4  ;;  %1283 = vmatprep.subr.bf16.mxu0 %v1434_v5  ;;  %v1442_v13 = vld [vmem:[%s2136_s1 + $0x60] sm:$0xff]   ;;  %v1446_v17 = vld [vmem:[%s2136_s1 + $0x58] sm:$0xff]   ;;  %v1450_v21 = vld [vmem:[%s2136_s1 + $0x50] sm:$0xff]  }
   0x6   :  { %1347 = vmatprep.subr.bf16.mxu1 %v1435_v6  ;;  %v1443_v14 = vld [vmem:[%s2136_s1 + $0xe0] sm:$0xff]   ;;  %v1447_v18 = vld [vmem:[%s2136_s1 + $0xd8] sm:$0xff]   ;;  %v1451_v22 = vld [vmem:[%s2136_s1 + $0xd0] sm:$0xff]  }
   0x7   :  { %v1444_v15 = vld [vmem:[%s2136_s1 + $0x20] sm:$0xff]   ;;  %v1448_v19 = vld [vmem:[%s2136_s1 + $0x18] sm:$0xff]   ;;  %v1452_v23 = vld [vmem:[%s2136_s1 + $0x10] sm:$0xff]  }
   0x8   :  { %1284 = vmatpush3.bf16.msra.mxu0 %v1436_v7  ;;  %v1445_v16 = vld [vmem:[%s2136_s1 + $0xa0] sm:$0xff]   ;;  %v1449_v20 = vld [vmem:[%s2136_s1 + $0x98] sm:$0xff]   ;;  %v1453_v24 = vld [vmem:[%s2136_s1 + $0x90] sm:$0xff]  }
   0x9   :  { %1348 = vmatpush3.bf16.msra.mxu1 %v1437_v8  ;;  %1285 = vmatprep.subr.bf16.mxu0 %v1438_v9  ;;  %v1454_v25 = vld [vmem:[%s2136_s1 + $0x48] sm:$0xff]   ;;  %v1458_v29 = vld [vmem:[%s2136_s1 + $0x40] sm:$0xff]   ;;  %v1468_v37 = vld [vmem:[%s2136_s1 + $0x138] sm:$0xff]  }
   0xa   :  { %1349 = vmatprep.subr.bf16.mxu1 %v1439_v10  ;;  %v1455_v26 = vld [vmem:[%s2136_s1 + $0xc8] sm:$0xff]   ;;  %v1459_v30 = vld [vmem:[%s2136_s1 + $0xc0] sm:$0xff]   ;;  %v1471_v39 = vld [vmem:[%s2137_s0 + $0x3c] ss:$24 sps:$4 sm:$0xff]  }
   0xb   :  { %v1456_v27 = vld [vmem:[%s2136_s1 + $0x8] sm:$0xff]   ;;  %v1460_v31 = vld [vmem:[%s2136_s1] sm:$0xff]   ;;  %v1475_v40 = vld [vmem:[%s2136_s1 + $0x130] sm:$0xff]  }
   0xc   :  { %1286 = vmatpush3.bf16.msra.mxu0 %v1440_v11  ;;  %v1457_v28 = vld [vmem:[%s2136_s1 + $0x88] sm:$0xff]   ;;  %v1461_v32 = vld [vmem:[%s2136_s1 + $0x80] sm:$0xff]   ;;  %v1474_v42 = vld [vmem:[%s2137_s0 + $0x38] ss:$24 sps:$4 sm:$0xff]  }
   0xd   :  { %1350 = vmatpush3.bf16.msra.mxu1 %v1441_v12  ;;  %1287 = vmatprep.subr.bf16.mxu0 %v1442_v13  ;;  %v1462_v33 = vld [vmem:[%s2137_s0] ss:$24 sps:$4 sm:$0xff]   ;;  %v1464_v34 = vld [vmem:[%s2137_s0 + $0x4] ss:$24 sps:$4 sm:$0xff]   ;;  %v1469_v38 = vld [vmem:[%s2137_s0 + $0x34] ss:$24 sps:$4 sm:$0xff]  }
   0xe   :  { %1351 = vmatprep.subr.bf16.mxu1 %v1443_v14  ;;  %v1465_v35 = vld [vmem:[%s2137_s0 + $0x8] ss:$24 sps:$4 sm:$0xff]   ;;  %v1467_v36 = vld [vmem:[%s2137_s0 + $0xc] ss:$24 sps:$4 sm:$0xff]   ;;  %776 = vmatprep.mubr.bf16.mxu0 %v1464_v34  ;;  %v1485_v50 = vld [vmem:[%s2137_s0 + $0x9c] ss:$24 sps:$4 sm:$0xff]  }
   0xf   :  { %873 = vmatprep.mubr.bf16.mxu1 %v1467_v36  ;;  %v1473_v41 = vld [vmem:[%s2137_s0 + $0x30] ss:$24 sps:$4 sm:$0xff]   ;;  %v1476_v43 = vld [vmem:[%s2137_s0 + $0x64] ss:$24 sps:$4 sm:$0xff]   ;;  %v1480_v47 = vld [vmem:[%s2137_s0 + $0x60] ss:$24 sps:$4 sm:$0xff]  }
  0x10   :  { %1288 = vmatpush3.bf16.msra.mxu0 %v1444_v15  ;;  %v1478_v44 = vld [vmem:[%s2137_s0 + $0x6c] ss:$24 sps:$4 sm:$0xff]   ;;  %v1481_v48 = vld [vmem:[%s2137_s0 + $0x68] ss:$24 sps:$4 sm:$0xff]   ;;  %v1490_v51 = vld [vmem:[%s2136_s1 + $0x118] sm:$0xff]  }
  0x11   :  { %1352 = vmatpush3.bf16.msra.mxu1 %v1445_v16  ;;  %1289 = vmatprep.subr.bf16.mxu0 %v1446_v17  ;;  %v1482_v45 = vld [vmem:[%s2136_s1 + $0x128] sm:$0xff]   ;;  %v1487_v46 = vld [vmem:[%s2136_s1 + $0x120] sm:$0xff]   ;;  %v1497_v52 = vld [vmem:[%s2136_s1 + $0x110] sm:$0xff]  }
  0x12   :  { %1353 = vmatprep.subr.bf16.mxu1 %v1447_v18  ;;  %v1483_v49 = vld [vmem:[%s2137_s0 + $0x94] ss:$24 sps:$4 sm:$0xff]   ;;  %v1488_v53 = vld [vmem:[%s2137_s0 + $0x90] ss:$24 sps:$4 sm:$0xff]   ;;  %v1491_v55 = vld [vmem:[%s2137_s0 + $0xc4] ss:$24 sps:$4 sm:$0xff]  }
  0x13   :  { %v1489_v54 = vld [vmem:[%s2137_s0 + $0x98] ss:$24 sps:$4 sm:$0xff]   ;;  %v1493_v56 = vld [vmem:[%s2137_s0 + $0xcc] ss:$24 sps:$4 sm:$0xff]   ;;  %v1518_v59 = vld [vmem:[%s2136_s1 + $0x140] ss:$0 sps:$4 sm:$0xff]  }
  0x14   :  { %1290 = vmatpush3.bf16.msra.mxu0 %v1448_v19  ;;  %v1504_v57 = vld [vmem:[%s2136_s1 + $0x108] sm:$0xff]   ;;  %v1511_v58 = vld [vmem:[%s2136_s1 + $0x100] sm:$0xff]   ;;  %v1500_v63 = vld [vmem:[%s2137_s0 + $0xfc] ss:$24 sps:$4 sm:$0xff]   ;;  %v742_v0 = vsel %vm740_vm0, %v1518_v59, 0 }
  0x15   :  { %1354 = vmatpush3.bf16.msra.mxu1 %v1449_v20  ;;  %1291 = vmatprep.subr.bf16.mxu0 %v1450_v21  ;;  %v1495_v60 = vld [vmem:[%s2137_s0 + $0xc0] ss:$24 sps:$4 sm:$0xff]   ;;  %v1498_v62 = vld [vmem:[%s2137_s0 + $0xf4] ss:$24 sps:$4 sm:$0xff]   ;;  %v1502_v4 = vld [vmem:[%s2137_s0 + $0xf0] ss:$24 sps:$4 sm:$0xff]  }
  0x16   :  { %1355 = vmatprep.subr.bf16.mxu1 %v1451_v22  ;;  %v1496_v61 = vld [vmem:[%s2137_s0 + $0xc8] ss:$24 sps:$4 sm:$0xff]   ;;  %v146_v3 = vld [vmem:[%s2138_s2 + $0x10] sm:$0xff]  ;;  %v1505_v6 = vld [vmem:[%s2137_s0 + $0x124] ss:$24 sps:$4 sm:$0xff]  }
  0x17   :  { %v144_v2 = vld [vmem:[%s2138_s2] sm:$0xff]  ;;  %172 = vperm.xlu1 %1429, %v146_v3   ;;  %v1503_v5 = vld [vmem:[%s2137_s0 + $0xf8] ss:$24 sps:$4 sm:$0xff]   ;;  %v149_v10 = vld [vmem:[%s2138_s2 + $0x28] sm:$0xff] }
  0x18   :  { %1292 = vmatpush3.bf16.msra.mxu0 %v1452_v23  ;;  %162 = vperm.xlu0 %1428, %v144_v2   ;;  %v147_v7 = vld [vmem:[%s2138_s2 + $0x18] sm:$0xff]  ;;  %v1507_v8 = vld [vmem:[%s2137_s0 + $0x12c] ss:$24 sps:$4 sm:$0xff]   ;;  %v150_v12 = vld [vmem:[%s2138_s2 + $0x30] sm:$0xff] }
  0x19   :  { %1356 = vmatpush3.bf16.msra.mxu1 %v1453_v24  ;;  %1293 = vmatprep.subr.bf16.mxu0 %v1454_v25  ;;  %v148_v9 = vld [vmem:[%s2138_s2 + $0x20] sm:$0xff]  ;;  %v1512_v14 = vld [vmem:[%s2137_s0 + $0x154] ss:$24 sps:$4 sm:$0xff]   ;;  %v151_v15 = vld [vmem:[%s2138_s2 + $0x38] sm:$0xff] }
  0x1a   :  { %1357 = vmatprep.subr.bf16.mxu1 %v1455_v26  ;;  %v1509_v11 = vld [vmem:[%s2137_s0 + $0x120] ss:$24 sps:$4 sm:$0xff]   ;;  %v1514_v16 = vld [vmem:[%s2137_s0 + $0x15c] ss:$24 sps:$4 sm:$0xff]   ;;  %v153_v18 = vld [vmem:[%s2138_s2 + $0x48] sm:$0xff] }
  0x1b   :  { %177 = vperm.xlu1 %1429, %v147_v7   ;;  %v1510_v13 = vld [vmem:[%s2137_s0 + $0x128] ss:$24 sps:$4 sm:$0xff]   ;;  %v154_v20 = vld [vmem:[%s2138_s2 + $0x50] sm:$0xff]  ;;  %v155_v23 = vld [vmem:[%s2138_s2 + $0x58] sm:$0xff] }
  0x1c   :  { %1294 = vmatpush3.bf16.msra.mxu0 %v1456_v27  ;;  %v152_v17 = vld [vmem:[%s2138_s2 + $0x40] sm:$0xff]  ;;  %v1516_v19 = vld [vmem:[%s2137_s0 + $0x150] ss:$24 sps:$4 sm:$0xff]   ;;  %v1521_v22 = vld [vmem:[%s2137_s0 + $0x14] ss:$24 sps:$4 sm:$0xff]  }
  0x1d   :  { %1358 = vmatpush3.bf16.msra.mxu1 %v1457_v28  ;;  %1295 = vmatprep.subr.bf16.mxu0 %v1458_v29  ;;  %v1517_v21 = vld [vmem:[%s2137_s0 + $0x158] ss:$24 sps:$4 sm:$0xff]   ;;  %v1524_v24 = vld [vmem:[%s2137_s0 + $0xd4] ss:$24 sps:$4 sm:$0xff]   ;;  %v156_v25 = vld [vmem:[%s2138_s2 + $0x60] sm:$0xff] }
  0x1e   :  { %1359 = vmatprep.subr.bf16.mxu1 %v1459_v30  ;;  %v157_v26 = vld [vmem:[%s2138_s2 + $0x68] sm:$0xff]  ;;  %v158_v28 = vld [vmem:[%s2138_s2 + $0x70] sm:$0xff]  ;;  %v1525_v30 = vld [vmem:[%s2137_s0 + $0x44] ss:$24 sps:$4 sm:$0xff]  }
  0x1f   :  { %187 = vperm.xlu1 %1429, %v149_v10   ;;  %v1519_v27 = vld [vmem:[%s2137_s0 + $0x10] ss:$24 sps:$4 sm:$0xff]   ;;  %v1530_v34 = vld [vmem:[%s2137_s0 + $0x100] ss:$24 sps:$4 sm:$0xff]   ;;  %v1533_v36 = vld [vmem:[%s2137_s0 + $0x134] ss:$24 sps:$4 sm:$0xff]  }
  0x20   :  { %1296 = vmatpush3.bf16.msra.mxu0 %v1460_v31  ;;  %v1522_v29 = vld [vmem:[%s2137_s0 + $0xd0] ss:$24 sps:$4 sm:$0xff]   ;;  %v159_v31 = vld [vmem:[%s2138_s2 + $0x78] sm:$0xff] }
  0x21   :  { %1360 = vmatpush3.bf16.msra.mxu1 %v1461_v32  ;;  %938 = vmatprep.subr.bf16.mxu0 %v1543_v1  ;;  %v1527_v32 = vld [vmem:[%s2137_s0 + $0x104] ss:$24 sps:$4 sm:$0xff]  }
  0x22   :  { %1409 = vmatprep.subr.bf16.mxu1 %v1543_v1 }
  0x23   :  { %777 = vmatmul.mubr.bf16.vlgmr.msra.gmra.mxu0 %v1462_v33  ;;  %197 = vperm.xlu1 %1429, %v151_v15   ;;  %v1529_v33 = vld [vmem:[%s2137_s0 + $0x40] ss:$24 sps:$4 sm:$0xff]  }
  0x24   :  { %874 = vmatmul.mubr.bf16.vlgmr.msra.gmra.mxu1 %v1465_v35  ;;  %939 = vmatpush1.bf16.msra.mxu0 %v1468_v37  ;;  %v1531_v35 = vld [vmem:[%s2137_s0 + $0x74] ss:$24 sps:$4 sm:$0xff]  }
  0x25   :  { %1418 = vmatpush1.bf16.msra.mxu1 %v1468_v37  ;;  %784 = vmatprep.mubr.bf16.mxu0 %v1469_v38  ;;  %v1535_v37 = vld [vmem:[%s2137_s0 + $0x70] ss:$24 sps:$4 sm:$0xff]  }
  0x26   :  { %881 = vmatprep.mubr.bf16.mxu1 %v1471_v39  ;;  %940 = vmatprep.subr.bf16.mxu0 %v1543_v1  ;;  %v1536_v38 = vld [vmem:[%s2137_s0 + $0x130] ss:$24 sps:$4 sm:$0xff]   ;;  %v1537_v39 = vld [vmem:[%s2137_s0 + $0xa4] ss:$24 sps:$4 sm:$0xff]  }
  0x27   :  { %1410 = vmatprep.subr.bf16.mxu1 %v1543_v1  ;;  %207 = vperm.xlu1 %1429, %v153_v18  }
  0x28   :  { %941 = vmatpush1.bf16.msra.mxu0 %v1475_v40 }
  0x29   :  { %1419 = vmatpush1.bf16.msra.mxu1 %v1475_v40  ;;  %942 = vmatprep.subr.bf16.mxu0 %v1543_v1  ;;  %v1539_v40 = vld [vmem:[%s2137_s0 + $0x164] ss:$24 sps:$4 sm:$0xff]  }
  0x2a   :  { %1411 = vmatprep.subr.bf16.mxu1 %v1543_v1 }
  0x2b   :  { %785 = vmatmul.mubr.bf16.gmra.mxu0 %v1473_v41  ;;  %217 = vperm.xlu1 %1429, %v155_v23   ;;  %v1541_v41 = vld [vmem:[%s2137_s0 + $0xa0] ss:$24 sps:$4 sm:$0xff]  }
  0x2c   :  { %882 = vmatmul.mubr.bf16.gmra.mxu1 %v1474_v42  ;;  %792 = vmatprep.mubr.bf16.mxu0 %v1476_v43  ;;  %v1542_v42 = vld [vmem:[%s2137_s0 + $0x160] ss:$24 sps:$4 sm:$0xff]  }
  0x2d   :  { %889 = vmatprep.mubr.bf16.mxu1 %v1478_v44  ;;  %943 = vmatpush1.bf16.msra.mxu0 %v1482_v45 }
  0x2e   :  { %1420 = vmatpush1.bf16.msra.mxu1 %v1482_v45  ;;  %944 = vmatprep.subr.bf16.mxu0 %v1543_v1 }
  0x2f   :  { %1412 = vmatprep.subr.bf16.mxu1 %v1543_v1  ;;  %227 = vperm.xlu1 %1429, %v157_v26  }
  0x31   :  { %945 = vmatpush1.bf16.msra.mxu0 %v1487_v46 }
  0x32   :  { %1421 = vmatpush1.bf16.msra.mxu1 %v1487_v46  ;;  %946 = vmatprep.subr.bf16.mxu0 %v1543_v1 }
  0x33   :  { %793 = vmatmul.mubr.bf16.gmra.mxu0 %v1480_v47  ;;  %1413 = vmatprep.subr.bf16.mxu1 %v1543_v1 }
  0x34   :  { %890 = vmatmul.mubr.bf16.gmra.mxu1 %v1481_v48  ;;  %800 = vmatprep.mubr.bf16.mxu0 %v1483_v49 }
  0x35   :  { %897 = vmatprep.mubr.bf16.mxu1 %v1485_v50  ;;  %947 = vmatpush1.bf16.msra.mxu0 %v1490_v51 }
  0x36   :  { %1422 = vmatpush1.bf16.msra.mxu1 %v1490_v51  ;;  %948 = vmatprep.subr.bf16.mxu0 %v1543_v1 }
  0x37   :  { %1414 = vmatprep.subr.bf16.mxu1 %v1543_v1  ;;  %237 = vperm.xlu1 %1429, %v159_v31  }
  0x39   :  { %949 = vmatpush1.bf16.msra.mxu0 %v1497_v52 }
  0x3a   :  { %1423 = vmatpush1.bf16.msra.mxu1 %v1497_v52  ;;  %950 = vmatprep.subr.bf16.mxu0 %v1543_v1 }
  0x3b   :  { %801 = vmatmul.mubr.bf16.gmra.mxu0 %v1488_v53  ;;  %1415 = vmatprep.subr.bf16.mxu1 %v1543_v1 }
  0x3c   :  { %898 = vmatmul.mubr.bf16.gmra.mxu1 %v1489_v54  ;;  %808 = vmatprep.mubr.bf16.mxu0 %v1491_v55 }
  0x3d   :  { %905 = vmatprep.mubr.bf16.mxu1 %v1493_v56  ;;  %951 = vmatpush1.bf16.msra.mxu0 %v1504_v57 }
  0x3e   :  { %1424 = vmatpush1.bf16.msra.mxu1 %v1504_v57  ;;  %952 = vmatprep.subr.bf16.mxu0 %v1543_v1 }
  0x3f   :  { %1416 = vmatprep.subr.bf16.mxu1 %v1543_v1 }
  0x41   :  { %953 = vmatpush1.bf16.msra.mxu0 %v1511_v58 }
  0x42   :  { %1425 = vmatpush1.bf16.msra.mxu1 %v1511_v58  ;;  %968 = vmatprep.subr.bf16.mxu0 %v1543_v1 }
  0x43   :  { %809 = vmatmul.mubr.bf16.gmra.mxu0 %v1495_v60  ;;  %1417 = vmatprep.subr.bf16.mxu1 %v1543_v1  ;;  %v145_v1 = vld [vmem:[%s2138_s2 + $0x8] sm:$0xff] }
  0x44   :  { %906 = vmatmul.mubr.bf16.gmra.mxu1 %v1496_v61  ;;  %816 = vmatprep.mubr.bf16.mxu0 %v1498_v62 }
  0x45   :  { %913 = vmatprep.mubr.bf16.mxu1 %v1500_v63  ;;  %969 = vmatpush2.bf16.msra.mxu0 %v742_v0 }
  0x46   :  { %1426 = vmatpush2.bf16.msra.mxu1 %v742_v0  ;;  %167 = vperm.xlu0 %1428, %v145_v1  }
  0x4a   :  { %182 = vperm.xlu0 %1428, %v148_v9  }
  0x4b   :  { %817 = vmatmul.mubr.bf16.gmra.mxu0 %v1502_v4 }
  0x4c   :  { %914 = vmatmul.mubr.bf16.gmra.mxu1 %v1503_v5  ;;  %824 = vmatprep.mubr.bf16.mxu0 %v1505_v6 }
  0x4d   :  { %921 = vmatprep.mubr.bf16.mxu1 %v1507_v8 }
  0x4e   :  { %192 = vperm.xlu0 %1428, %v150_v12  }
  0x52   :  { %202 = vperm.xlu0 %1428, %v152_v17  }
  0x53   :  { %825 = vmatmul.mubr.bf16.gmra.mxu0 %v1509_v11 }
  0x54   :  { %922 = vmatmul.mubr.bf16.gmra.mxu1 %v1510_v13  ;;  %832 = vmatprep.mubr.bf16.mxu0 %v1512_v14 }
  0x55   :  { %929 = vmatprep.mubr.bf16.mxu1 %v1514_v16 }
  0x56   :  { %212 = vperm.xlu0 %1428, %v154_v20  }
  0x5a   :  { %222 = vperm.xlu0 %1428, %v156_v25  }
  0x5b   :  { %833 = vmatmul.mubr.bf16.gmra.mxu0 %v1516_v19 }
  0x5c   :  { %930 = vmatmul.mubr.bf16.gmra.mxu1 %v1517_v21  ;;  %1241 = vmatprep.mubr.msk.bf16.mxu0 %vm715_vm1, %v1521_v22 }
  0x5d   :  { %1245 = vmatprep.mubr.msk.bf16.mxu1 %vm715_vm1, %v1524_v24 }
  0x5e   :  { %232 = vperm.xlu0 %1428, %v158_v28  }
  0x63   :  { %971 = vmatmul.mubr.bf16.vlgmr.msra.gmra.mxu0 %v1519_v27 }
  0x64   :  { %1003 = vmatmul.mubr.bf16.vlgmr.msra.gmra.mxu1 %v1522_v29  ;;  %1242 = vmatprep.mubr.msk.bf16.mxu0 %vm715_vm1, %v1525_v30 }
  0x65   :  { %1246 = vmatprep.mubr.msk.bf16.mxu1 %vm715_vm1, %v1527_v32 }
  0x6b   :  { %979 = vmatmul.mubr.bf16.gmra.mxu0 %v1529_v33 }
  0x6c   :  { %1011 = vmatmul.mubr.bf16.gmra.mxu1 %v1530_v34  ;;  %1243 = vmatprep.mubr.msk.bf16.mxu0 %vm715_vm1, %v1531_v35 }
  0x6d   :  { %1247 = vmatprep.mubr.msk.bf16.mxu1 %vm715_vm1, %v1533_v36 }
  0x73   :  { %987 = vmatmul.mubr.bf16.gmra.mxu0 %v1535_v37 }
  0x74   :  { %1019 = vmatmul.mubr.bf16.gmra.mxu1 %v1536_v38  ;;  %1244 = vmatprep.mubr.msk.bf16.mxu0 %vm715_vm1, %v1537_v39 }
  0x75   :  { %1248 = vmatprep.mubr.msk.bf16.mxu1 %vm715_vm1, %v1539_v40 }
  0x7b   :  { %995 = vmatmul.mubr.bf16.gmra.mxu0 %v1541_v41 }
  0x7c   :  { %1027 = vmatmul.mubr.bf16.gmra.mxu1 %v1542_v42 }
  0x92   :  { %v173_v22 = vpop.permute.xlu1 %172 }
  0x93   :  { %v163_v18 = vpop.permute.xlu0 %162 }
  0x96   :  { %v1975_v30 = vpop.permute.xlu1 %177 }
  0x9a   :  { %v1987_v36 = vpop.permute.xlu1 %187 }
  0xc1   :  { %v168_v26 = vpop.permute.xlu0 %167 }
  0xc5   :  { %v1979_v32 = vpop.permute.xlu0 %182 }
  0xc9   :  { %v1991_v38 = vpop.permute.xlu0 %192 }
  0xca   :  { %2148 = vst [vmem:[#allocation10_spill] sm:$0xff] %v1991_v38 }
  0xe3   :  { %v1297_v43 = vpop.f32.mrf.mxu0 }
  0xe4   :  { %v1907_v44 = vpop.f32.mrf.mxu1 }
  0xe5   :  { %v1298_v45 = vpop.f32.mrf.mxu0 }
  0xe6   :  { %v1909_v46 = vpop.f32.mrf.mxu1  ;;  %v1299_v41 = vadd.f32 %v1298_v45, %v1297_v43 }
  0xe7   :  { %v1911_v47 = vpop.f32.mrf.mxu0 }
  0xe8   :  { %v1913_v48 = vpop.f32.mrf.mxu1 }
  0xe9   :  { %v1915_v49 = vpop.f32.mrf.mxu0 }
  0xea   :  { %v1917_v50 = vpop.f32.mrf.mxu1  ;;  %v1302_v38 = vadd.f32 %v1915_v49, %v1911_v47 }
  0xeb   :  { %v1919_v51 = vpop.f32.mrf.mxu0 }
  0xec   :  { %v1921_v52 = vpop.f32.mrf.mxu1 }
  0xed   :  { %v1923_v53 = vpop.f32.mrf.mxu0 }
  0xee   :  { %v1925_v54 = vpop.f32.mrf.mxu1 }
  0xef   :  { %v1927_v55 = vpop.f32.mrf.mxu0 }
  0xf0   :  { %v1929_v56 = vpop.f32.mrf.mxu1 }
  0xf1   :  { %v1931_v57 = vpop.f32.mrf.mxu0 }
  0xf2   :  { %v1933_v58 = vpop.f32.mrf.mxu1 }
  0xf3   :  { %v1935_v59 = vpop.f32.mrf.mxu0 }
  0xf4   :  { %v1937_v60 = vpop.f32.mrf.mxu1 }
  0xf5   :  { %v1939_v61 = vpop.f32.mrf.mxu0 }
  0xf6   :  { %v1941_v62 = vpop.f32.mrf.mxu1 }
  0xf7   :  { %v1943_v63 = vpop.f32.mrf.mxu0 }
  0xf8   :  { %v1945_v0 = vpop.f32.mrf.mxu1 }
  0xf9   :  { %2140 = vst [vmem:[#allocation2_spill] sm:$0xff] %v1945_v0  ;;  %v1947_v2 = vpop.f32.mrf.mxu0 }
  0xfa   :  { %v1949_v3 = vpop.f32.mrf.mxu1 }
  0xfb   :  { %2141 = vst [vmem:[#allocation3_spill] sm:$0xff] %v1949_v3  ;;  %v1951_v4 = vpop.f32.mrf.mxu0  ;;  %v779_v3 = vadd.f32 %v1299_v41, %v163_v18  ;;  %v782_v41 = vadd.f32 %v1302_v38, %v168_v26 }
  0xfc   :  { %v1953_v1 = vpop.f32.mrf.mxu1 }
  0xfd   :  { %2142 = vst [vmem:[#allocation4_spill] sm:$0xff] %v1953_v1  ;;  %v1955_v5 = vpop.f32.mrf.mxu0  ;;  %v203_v1 = vpop.permute.xlu0 %202 }
  0xfe   :  { %v1957_v6 = vpop.f32.mrf.mxu1 }
  0xff   :  { %2143 = vst [vmem:[#allocation5_spill] sm:$0xff] %v1957_v6  ;;  %v1959_v7 = vpop.f32.mrf.mxu0 }
 0x100   :  { %2144 = vst [vmem:[#allocation6_spill] sm:$0xff] %v1959_v7  ;;  %v1961_v8 = vpop.f32.mrf.mxu1 }
 0x101   :  { %2145 = vst [vmem:[#allocation7_spill] sm:$0xff] %v1961_v8  ;;  %v1963_v9 = vpop.f32.mrf.mxu0 }
 0x102   :  { %2146 = vst [vmem:[#allocation8_spill] sm:$0xff] %v1963_v9  ;;  %v1965_v10 = vpop.f32.mrf.mxu1 }
 0x103   :  { %2147 = vst [vmem:[#allocation9_spill] sm:$0xff] %v1965_v10  ;;  %v1321_v11 = vpop.f32.mrf.mxu0  ;;  %v1999_v10 = vpop.permute.xlu1 %197 }
 0x104   :  { %v1385_v12 = vpop.f32.mrf.mxu1  ;;  %2151 = vst [vmem:[#allocation13_spill] sm:$0xff] %v1999_v10 }
 0x105   :  { %v1322_v13 = vpop.f32.mrf.mxu0 }
 0x106   :  { %v1386_v14 = vpop.f32.mrf.mxu1  ;;  %v1323_v8 = vadd.f32 %v1322_v13, %v1321_v11  ;;  %v1363_v11 = vadd.f32 %v1909_v46, %v1907_v44  ;;  %v1366_v44 = vadd.f32 %v1917_v50, %v1913_v48 }
 0x107   :  { %v1324_v15 = vpop.f32.mrf.mxu0  ;;  %v208_v13 = vpop.permute.xlu1 %207 }
 0x108   :  { %v1388_v16 = vpop.f32.mrf.mxu1  ;;  %v811_v0 = vadd.f32 %v1323_v8, %v203_v1  ;;  %v876_v1 = vadd.f32 %v1363_v11, %v779_v3  ;;  %v879_v26 = vadd.f32 %v1366_v44, %v782_v41 }
 0x109   :  { %v1325_v17 = vpop.f32.mrf.mxu0 }
 0x10a   :  { %v1389_v19 = vpop.f32.mrf.mxu1  ;;  %v1326_v43 = vadd.f32 %v1325_v17, %v1324_v15  ;;  %v213_v15 = vpop.permute.xlu0 %212 }
 0x10b   :  { %v1327_v20 = vpop.f32.mrf.mxu0 }
 0x10c   :  { %v1967_v21 = vpop.f32.mrf.mxu1  ;;  %v814_v8 = vadd.f32 %v1326_v43, %v208_v13 }
 0x10d   :  { %v1328_v23 = vpop.f32.mrf.mxu0 }
 0x10e   :  { %v1969_v24 = vpop.f32.mrf.mxu1  ;;  %v1329_v47 = vadd.f32 %v1328_v23, %v1327_v20 }
 0x10f   :  { %v1330_v25 = vpop.f32.mrf.mxu0 }
 0x110   :  { %v1971_v27 = vpop.f32.mrf.mxu1  ;;  %v819_v20 = vadd.f32 %v1329_v47, %v213_v15  ;;  %v1375_v15 = vadd.f32 %v1941_v62, %v1937_v60 }
 0x111   :  { %v1331_v28 = vpop.f32.mrf.mxu0 }
 0x112   :  { %v1973_v29 = vpop.f32.mrf.mxu1  ;;  %v1332_v38 = vadd.f32 %v1331_v28, %v1330_v25 }
 0x113   :  { %v1977_v31 = vpop.f32.mrf.mxu0 }
 0x114   :  { %v1981_v33 = vpop.f32.mrf.mxu1 }
 0x115   :  { %v1983_v34 = vpop.f32.mrf.mxu0 }
 0x116   :  { %v1985_v35 = vpop.f32.mrf.mxu1 }
 0x117   :  { %v1989_v37 = vpop.f32.mrf.mxu0 }
 0x118   :  { %v1993_v39 = vpop.f32.mrf.mxu1 }
 0x119   :  { %2149 = vst [vmem:[#allocation11_spill] sm:$0xff] %v1993_v39  ;;  %v1995_v40 = vpop.f32.mrf.mxu0 }
 0x11a   :  { %v1997_v42 = vpop.f32.mrf.mxu1 }
 0x11b   :  { %2150 = vst [vmem:[#allocation12_spill] sm:$0xff] %v1997_v42  ;;  %v2001_v6 = vpop.f32.mrf.mxu0  ;;  %v1387_v42 = vadd.f32 %v1386_v14, %v1385_v12 }
 0x11c   :  { %v2003_v9 = vpop.f32.mrf.mxu1 }
 0x11d   :  { %2152 = vst [vmem:[#allocation14_spill] sm:$0xff] %v2003_v9  ;;  %v2005_v7 = vpop.f32.mrf.mxu0  ;;  %v1305_v9 = vadd.f32 %v1923_v53, %v1919_v51  ;;  %v1308_v51 = vadd.f32 %v1931_v57, %v1927_v55  ;;  %v1390_v53 = vadd.f32 %v1389_v19, %v1388_v16  ;;  %v1393_v55 = vadd.f32 %v1969_v24, %v1967_v21  ;;  %v218_v57 = vpop.permute.xlu1 %217 }
 0x11e   :  { %v2009_v39 = vpop.f32.mrf.mxu1  ;;  %v1335_v21 = vadd.f32 %v1983_v34, %v1977_v31  ;;  %v1396_v31 = vadd.f32 %v1973_v29, %v1971_v27 }
 0x11f   :  { %2153 = vst [vmem:[#allocation15_spill] sm:$0xff] %v2009_v39  ;;  %v2011_v45 = vpop.f32.mrf.mxu0  ;;  %v908_v39 = vadd.f32 %v1387_v42, %v811_v0  ;;  %v1369_v0 = vadd.f32 %v1925_v54, %v1921_v52  ;;  %v911_v50 = vadd.f32 %v1390_v53, %v814_v8  ;;  %v1372_v54 = vadd.f32 %v1933_v58, %v1929_v56 }
 0x120   :  { %2154 = vst [vmem:[#allocation16_spill] sm:$0xff] %v2011_v45  ;;  %v2015_v10 = vpop.f32.mrf.mxu1  ;;  %v787_v45 = vadd.f32 %v1305_v9, %v173_v22  ;;  %v1311_v9 = vadd.f32 %v1939_v61, %v1935_v59  ;;  %v790_v22 = vadd.f32 %v1308_v51, %v1975_v30  ;;  %v916_v59 = vadd.f32 %v1393_v55, %v819_v20 }
 0x121   :  { %2155 = vst [vmem:[#allocation17_spill] sm:$0xff] %v2015_v10  ;;  %v2019_v18 = vpop.f32.mrf.mxu0  ;;  %v822_v61 = vadd.f32 %v1332_v38, %v218_v57  ;;  %v228_v27 = vpop.permute.xlu1 %227 }
 0x122   :  { %v2021_v49 = vpop.f32.mrf.mxu1  ;;  %v884_v52 = vadd.f32 %v1369_v0, %v787_v45  ;;  %v795_v30 = vadd.f32 %v1311_v9, %v1979_v32  ;;  %v223_v45 = vpop.permute.xlu0 %222 }
 0x123   :  { %v972_v17 = vpop.f32.mrf.mxu0  ;;  %v827_v53 = vadd.f32 %v1335_v21, %v223_v45  ;;  %v919_v20 = vadd.f32 %v1396_v31, %v822_v61  ;;  %v2161_v61 = vld [vmem:[#allocation6_spill] sm:$0xff]  ;;  %v2162_v21 = vld [vmem:[#allocation8_spill] sm:$0xff] }
 0x124   :  { %v973_v46 = vadd.f32 %v972_v17, %v876_v1  ;;  %v1004_v10 = vpop.f32.mrf.mxu1  ;;  %v1314_v1 = vadd.f32 %v1947_v2, %v1943_v63  ;;  %v887_v2 = vadd.f32 %v1372_v54, %v790_v22  ;;  %v1338_v17 = vadd.f32 %v1995_v40, %v1989_v37  ;;  %v2159_v22 = vld [vmem:[#allocation12_spill] sm:$0xff] }
 0x125   :  { %v1005_v12 = vadd.f32 %v1004_v10, %v908_v39  ;;  %v974_v14 = vpop.f32.mrf.mxu0  ;;  %v892_v37 = vadd.f32 %v1375_v15, %v795_v30  ;;  %v1317_v40 = vadd.f32 %v1955_v5, %v1951_v4  ;;  %v1341_v4 = vadd.f32 %v2005_v7, %v2001_v6 }
 0x126   :  { %v1035_v23 = vmul.f32 0.01, %v973_v46  ;;  %v1006_v3 = vpop.f32.mrf.mxu1  ;;  %v830_v9 = vadd.f32 %v1338_v17, %v228_v27 }
 0x127   :  { %v1043_v42 = vmul.f32 0.01, %v1005_v12  ;;  %v975_v48 = vpop.f32.mrf.mxu0 }
 0x128   :  { %v1051_v10 = vmax.f32 %v973_v46, %v1035_v23  ;;  %v976_v16 = vadd.f32 %v975_v48, %v879_v26  ;;  %v1007_v19 = vpop.f32.mrf.mxu1  ;;  %v798_v23 = vadd.f32 %v1314_v1, %v1987_v36  ;;  %v1399_v26 = vadd.f32 %v1985_v35, %v1981_v33  ;;  %v2157_v48 = vld [vmem:[#allocation3_spill] sm:$0xff] }
 0x129   :  { %v1059_v39 = vmax.f32 %v1005_v12, %v1043_v42  ;;  %v1008_v43 = vadd.f32 %v1007_v19, %v911_v50  ;;  %v977_v11 = vpop.f32.mrf.mxu0  ;;  %v2156_v42 = vld [vmem:[#allocation2_spill] sm:$0xff]  ;;  %v2158_v19 = vld [vmem:[#allocation11_spill] sm:$0xff] }
 0x12a   :  { %v1265_v25 = vpack.c.bf16 %v1051_v10, %v1051_v10  ;;  %v1036_v28 = vmul.f32 0.01, %v976_v16  ;;  %v1009_v13 = vpop.f32.mrf.mxu1  ;;  %v1378_v50 = vadd.f32 %v2157_v48, %v2156_v42  ;;  %v2170_v42 = vld [vmem:[#allocation9_spill] sm:$0xff] }
 0x12b   :  { %v1273_v24 = vpack.c.bf16 %v1059_v39, %v1059_v39  ;;  %v1044_v41 = vmul.f32 0.01, %v1008_v43  ;;  %v980_v47 = vpop.f32.mrf.mxu0  ;;  %v1402_v39 = vadd.f32 %v2159_v22, %v2158_v19 }
 0x12c   :  { %1132 = vst.msk [vmem:[%s2139_s3] sm:$0xf] %vm1131_vm2, %v1265_v25  ;;  %v1052_v56 = vmax.f32 %v976_v16, %v1036_v28  ;;  %v981_v58 = vadd.f32 %v980_v47, %v884_v52  ;;  %v1012_v8 = vpop.f32.mrf.mxu1  ;;  %v924_v16 = vadd.f32 %v1399_v26, %v827_v53  ;;  %v2160_v25 = vld [vmem:[#allocation10_spill] sm:$0xff] }
 0x12d   :  { %1140 = vst.msk [vmem:[%s2139_s3 + $0x20] sm:$0xf] %vm1131_vm2, %v1273_v24  ;;  %v1060_v32 = vmax.f32 %v1008_v43, %v1044_v41  ;;  %v1013_v34 = vadd.f32 %v1012_v8, %v916_v59  ;;  %v982_v63 = vpop.f32.mrf.mxu0  ;;  %v233_v43 = vpop.permute.xlu0 %232  ;;  %v803_v28 = vadd.f32 %v1317_v40, %v2160_v25  ;;  %v895_v59 = vadd.f32 %v1378_v50, %v798_v23 }
 0x12e   :  { %v1266_v44 = vpack.c.bf16 %v1052_v56, %v1052_v56  ;;  %v1037_v46 = vmul.f32 0.01, %v981_v58  ;;  %v1014_v51 = vpop.f32.mrf.mxu1  ;;  %v1320_v24 = vadd.f32 %v2162_v21, %v2161_v61  ;;  %v927_v1 = vadd.f32 %v1402_v39, %v830_v9  ;;  %v2163_v56 = vld [vmem:[#allocation16_spill] sm:$0xff]  ;;  %v2165_v63 = vld [vmem:[#allocation5_spill] sm:$0xff] }
 0x12f   :  { %v1274_v29 = vpack.c.bf16 %v1060_v32, %v1060_v32  ;;  %v1045_v12 = vmul.f32 0.01, %v1013_v34  ;;  %v983_v14 = vpop.f32.mrf.mxu0  ;;  %v835_v45 = vadd.f32 %v1341_v4, %v233_v43  ;;  %v2167_v51 = vld [vmem:[#allocation15_spill] sm:$0xff] }
 0x130   :  { %1133 = vst.msk [vmem:[%s2139_s3 + $0x4] sm:$0xf] %vm1131_vm2, %v1266_v44  ;;  %v1053_v60 = vmax.f32 %v981_v58, %v1037_v46  ;;  %v984_v62 = vadd.f32 %v983_v14, %v887_v2  ;;  %v1015_v3 = vpop.f32.mrf.mxu1  ;;  %v1344_v58 = vadd.f32 %v2019_v18, %v2163_v56  ;;  %v2166_v46 = vld [vmem:[#allocation14_spill] sm:$0xff] }
 0x131   :  { %1141 = vst.msk [vmem:[%s2139_s3 + $0x24] sm:$0xf] %vm1131_vm2, %v1274_v29  ;;  %v1061_v36 = vmax.f32 %v1013_v34, %v1045_v12  ;;  %v1016_v0 = vadd.f32 %v1015_v3, %v919_v20  ;;  %v985_v38 = vpop.f32.mrf.mxu0  ;;  %v2164_v34 = vld [vmem:[#allocation4_spill] sm:$0xff]  ;;  %v1405_v53 = vadd.f32 %v2167_v51, %v2166_v46  ;;  %v2168_v12 = vld [vmem:[#allocation13_spill] sm:$0xff]  ;;  %v238_v20 = vpop.permute.xlu1 %237 }
 0x132   :  { %v1267_v55 = vpack.c.bf16 %v1053_v60, %v1053_v60  ;;  %v1038_v57 = vmul.f32 0.01, %v984_v62  ;;  %v1017_v10 = vpop.f32.mrf.mxu1  ;;  %v1381_v2 = vadd.f32 %v2165_v63, %v2164_v34  ;;  %v806_v14 = vadd.f32 %v1320_v24, %v2168_v12  ;;  %v2169_v38 = vld [vmem:[#allocation7_spill] sm:$0xff] }
 0x133   :  { %v1275_v5 = vpack.c.bf16 %v1061_v36, %v1061_v36  ;;  %v1046_v33 = vmul.f32 0.01, %v1016_v0  ;;  %v988_v35 = vpop.f32.mrf.mxu0  ;;  %v1384_v48 = vadd.f32 %v2170_v42, %v2169_v38 }
 0x134   :  { %1134 = vst.msk [vmem:[%s2139_s3 + $0x8] sm:$0xf] %vm1131_vm2, %v1267_v55  ;;  %v1054_v11 = vmax.f32 %v984_v62, %v1038_v57  ;;  %v989_v52 = vadd.f32 %v988_v35, %v892_v37  ;;  %v1020_v54 = vpop.f32.mrf.mxu1  ;;  %v900_v3 = vadd.f32 %v1381_v2, %v803_v28  ;;  %v838_v37 = vadd.f32 %v1344_v58, %v238_v20  ;;  %v2171_v57 = vld [vmem:[#allocation17_spill] sm:$0xff] }
 0x135   :  { %1142 = vst.msk [vmem:[%s2139_s3 + $0x28] sm:$0xf] %vm1131_vm2, %v1275_v5  ;;  %v1062_v6 = vmax.f32 %v1016_v0, %v1046_v33  ;;  %v1021_v7 = vadd.f32 %v1020_v54, %v924_v16  ;;  %v990_v13 = vpop.f32.mrf.mxu0  ;;  %v932_v0 = vadd.f32 %v1405_v53, %v835_v45  ;;  %v1408_v10 = vadd.f32 %v2021_v49, %v2171_v57 }
 0x136   :  { %v1268_v41 = vpack.c.bf16 %v1054_v11, %v1054_v11  ;;  %v1039_v47 = vmul.f32 0.01, %v989_v52  ;;  %v1022_v30 = vpop.f32.mrf.mxu1  ;;  %v903_v22 = vadd.f32 %v1384_v48, %v806_v14 }
 0x137   :  { %v1276_v8 = vpack.c.bf16 %v1062_v6, %v1062_v6  ;;  %v1047_v31 = vmul.f32 0.01, %v1021_v7  ;;  %v991_v32 = vpop.f32.mrf.mxu0 }
 0x138   :  { %1135 = vst.msk [vmem:[%s2139_s3 + $0xc] sm:$0xf] %vm1131_vm2, %v1268_v41  ;;  %v1055_v15 = vmax.f32 %v989_v52, %v1039_v47  ;;  %v992_v17 = vadd.f32 %v991_v32, %v895_v59  ;;  %v1023_v44 = vpop.f32.mrf.mxu1  ;;  %v935_v52 = vadd.f32 %v1408_v10, %v838_v37 }
 0x139   :  { %1143 = vst.msk [vmem:[%s2139_s3 + $0x2c] sm:$0xf] %vm1131_vm2, %v1276_v8  ;;  %v1063_v18 = vmax.f32 %v1021_v7, %v1047_v31  ;;  %v1024_v27 = vadd.f32 %v1023_v44, %v927_v1  ;;  %v993_v29 = vpop.f32.mrf.mxu0 }
 0x13a   :  { %v1269_v23 = vpack.c.bf16 %v1055_v15, %v1055_v15  ;;  %v1040_v60 = vmul.f32 0.01, %v992_v17  ;;  %v1025_v62 = vpop.f32.mrf.mxu1 }
 0x13b   :  { %v1277_v40 = vpack.c.bf16 %v1063_v18, %v1063_v18  ;;  %v1048_v26 = vmul.f32 0.01, %v1024_v27  ;;  %v996_v36 = vpop.f32.mrf.mxu0 }
 0x13c   :  { %1136 = vst.msk [vmem:[%s2139_s3 + $0x10] sm:$0xf] %vm1131_vm2, %v1269_v23  ;;  %v1056_v50 = vmax.f32 %v992_v17, %v1040_v60  ;;  %v997_v9 = vadd.f32 %v996_v36, %v900_v3  ;;  %v1028_v55 = vpop.f32.mrf.mxu1 }
 0x13d   :  { %1144 = vst.msk [vmem:[%s2139_s3 + $0x30] sm:$0xf] %vm1131_vm2, %v1277_v40  ;;  %v1064_v4 = vmax.f32 %v1024_v27, %v1048_v26  ;;  %v1029_v5 = vadd.f32 %v1028_v55, %v932_v0  ;;  %v998_v33 = vpop.f32.mrf.mxu0 }
 0x13e   :  { %v1270_v35 = vpack.c.bf16 %v1056_v50, %v1056_v50  ;;  %v1041_v16 = vmul.f32 0.01, %v997_v9  ;;  %v1030_v19 = vpop.f32.mrf.mxu1 }
 0x13f   :  { %v1278_v39 = vpack.c.bf16 %v1064_v4, %v1064_v4  ;;  %v1049_v43 = vmul.f32 0.01, %v1029_v5  ;;  %v999_v11 = vpop.f32.mrf.mxu0 }
 0x140   :  { %1137 = vst.msk [vmem:[%s2139_s3 + $0x14] sm:$0xf] %vm1131_vm2, %v1270_v35  ;;  %v1057_v49 = vmax.f32 %v997_v9, %v1041_v16  ;;  %v1000_v54 = vadd.f32 %v999_v11, %v903_v22  ;;  %v1031_v25 = vpop.f32.mrf.mxu1 }
 0x141   :  { %1145 = vst.msk [vmem:[%s2139_s3 + $0x34] sm:$0xf] %vm1131_vm2, %v1278_v39  ;;  %v1065_v28 = vmax.f32 %v1029_v5, %v1049_v43  ;;  %v1032_v6 = vadd.f32 %v1031_v25, %v935_v52  ;;  %v1001_v7 = vpop.f32.mrf.mxu0 }
 0x142   :  { %v1271_v13 = vpack.c.bf16 %v1057_v49, %v1057_v49  ;;  %v1042_v59 = vmul.f32 0.01, %v1000_v54  ;;  %v1033_v61 = vpop.f32.mrf.mxu1 }
 0x143   :  { %v1279_v21 = vpack.c.bf16 %v1065_v28, %v1065_v28  ;;  %v1050_v24 = vmul.f32 0.01, %v1032_v6 }
 0x144   :  { %1138 = vst.msk [vmem:[%s2139_s3 + $0x18] sm:$0xf] %vm1131_vm2, %v1271_v13  ;;  %v1058_v41 = vmax.f32 %v1000_v54, %v1042_v59 }
 0x145   :  { %1146 = vst.msk [vmem:[%s2139_s3 + $0x38] sm:$0xf] %vm1131_vm2, %v1279_v21  ;;  %v1066_v47 = vmax.f32 %v1032_v6, %v1050_v24 }
 0x146   :  { %v1272_v30 = vpack.c.bf16 %v1058_v41, %v1058_v41 }
 0x147   :  { %v1280_v1 = vpack.c.bf16 %v1066_v47, %v1066_v47 }
 0x148   :  { %1139 = vst.msk [vmem:[%s2139_s3 + $0x1c] sm:$0xf] %vm1131_vm2, %v1272_v30 }
 0x149   :  { %1147 = vst.msk [vmem:[%s2139_s3 + $0x3c] sm:$0xf] %vm1131_vm2, %v1280_v1 }

// kernel: hourglass2_forward.37
= control target key start
LH: loop header
LB: loop body
LE: loop exit
PB: predicated region body
PF: predicated region fallthrough
CT: control target
= control target key end

     0   :  { %v277_v0 = vmov 0   ;;  %vm116_vm0 = vcmask 130048   ;;  %v278_v14 = vmov 0.0   ;;  %vm279_vm1 = vmmov 0   ;;  %s366_s1 = inlined_call_operand.vmem [shape: bf16[144,32], index: 1, kind: input, shape index: {}]   ;;  %s367_s0 = inlined_call_operand.vmem [shape: bf16[16,144], index: 0, kind: input, shape index: {}]   ;;  %s368_s2 = inlined_call_operand.vmem [shape: f32[16,1], index: 2, kind: input, shape index: {}]   ;;  %s369_s3 = inlined_call_operand.vmem [shape: bf16[16,16], index: 3, kind: input, shape index: {}]   ;;  %s370_s4 = inlined_call_operand.vmem [shape: f32[16,32], index: 4, kind: input, shape index: {}]   ;;  %s371_s5 = inlined_call_operand.vmem [shape: bf16[16,32], index: 5, kind: output, shape index: {}]  }
   0x1   :  { %120 = vmatprep.subr.bf16.mxu0 %v277_v0  ;;  %v264_v1 = vld [vmem:[%s366_s1 + $0x38] sm:$0xff]   ;;  %263 = vset.pattern.permute.xlu0 %v277_v0  ;;  %v265_v2 = vld [vmem:[%s366_s1 + $0x30] sm:$0xff]   ;;  %v266_v3 = vld [vmem:[%s366_s1 + $0x28] sm:$0xff]   ;;  %vm227_vm2 = vcmask 257024  }
   0x2   :  { %121 = vmatpush1.bf16.msra.mxu0 %v264_v1  ;;  %v267_v4 = vld [vmem:[%s366_s1 + $0x20] sm:$0xff]   ;;  %v42_v7 = vld [vmem:[%s368_s2 + $0x8] sm:$0xff]  ;;  %v268_v8 = vld [vmem:[%s366_s1 + $0x18] sm:$0xff]   ;;  %254 = vmatprep.subr.bf16.mxu1 %v278_v14 }
   0x3   :  { %122 = vmatprep.subr.bf16.mxu0 %v277_v0  ;;  %v275_v5 = vld [vmem:[%s367_s0 + $0x4] ss:$8 sps:$4 sm:$0xff]   ;;  %v269_v9 = vld [vmem:[%s366_s1 + $0x10] sm:$0xff]   ;;  %v273_v13 = vld [vmem:[%s367_s0] ss:$8 sps:$4 sm:$0xff]   ;;  %256 = vmatprep.mubr.msk.bf16.mxu1 %vm279_vm1, %v278_v14 }
   0x4   :  { %v41_v6 = vld [vmem:[%s368_s2] sm:$0xff]  ;;  %245 = vmatprep.mubr.msk.bf16.mxu0 %vm116_vm0, %v275_v5  ;;  %v270_v10 = vld [vmem:[%s366_s1 + $0x8] sm:$0xff]  }
   0x5   :  { %45 = vperm.xlu0 %263, %v41_v6   ;;  %v271_v11 = vld [vmem:[%s366_s1] sm:$0xff]   ;;  %v169_v33 = vld [vmem:[%s370_s4 + $0x8] sm:$0xff] }
   0x6   :  { %123 = vmatpush1.bf16.msra.mxu0 %v265_v2  ;;  %v272_v12 = vld [vmem:[%s366_s1 + $0x40] sm:$0xff]  }
   0x7   :  { %124 = vmatprep.subr.bf16.mxu0 %v277_v0  ;;  %v276_v28 = vld [vmem:[%s369_s3] sm:$0xff]  }
   0x8   :  { %v168_v29 = vld [vmem:[%s370_s4] sm:$0xff] }
   0x9   :  { %50 = vperm.xlu0 %263, %v42_v7  }
   0xa   :  { %125 = vmatpush1.bf16.msra.mxu0 %v266_v3 }
   0xb   :  { %126 = vmatprep.subr.bf16.mxu0 %v277_v0 }
   0xe   :  { %127 = vmatpush1.bf16.msra.mxu0 %v267_v4 }
   0xf   :  { %128 = vmatprep.subr.bf16.mxu0 %v277_v0 }
  0x12   :  { %129 = vmatpush1.bf16.msra.mxu0 %v268_v8 }
  0x13   :  { %130 = vmatprep.subr.bf16.mxu0 %v277_v0 }
  0x16   :  { %131 = vmatpush1.bf16.msra.mxu0 %v269_v9 }
  0x17   :  { %132 = vmatprep.subr.bf16.mxu0 %v277_v0 }
  0x1a   :  { %133 = vmatpush1.bf16.msra.mxu0 %v270_v10 }
  0x1b   :  { %134 = vmatprep.subr.bf16.mxu0 %v277_v0 }
  0x1e   :  { %135 = vmatpush1.bf16.msra.mxu0 %v271_v11 }
  0x1f   :  { %150 = vmatprep.subr.bf16.mxu0 %v277_v0 }
  0x22   :  { %151 = vmatpush2.bf16.msra.mxu0 %v272_v12 }
  0x25   :  { %153 = vmatmul.mubr.bf16.vlgmr.msra.gmra.mxu0 %v273_v13 }
  0x80   :  { %v46_v15 = vpop.permute.xlu0 %45 }
  0x84   :  { %v51_v19 = vpop.permute.xlu0 %50 }
  0xe5   :  { %v154_v16 = vpop.f32.mrf.mxu0 }
  0xe6   :  { %v155_v17 = vadd.f32 %v154_v16, %v46_v15 }
  0xe7   :  { %v156_v18 = vpop.f32.mrf.mxu0 }
  0xe8   :  { %v161_v21 = vmul.f32 0.01, %v155_v17 }
  0xe9   :  { %v157_v20 = vpop.f32.mrf.mxu0 }
  0xea   :  { %v158_v22 = vadd.f32 %v157_v20, %v51_v19  ;;  %v163_v25 = vmax.f32 %v155_v17, %v161_v21 }
  0xeb   :  { %v159_v23 = vpop.f32.mrf.mxu0 }
  0xec   :  { %v162_v24 = vmul.f32 0.01, %v158_v22 }
  0xee   :  { %v164_v26 = vmax.f32 %v158_v22, %v162_v24 }
  0xf0   :  { %v167_v27 = vpack.c.bf16 %v164_v26, %v163_v25 }
  0xf2   :  { %255 = vmatpush3.bf16.msra.mxu1 %v167_v27 }
  0xf5   :  { %257 = vmatmul.mubr.msk.bf16.vlgmr.msra.gmra.mxu1 %vm116_vm0, %v276_v28 }
 0x1b5   :  { %v212_v30 = vpop.f32.mrf.mxu1 }
 0x1b6   :  { %v213_v31 = vadd.f32 %v212_v30, %v168_v29 }
 0x1b7   :  { %v258_v32 = vpop.f32.mrf.mxu1 }
 0x1b8   :  { %v250_v34 = vpack.c.bf16 %v213_v31, %v213_v31 }
 0x1b9   :  { %v215_v35 = vpop.f32.mrf.mxu1 }
 0x1ba   :  { %228 = vst.msk [vmem:[%s371_s5] sm:$0xf] %vm227_vm2, %v250_v34  ;;  %v216_v36 = vadd.f32 %v215_v35, %v169_v33 }
 0x1bb   :  { %v259_v37 = vpop.f32.mrf.mxu1 }
 0x1bc   :  { %v251_v38 = vpack.c.bf16 %v216_v36, %v216_v36 }
 0x1be   :  { %229 = vst.msk [vmem:[%s371_s5 + $0x4] sm:$0xf] %vm227_vm2, %v251_v38 }

// kernel: hourglass2_forward.39
= control target key start
LH: loop header
LB: loop body
LE: loop exit
PB: predicated region body
PF: predicated region fallthrough
CT: control target
= control target key end

     0   :  { %v283_v0 = vmov 0   ;;  %vm116_vm0 = vcmask 130048   ;;  %v284_v14 = vmov 0.0   ;;  %vm285_vm1 = vmmov 0   ;;  %s369_s1 = inlined_call_operand.vmem [shape: bf16[144,32], index: 1, kind: input, shape index: {}]   ;;  %s370_s0 = inlined_call_operand.vmem [shape: bf16[16,144], index: 0, kind: input, shape index: {}]   ;;  %s371_s2 = inlined_call_operand.vmem [shape: f32[16,1], index: 2, kind: input, shape index: {}]   ;;  %s372_s3 = inlined_call_operand.vmem [shape: bf16[16,16], index: 3, kind: input, shape index: {}]   ;;  %s373_s4 = inlined_call_operand.vmem [shape: bf16[16,32], index: 4, kind: input, shape index: {}]   ;;  %s374_s5 = inlined_call_operand.vmem [shape: bf16[16,32], index: 5, kind: output, shape index: {}]  }
   0x1   :  { %120 = vmatprep.subr.bf16.mxu0 %v283_v0  ;;  %v270_v1 = vld [vmem:[%s369_s1 + $0x38] sm:$0xff]   ;;  %269 = vset.pattern.permute.xlu0 %v283_v0  ;;  %v271_v2 = vld [vmem:[%s369_s1 + $0x30] sm:$0xff]   ;;  %v272_v3 = vld [vmem:[%s369_s1 + $0x28] sm:$0xff]   ;;  %vm229_vm2 = vcmask 257024  }
   0x2   :  { %121 = vmatpush1.bf16.msra.mxu0 %v270_v1  ;;  %v273_v4 = vld [vmem:[%s369_s1 + $0x20] sm:$0xff]   ;;  %v42_v7 = vld [vmem:[%s371_s2 + $0x8] sm:$0xff]  ;;  %v274_v8 = vld [vmem:[%s369_s1 + $0x18] sm:$0xff]   ;;  %260 = vmatprep.subr.bf16.mxu1 %v284_v14 }
   0x3   :  { %122 = vmatprep.subr.bf16.mxu0 %v283_v0  ;;  %v281_v5 = vld [vmem:[%s370_s0 + $0x4] ss:$8 sps:$4 sm:$0xff]   ;;  %v275_v9 = vld [vmem:[%s369_s1 + $0x10] sm:$0xff]   ;;  %v279_v13 = vld [vmem:[%s370_s0] ss:$8 sps:$4 sm:$0xff]   ;;  %262 = vmatprep.mubr.msk.bf16.mxu1 %vm285_vm1, %v284_v14 }
   0x4   :  { %v41_v6 = vld [vmem:[%s371_s2] sm:$0xff]  ;;  %247 = vmatprep.mubr.msk.bf16.mxu0 %vm116_vm0, %v281_v5  ;;  %v276_v10 = vld [vmem:[%s369_s1 + $0x8] sm:$0xff]  }
   0x5   :  { %45 = vperm.xlu0 %269, %v41_v6   ;;  %v277_v11 = vld [vmem:[%s369_s1] sm:$0xff]  }
   0x6   :  { %123 = vmatpush1.bf16.msra.mxu0 %v271_v2  ;;  %v278_v12 = vld [vmem:[%s369_s1 + $0x40] sm:$0xff]  }
   0x7   :  { %124 = vmatprep.subr.bf16.mxu0 %v283_v0  ;;  %v282_v28 = vld [vmem:[%s372_s3] sm:$0xff]  }
   0x8   :  { %v255_v29 = vld [vmem:[%s373_s4] sm:$0xff]  }
   0x9   :  { %50 = vperm.xlu0 %269, %v42_v7   ;;  %v256_v30 = vunpack.c.l.bf16 %v255_v29  ;;  %v257_v33 = vunpack.c.h.bf16 %v255_v29 }
   0xa   :  { %125 = vmatpush1.bf16.msra.mxu0 %v272_v3 }
   0xb   :  { %126 = vmatprep.subr.bf16.mxu0 %v283_v0 }
   0xe   :  { %127 = vmatpush1.bf16.msra.mxu0 %v273_v4 }
   0xf   :  { %128 = vmatprep.subr.bf16.mxu0 %v283_v0 }
  0x12   :  { %129 = vmatpush1.bf16.msra.mxu0 %v274_v8 }
  0x13   :  { %130 = vmatprep.subr.bf16.mxu0 %v283_v0 }
  0x16   :  { %131 = vmatpush1.bf16.msra.mxu0 %v275_v9 }
  0x17   :  { %132 = vmatprep.subr.bf16.mxu0 %v283_v0 }
  0x1a   :  { %133 = vmatpush1.bf16.msra.mxu0 %v276_v10 }
  0x1b   :  { %134 = vmatprep.subr.bf16.mxu0 %v283_v0 }
  0x1e   :  { %135 = vmatpush1.bf16.msra.mxu0 %v277_v11 }
  0x1f   :  { %150 = vmatprep.subr.bf16.mxu0 %v283_v0 }
  0x22   :  { %151 = vmatpush2.bf16.msra.mxu0 %v278_v12 }
  0x25   :  { %153 = vmatmul.mubr.bf16.vlgmr.msra.gmra.mxu0 %v279_v13 }
  0x80   :  { %v46_v15 = vpop.permute.xlu0 %45 }
  0x84   :  { %v51_v19 = vpop.permute.xlu0 %50 }
  0xe5   :  { %v154_v16 = vpop.f32.mrf.mxu0 }
  0xe6   :  { %v155_v17 = vadd.f32 %v154_v16, %v46_v15 }
  0xe7   :  { %v156_v18 = vpop.f32.mrf.mxu0 }
  0xe8   :  { %v161_v21 = vmul.f32 0.01, %v155_v17 }
  0xe9   :  { %v157_v20 = vpop.f32.mrf.mxu0 }
  0xea   :  { %v158_v22 = vadd.f32 %v157_v20, %v51_v19  ;;  %v163_v25 = vmax.f32 %v155_v17, %v161_v21 }
  0xeb   :  { %v159_v23 = vpop.f32.mrf.mxu0 }
  0xec   :  { %v162_v24 = vmul.f32 0.01, %v158_v22 }
  0xee   :  { %v164_v26 = vmax.f32 %v158_v22, %v162_v24 }
  0xf0   :  { %v167_v27 = vpack.c.bf16 %v164_v26, %v163_v25 }
  0xf2   :  { %261 = vmatpush3.bf16.msra.mxu1 %v167_v27 }
  0xf5   :  { %263 = vmatmul.mubr.msk.bf16.vlgmr.msra.gmra.mxu1 %vm116_vm0, %v282_v28 }
 0x1b5   :  { %v214_v31 = vpop.f32.mrf.mxu1 }
 0x1b6   :  { %v215_v32 = vadd.f32 %v256_v30, %v214_v31 }
 0x1b7   :  { %v264_v34 = vpop.f32.mrf.mxu1 }
 0x1b8   :  { %v252_v35 = vpack.c.bf16 %v215_v32, %v215_v32 }
 0x1b9   :  { %v217_v36 = vpop.f32.mrf.mxu1 }
 0x1ba   :  { %230 = vst.msk [vmem:[%s374_s5] sm:$0xf] %vm229_vm2, %v252_v35  ;;  %v218_v37 = vadd.f32 %v257_v33, %v217_v36 }
 0x1bb   :  { %v265_v38 = vpop.f32.mrf.mxu1 }
 0x1bc   :  { %v253_v39 = vpack.c.bf16 %v218_v37, %v218_v37 }
 0x1be   :  { %231 = vst.msk [vmem:[%s374_s5 + $0x4] sm:$0xf] %vm229_vm2, %v253_v39 }

// kernel: hourglass2_forward.40
= control target key start
LH: loop header
LB: loop body
LE: loop exit
PB: predicated region body
PF: predicated region fallthrough
CT: control target
= control target key end

     0   :  { %v732_v0 = vmov 0   ;;  %vm371_vm0 = vcmask 392192   ;;  %vm562_vm1 = vcmask 257024   ;;  %s955_s1 = inlined_call_operand.vmem [shape: bf16[432,32], index: 1, kind: input, shape index: {}]   ;;  %s956_s0 = inlined_call_operand.vmem [shape: bf16[64,432], index: 0, kind: input, shape index: {}]   ;;  %s957_s2 = inlined_call_operand.vmem [shape: f32[64,1], index: 2, kind: input, shape index: {}]   ;;  %s958_s3 = inlined_call_operand.vmem [shape: bf16[64,32], index: 3, kind: output, shape index: {}]  }
   0x1   :  { %449 = vmatprep.subr.bf16.mxu1 %v732_v0  ;;  %v681_v1 = vld [vmem:[%s955_s1 + $0x78] sm:$0xff]   ;;  %679 = vset.pattern.permute.xlu0 %v732_v0  ;;  %v684_v4 = vld [vmem:[%s955_s1 + $0x70] sm:$0xff]   ;;  %v687_v7 = vld [vmem:[%s955_s1 + $0x68] sm:$0xff]  }
   0x2   :  { %v682_v2 = vld [vmem:[%s955_s1 + $0xb8] sm:$0xff]   ;;  %680 = vset.pattern.permute.xlu1 %v732_v0  ;;  %638 = vmatprep.subr.bf16.mxu0 %v681_v1  ;;  %v685_v5 = vld [vmem:[%s955_s1 + $0xb0] sm:$0xff]   ;;  %v688_v8 = vld [vmem:[%s955_s1 + $0xa8] sm:$0xff]  }
   0x3   :  { %v683_v3 = vld [vmem:[%s955_s1 + $0x38] sm:$0xff]   ;;  %450 = vmatpush1.bf16.msra.mxu1 %v682_v2  ;;  %v686_v6 = vld [vmem:[%s955_s1 + $0x30] sm:$0xff]   ;;  %v689_v9 = vld [vmem:[%s955_s1 + $0x28] sm:$0xff]  }
   0x4   :  { %639 = vmatpush3.bf16.msra.mxu0 %v683_v3  ;;  %451 = vmatprep.subr.bf16.mxu1 %v732_v0  ;;  %v690_v10 = vld [vmem:[%s955_s1 + $0x60] sm:$0xff]   ;;  %v693_v13 = vld [vmem:[%s955_s1 + $0x58] sm:$0xff]   ;;  %v696_v16 = vld [vmem:[%s955_s1 + $0x50] sm:$0xff]  }
   0x5   :  { %640 = vmatprep.subr.bf16.mxu0 %v684_v4  ;;  %v691_v11 = vld [vmem:[%s955_s1 + $0xa0] sm:$0xff]   ;;  %v694_v14 = vld [vmem:[%s955_s1 + $0x98] sm:$0xff]   ;;  %v697_v17 = vld [vmem:[%s955_s1 + $0x90] sm:$0xff]  }
   0x6   :  { %v692_v12 = vld [vmem:[%s955_s1 + $0x20] sm:$0xff]   ;;  %v695_v15 = vld [vmem:[%s955_s1 + $0x18] sm:$0xff]   ;;  %v698_v18 = vld [vmem:[%s955_s1 + $0x10] sm:$0xff]  }
   0x7   :  { %452 = vmatpush1.bf16.msra.mxu1 %v685_v5  ;;  %v699_v19 = vld [vmem:[%s955_s1 + $0x48] sm:$0xff]   ;;  %v702_v22 = vld [vmem:[%s955_s1 + $0x40] sm:$0xff]   ;;  %v708_v28 = vld [vmem:[%s955_s1 + $0xd0] sm:$0xff]  }
   0x8   :  { %641 = vmatpush3.bf16.msra.mxu0 %v686_v6  ;;  %453 = vmatprep.subr.bf16.mxu1 %v732_v0  ;;  %v700_v20 = vld [vmem:[%s955_s1 + $0x88] sm:$0xff]   ;;  %v707_v23 = vld [vmem:[%s956_s0 + $0x4] ss:$16 sps:$4 sm:$0xff]   ;;  %v705_v26 = vld [vmem:[%s956_s0] ss:$16 sps:$4 sm:$0xff]  }
   0x9   :  { %642 = vmatprep.subr.bf16.mxu0 %v687_v7  ;;  %v701_v21 = vld [vmem:[%s955_s1 + $0x8] sm:$0xff]   ;;  %v703_v24 = vld [vmem:[%s955_s1 + $0x80] sm:$0xff]   ;;  %416 = vmatprep.mubr.bf16.mxu0 %v707_v23  ;;  %v87_v32 = vld [vmem:[%s957_s2 + $0x10] sm:$0xff] }
   0xa   :  { %v704_v25 = vld [vmem:[%s955_s1] sm:$0xff]   ;;  %v716_v27 = vld [vmem:[%s956_s0 + $0xc] ss:$16 sps:$4 sm:$0xff]   ;;  %105 = vperm.xlu1 %680, %v87_v32   ;;  %v714_v38 = vld [vmem:[%s956_s0 + $0x8] ss:$16 sps:$4 sm:$0xff]  }
   0xb   :  { %454 = vmatpush1.bf16.msra.mxu1 %v688_v8  ;;  %v710_v29 = vld [vmem:[%s956_s0 + $0x24] ss:$16 sps:$4 sm:$0xff]   ;;  %618 = vmatprep.mubr.msk.bf16.mxu1 %vm371_vm0, %v716_v27  ;;  %v709_v30 = vld [vmem:[%s955_s1 + $0xc8] sm:$0xff]   ;;  %v712_v33 = vld [vmem:[%s956_s0 + $0x20] ss:$16 sps:$4 sm:$0xff]  }
   0xc   :  { %643 = vmatpush3.bf16.msra.mxu0 %v689_v9  ;;  %455 = vmatprep.subr.bf16.mxu1 %v732_v0  ;;  %v85_v31 = vld [vmem:[%s957_s2] sm:$0xff]  ;;  %v86_v35 = vld [vmem:[%s957_s2 + $0x8] sm:$0xff]  ;;  %v88_v37 = vld [vmem:[%s957_s2 + $0x18] sm:$0xff] }
   0xd   :  { %644 = vmatprep.subr.bf16.mxu0 %v690_v10  ;;  %95 = vperm.xlu0 %679, %v85_v31   ;;  %v713_v34 = vld [vmem:[%s955_s1 + $0xc0] sm:$0xff]   ;;  %v720_v39 = vld [vmem:[%s956_s0 + $0x2c] ss:$16 sps:$4 sm:$0xff]   ;;  %v91_v43 = vld [vmem:[%s957_s2 + $0x30] sm:$0xff] }
   0xe   :  { %v717_v36 = vld [vmem:[%s956_s0 + $0x44] ss:$16 sps:$4 sm:$0xff]   ;;  %110 = vperm.xlu1 %680, %v88_v37   ;;  %v90_v41 = vld [vmem:[%s957_s2 + $0x28] sm:$0xff]  ;;  %v719_v42 = vld [vmem:[%s956_s0 + $0x40] ss:$16 sps:$4 sm:$0xff]  }
   0xf   :  { %456 = vmatpush1.bf16.msra.mxu1 %v691_v11  ;;  %v89_v40 = vld [vmem:[%s957_s2 + $0x20] sm:$0xff]  ;;  %v92_v45 = vld [vmem:[%s957_s2 + $0x38] sm:$0xff] }
  0x10   :  { %645 = vmatpush3.bf16.msra.mxu0 %v692_v12  ;;  %457 = vmatprep.subr.bf16.mxu1 %v732_v0  ;;  %v723_v44 = vld [vmem:[%s956_s0 + $0x64] ss:$16 sps:$4 sm:$0xff]   ;;  %v722_v46 = vld [vmem:[%s956_s0 + $0x28] ss:$16 sps:$4 sm:$0xff]   ;;  %v726_v47 = vld [vmem:[%s956_s0 + $0x4c] ss:$16 sps:$4 sm:$0xff]  }
  0x11   :  { %646 = vmatprep.subr.bf16.mxu0 %v693_v13  ;;  %100 = vperm.xlu0 %679, %v86_v35   ;;  %v725_v48 = vld [vmem:[%s956_s0 + $0x60] ss:$16 sps:$4 sm:$0xff]   ;;  %v728_v49 = vld [vmem:[%s956_s0 + $0x48] ss:$16 sps:$4 sm:$0xff]   ;;  %v729_v50 = vld [vmem:[%s956_s0 + $0x6c] ss:$16 sps:$4 sm:$0xff]  }
  0x12   :  { %120 = vperm.xlu1 %680, %v90_v41   ;;  %v731_v51 = vld [vmem:[%s956_s0 + $0x68] ss:$16 sps:$4 sm:$0xff]  }
  0x13   :  { %458 = vmatpush1.bf16.msra.mxu1 %v694_v14 }
  0x14   :  { %647 = vmatpush3.bf16.msra.mxu0 %v695_v15  ;;  %459 = vmatprep.subr.bf16.mxu1 %v732_v0 }
  0x15   :  { %648 = vmatprep.subr.bf16.mxu0 %v696_v16  ;;  %115 = vperm.xlu0 %679, %v89_v40  }
  0x16   :  { %130 = vperm.xlu1 %680, %v92_v45  }
  0x17   :  { %460 = vmatpush1.bf16.msra.mxu1 %v697_v17 }
  0x18   :  { %649 = vmatpush3.bf16.msra.mxu0 %v698_v18  ;;  %461 = vmatprep.subr.bf16.mxu1 %v732_v0 }
  0x19   :  { %650 = vmatprep.subr.bf16.mxu0 %v699_v19  ;;  %125 = vperm.xlu0 %679, %v91_v43  }
  0x1b   :  { %462 = vmatpush1.bf16.msra.mxu1 %v700_v20 }
  0x1c   :  { %651 = vmatpush3.bf16.msra.mxu0 %v701_v21  ;;  %463 = vmatprep.subr.bf16.mxu1 %v732_v0 }
  0x1d   :  { %652 = vmatprep.subr.bf16.mxu0 %v702_v22 }
  0x1f   :  { %464 = vmatpush1.bf16.msra.mxu1 %v703_v24 }
  0x20   :  { %653 = vmatpush3.bf16.msra.mxu0 %v704_v25  ;;  %475 = vmatprep.subr.bf16.mxu1 %v732_v0 }
  0x23   :  { %417 = vmatmul.mubr.bf16.vlgmr.msra.gmra.mxu0 %v705_v26  ;;  %476 = vmatpush2.bf16.msra.mxu1 %v708_v28 }
  0x24   :  { %477 = vmatprep.subr.bf16.mxu1 %v732_v0  ;;  %424 = vmatprep.mubr.bf16.mxu0 %v710_v29 }
  0x27   :  { %478 = vmatpush2.bf16.msra.mxu1 %v709_v30 }
  0x28   :  { %479 = vmatprep.subr.bf16.mxu1 %v732_v0 }
  0x2b   :  { %425 = vmatmul.mubr.bf16.gmra.mxu0 %v712_v33  ;;  %480 = vmatpush2.bf16.msra.mxu1 %v713_v34 }
  0x2c   :  { %432 = vmatprep.mubr.bf16.mxu0 %v717_v36 }
  0x2e   :  { %482 = vmatmul.mubr.bf16.vlgmr.msra.gmra.mxu1 %v714_v38 }
  0x2f   :  { %619 = vmatprep.mubr.msk.bf16.mxu1 %vm371_vm0, %v720_v39 }
  0x33   :  { %433 = vmatmul.mubr.bf16.gmra.mxu0 %v719_v42 }
  0x34   :  { %440 = vmatprep.mubr.bf16.mxu0 %v723_v44 }
  0x36   :  { %490 = vmatmul.mubr.bf16.gmra.mxu1 %v722_v46 }
  0x37   :  { %620 = vmatprep.mubr.msk.bf16.mxu1 %vm371_vm0, %v726_v47 }
  0x3b   :  { %441 = vmatmul.mubr.bf16.gmra.mxu0 %v725_v48 }
  0x3e   :  { %498 = vmatmul.mubr.bf16.gmra.mxu1 %v728_v49 }
  0x3f   :  { %621 = vmatprep.mubr.msk.bf16.mxu1 %vm371_vm0, %v729_v50 }
  0x46   :  { %506 = vmatmul.mubr.bf16.gmra.mxu1 %v731_v51 }
  0x85   :  { %v106_v2 = vpop.permute.xlu1 %105 }
  0x88   :  { %v96_v55 = vpop.permute.xlu0 %95 }
  0x89   :  { %v111_v18 = vpop.permute.xlu1 %110 }
  0x8c   :  { %v101_v62 = vpop.permute.xlu0 %100 }
  0x8d   :  { %v121_v44 = vpop.permute.xlu1 %120 }
  0x90   :  { %v116_v33 = vpop.permute.xlu0 %115 }
  0xe3   :  { %v654_v52 = vpop.f32.mrf.mxu0 }
  0xe5   :  { %v655_v53 = vpop.f32.mrf.mxu0 }
  0xe6   :  { %v656_v56 = vadd.f32 %v655_v53, %v654_v52 }
  0xe7   :  { %v657_v54 = vpop.f32.mrf.mxu0 }
  0xe8   :  { %v419_v59 = vadd.f32 %v656_v56, %v96_v55 }
  0xe9   :  { %v658_v57 = vpop.f32.mrf.mxu0 }
  0xea   :  { %v659_v60 = vadd.f32 %v658_v57, %v657_v54  ;;  %v126_v54 = vpop.permute.xlu0 %125 }
  0xeb   :  { %v660_v58 = vpop.f32.mrf.mxu0 }
  0xec   :  { %v422_v4 = vadd.f32 %v659_v60, %v101_v62 }
  0xed   :  { %v661_v61 = vpop.f32.mrf.mxu0 }
  0xee   :  { %v483_v63 = vpop.f32.mrf.mxu1  ;;  %v662_v5 = vadd.f32 %v661_v61, %v660_v58 }
  0xef   :  { %v484_v0 = vadd.f32 %v483_v63, %v419_v59  ;;  %v663_v1 = vpop.f32.mrf.mxu0  ;;  %v131_v63 = vpop.permute.xlu1 %130 }
  0xf0   :  { %v485_v3 = vpop.f32.mrf.mxu1  ;;  %v427_v14 = vadd.f32 %v662_v5, %v106_v2 }
  0xf1   :  { %v514_v6 = vmul.f32 0.01, %v484_v0  ;;  %v664_v7 = vpop.f32.mrf.mxu0 }
  0xf2   :  { %v486_v8 = vpop.f32.mrf.mxu1  ;;  %v665_v15 = vadd.f32 %v664_v7, %v663_v1 }
  0xf3   :  { %v522_v9 = vmax.f32 %v484_v0, %v514_v6  ;;  %v487_v10 = vadd.f32 %v486_v8, %v422_v4  ;;  %v666_v11 = vpop.f32.mrf.mxu0 }
  0xf4   :  { %v488_v12 = vpop.f32.mrf.mxu1  ;;  %v430_v25 = vadd.f32 %v665_v15, %v111_v18 }
  0xf5   :  { %v630_v13 = vpack.c.bf16 %v522_v9, %v522_v9  ;;  %v515_v16 = vmul.f32 0.01, %v487_v10  ;;  %v667_v17 = vpop.f32.mrf.mxu0 }
  0xf6   :  { %v491_v19 = vpop.f32.mrf.mxu1  ;;  %v668_v26 = vadd.f32 %v667_v17, %v666_v11 }
  0xf7   :  { %563 = vst.msk [vmem:[%s958_s3] sm:$0xf] %vm562_vm1, %v630_v13  ;;  %v523_v20 = vmax.f32 %v487_v10, %v515_v16  ;;  %v492_v21 = vadd.f32 %v491_v19, %v427_v14  ;;  %v669_v22 = vpop.f32.mrf.mxu0 }
  0xf8   :  { %v493_v23 = vpop.f32.mrf.mxu1  ;;  %v435_v36 = vadd.f32 %v668_v26, %v116_v33 }
  0xf9   :  { %v631_v24 = vpack.c.bf16 %v523_v20, %v523_v20  ;;  %v516_v27 = vmul.f32 0.01, %v492_v21  ;;  %v670_v28 = vpop.f32.mrf.mxu0 }
  0xfa   :  { %v494_v29 = vpop.f32.mrf.mxu1  ;;  %v671_v37 = vadd.f32 %v670_v28, %v669_v22 }
  0xfb   :  { %564 = vst.msk [vmem:[%s958_s3 + $0x4] sm:$0xf] %vm562_vm1, %v631_v24  ;;  %v524_v30 = vmax.f32 %v492_v21, %v516_v27  ;;  %v495_v31 = vadd.f32 %v494_v29, %v430_v25  ;;  %v672_v32 = vpop.f32.mrf.mxu0 }
  0xfc   :  { %v496_v34 = vpop.f32.mrf.mxu1  ;;  %v438_v49 = vadd.f32 %v671_v37, %v121_v44 }
  0xfd   :  { %v632_v35 = vpack.c.bf16 %v524_v30, %v524_v30  ;;  %v517_v38 = vmul.f32 0.01, %v495_v31  ;;  %v673_v39 = vpop.f32.mrf.mxu0 }
  0xfe   :  { %v499_v40 = vpop.f32.mrf.mxu1  ;;  %v674_v47 = vadd.f32 %v673_v39, %v672_v32 }
  0xff   :  { %565 = vst.msk [vmem:[%s958_s3 + $0x8] sm:$0xf] %vm562_vm1, %v632_v35  ;;  %v525_v41 = vmax.f32 %v495_v31, %v517_v38  ;;  %v500_v42 = vadd.f32 %v499_v40, %v435_v36  ;;  %v675_v43 = vpop.f32.mrf.mxu0 }
 0x100   :  { %v501_v45 = vpop.f32.mrf.mxu1  ;;  %v443_v59 = vadd.f32 %v674_v47, %v126_v54 }
 0x101   :  { %v633_v46 = vpack.c.bf16 %v525_v41, %v525_v41  ;;  %v518_v48 = vmul.f32 0.01, %v500_v42  ;;  %v676_v50 = vpop.f32.mrf.mxu0 }
 0x102   :  { %v502_v51 = vpop.f32.mrf.mxu1  ;;  %v677_v57 = vadd.f32 %v676_v50, %v675_v43 }
 0x103   :  { %566 = vst.msk [vmem:[%s958_s3 + $0xc] sm:$0xf] %vm562_vm1, %v633_v46  ;;  %v526_v52 = vmax.f32 %v500_v42, %v518_v48  ;;  %v503_v53 = vadd.f32 %v502_v51, %v438_v49 }
 0x104   :  { %v504_v55 = vpop.f32.mrf.mxu1  ;;  %v446_v3 = vadd.f32 %v677_v57, %v131_v63 }
 0x105   :  { %v634_v56 = vpack.c.bf16 %v526_v52, %v526_v52  ;;  %v519_v58 = vmul.f32 0.01, %v503_v53 }
 0x106   :  { %v507_v60 = vpop.f32.mrf.mxu1 }
 0x107   :  { %567 = vst.msk [vmem:[%s958_s3 + $0x10] sm:$0xf] %vm562_vm1, %v634_v56  ;;  %v527_v61 = vmax.f32 %v503_v53, %v519_v58  ;;  %v508_v62 = vadd.f32 %v507_v60, %v443_v59 }
 0x108   :  { %v509_v0 = vpop.f32.mrf.mxu1 }
 0x109   :  { %v635_v1 = vpack.c.bf16 %v527_v61, %v527_v61  ;;  %v520_v2 = vmul.f32 0.01, %v508_v62 }
 0x10a   :  { %v510_v4 = vpop.f32.mrf.mxu1 }
 0x10b   :  { %568 = vst.msk [vmem:[%s958_s3 + $0x14] sm:$0xf] %vm562_vm1, %v635_v1  ;;  %v528_v5 = vmax.f32 %v508_v62, %v520_v2  ;;  %v511_v6 = vadd.f32 %v510_v4, %v446_v3 }
 0x10c   :  { %v512_v7 = vpop.f32.mrf.mxu1 }
 0x10d   :  { %v636_v8 = vpack.c.bf16 %v528_v5, %v528_v5  ;;  %v521_v9 = vmul.f32 0.01, %v511_v6 }
 0x10f   :  { %569 = vst.msk [vmem:[%s958_s3 + $0x18] sm:$0xf] %vm562_vm1, %v636_v8  ;;  %v529_v10 = vmax.f32 %v511_v6, %v521_v9 }
 0x111   :  { %v637_v11 = vpack.c.bf16 %v529_v10, %v529_v10 }
 0x113   :  { %570 = vst.msk [vmem:[%s958_s3 + $0x1c] sm:$0xf] %vm562_vm1, %v637_v11 }

// kernel: hourglass2_forward.41
= control target key start
LH: loop header
LB: loop body
LE: loop exit
PB: predicated region body
PF: predicated region fallthrough
CT: control target
= control target key end

     0   :  { %vm34_vm0 = vcmask 1043456   ;;  %v178_v2 = vmov 0   ;;  %vm30_vm1 = vcmask 64512   ;;  %s231_s3 = inlined_call_operand.vmem [shape: bf16[8,256], index: 3, kind: input, shape index: {}]   ;;  %s232_s1 = inlined_call_operand.vmem [shape: bf16[8,256], index: 1, kind: input, shape index: {}]   ;;  %s233_s4 = inlined_call_operand.vmem [shape: f32[8,1], index: 4, kind: input, shape index: {}]   ;;  %s234_s2 = inlined_call_operand.vmem [shape: bf16[8,8], index: 2, kind: input, shape index: {}]   ;;  %s235_s0 = inlined_call_operand.vmem [shape: bf16[8,8], index: 0, kind: input, shape index: {}]   ;;  %s236_s5 = inlined_call_operand.vmem [shape: bf16[8,256], index: 5, kind: output, shape index: {}]  }
   0x1   :  { %v24_v0 = vld [vmem:[%s231_s3] sm:$0xff]  ;;  %73 = vmatprep.mubr.bf16.mxu0 %v178_v2  ;;  %128 = vmatprep.mubr.bf16.mxu1 %v178_v2 }
   0x2   :  { %v22_v1 = vld [vmem:[%s232_s1] sm:$0xff]  ;;  %v163_v3 = vcombine.high %v24_v0, %v24_v0  ;;  %v162_v5 = vcombine.low %v24_v0, %v24_v0  ;;  %173 = vset.pattern.permute.xlu0 %v178_v2 }
   0x3   :  { %v167_v4 = vcombine.high %v22_v1, %v22_v1  ;;  %v166_v6 = vcombine.low %v22_v1, %v22_v1  ;;  %v137_v7 = vld [vmem:[%s233_s4] sm:$0xff] }
   0x4   :  { %140 = vperm.xlu0 %173, %v137_v7   ;;  %164 = vmatprep.subr.msk.bf16.mxu0 %vm34_vm0, %v163_v3  ;;  %v36_v8 = vsel %vm34_vm0, %v162_v5, 0  ;;  %v23_v10 = vld [vmem:[%s234_s2] sm:$0xf] }
   0x5   :  { %168 = vmatprep.subr.msk.bf16.mxu1 %vm34_vm0, %v167_v4  ;;  %v91_v9 = vsel %vm34_vm0, %v166_v6, 0  ;;  %56 = vmatpush1.bf16.msra.mxu0 %v36_v8  ;;  %v21_v11 = vld [vmem:[%s235_s0] sm:$0xf] }
   0x6   :  { %111 = vmatpush1.bf16.msra.mxu1 %v91_v9 }
   0x8   :  { %165 = vmatmul.mubr.msk.bf16.vlgmr.msra.gmra.mxu0 %vm30_vm1, %v23_v10 }
   0x9   :  { %169 = vmatmul.mubr.msk.bf16.vlgmr.msra.gmra.mxu1 %vm30_vm1, %v21_v11 }
  0x7f   :  { %v141_v12 = vpop.permute.xlu0 %140 }
  0xc8   :  { %v75_v13 = vpop.f32.mrf.mxu0 }
  0xc9   :  { %v130_v14 = vpop.f32.mrf.mxu1 }
  0xca   :  { %v131_v15 = vadd.f32 %v130_v14, %v75_v13  ;;  %v77_v16 = vpop.f32.mrf.mxu0 }
  0xcb   :  { %v132_v17 = vpop.f32.mrf.mxu1 }
  0xcc   :  { %v143_v18 = vadd.f32 %v141_v12, %v131_v15  ;;  %v133_v19 = vadd.f32 %v132_v17, %v77_v16  ;;  %v79_v20 = vpop.f32.mrf.mxu0 }
  0xcd   :  { %v134_v21 = vpop.f32.mrf.mxu1 }
  0xce   :  { %v145_v22 = vmul.f32 0.01, %v143_v18  ;;  %v144_v23 = vadd.f32 %v141_v12, %v133_v19  ;;  %v80_v24 = vpop.f32.mrf.mxu0 }
  0xcf   :  { %v135_v25 = vpop.f32.mrf.mxu1 }
  0xd0   :  { %v146_v26 = vmul.f32 0.01, %v144_v23  ;;  %v147_v27 = vmax.f32 %v143_v18, %v145_v22 }
  0xd2   :  { %v148_v28 = vmax.f32 %v144_v23, %v146_v26 }
  0xd4   :  { %v171_v29 = vpack.c.bf16 %v148_v28, %v147_v27 }
  0xd6   :  { %157 = vst [vmem:[%s236_s5] sm:$0xff] %v171_v29 }

// kernel: hourglass2_forward.45
= control target key start
LH: loop header
LB: loop body
LE: loop exit
PB: predicated region body
PF: predicated region fallthrough
CT: control target
= control target key end

     0   :  { %vm80_vm0 = vcmask 1043456   ;;  %v175_v1 = vmov 0   ;;  %vm76_vm1 = vcmask 588800   ;;  %s232_s1 = inlined_call_operand.vmem [shape: bf16[72,256], index: 1, kind: input, shape index: {}]   ;;  %s233_s2 = inlined_call_operand.vmem [shape: f32[8,1], index: 2, kind: input, shape index: {}]   ;;  %s234_s0 = inlined_call_operand.vmem [shape: bf16[8,72], index: 0, kind: input, shape index: {}]   ;;  %s235_s3 = inlined_call_operand.vmem [shape: bf16[8,256], index: 3, kind: output, shape index: {}]  }
   0x1   :  { %v24_v0 = vld [vmem:[%s232_s1 + $0x40] sm:$0xff]  ;;  %119 = vmatprep.mubr.bf16.mxu0 %v175_v1  ;;  %160 = vset.pattern.permute.xlu0 %v175_v1  ;;  %v163_v4 = vld [vmem:[%s232_s1 + $0x34] ss:$8 sps:$4 sm:$0xff]   ;;  %v165_v6 = vld [vmem:[%s232_s1 + $0x30] ss:$8 sps:$4 sm:$0xff]  }
   0x2   :  { %v154_v2 = vcombine.high %v24_v0, %v24_v0  ;;  %v153_v3 = vcombine.low %v24_v0, %v24_v0  ;;  %v166_v7 = vld [vmem:[%s232_s1 + $0x24] ss:$8 sps:$4 sm:$0xff]   ;;  %v168_v9 = vld [vmem:[%s232_s1 + $0x20] ss:$8 sps:$4 sm:$0xff]   ;;  %v169_v10 = vld [vmem:[%s232_s1 + $0x14] ss:$8 sps:$4 sm:$0xff]  }
   0x3   :  { %v25_v8 = vld [vmem:[%s233_s2] sm:$0xff]  ;;  %v171_v11 = vld [vmem:[%s232_s1 + $0x10] ss:$8 sps:$4 sm:$0xff]  }
   0x4   :  { %155 = vmatprep.subr.msk.bf16.mxu0 %vm80_vm0, %v154_v2  ;;  %v82_v5 = vsel %vm80_vm0, %v153_v3, 0  ;;  %28 = vperm.xlu0 %160, %v25_v8   ;;  %v172_v12 = vld [vmem:[%s232_s1 + $0x4] ss:$8 sps:$4 sm:$0xff]   ;;  %v174_v13 = vld [vmem:[%s232_s1] ss:$8 sps:$4 sm:$0xff]  }
   0x5   :  { %94 = vmatpush1.bf16.msra.mxu0 %v82_v5  ;;  %v15_v14 = vld [vmem:[%s234_s0] sm:$0xf] }
   0x6   :  { %95 = vmatprep.subr.bf16.mxu0 %v163_v4 }
   0x9   :  { %96 = vmatpush1.bf16.msra.mxu0 %v165_v6 }
   0xa   :  { %97 = vmatprep.subr.bf16.mxu0 %v166_v7 }
   0xd   :  { %98 = vmatpush1.bf16.msra.mxu0 %v168_v9 }
   0xe   :  { %99 = vmatprep.subr.bf16.mxu0 %v169_v10 }
  0x11   :  { %100 = vmatpush1.bf16.msra.mxu0 %v171_v11 }
  0x12   :  { %101 = vmatprep.subr.bf16.mxu0 %v172_v12 }
  0x15   :  { %102 = vmatpush1.bf16.msra.mxu0 %v174_v13 }
  0x18   :  { %156 = vmatmul.mubr.msk.bf16.vlgmr.msra.gmra.mxu0 %vm76_vm1, %v15_v14 }
  0x7f   :  { %v29_v15 = vpop.permute.xlu0 %28 }
  0xd8   :  { %v121_v16 = vpop.f32.mrf.mxu0 }
  0xd9   :  { %v122_v17 = vadd.f32 %v121_v16, %v29_v15 }
  0xda   :  { %v123_v18 = vpop.f32.mrf.mxu0 }
  0xdb   :  { %v128_v19 = vmul.f32 0.01, %v122_v17  ;;  %v124_v20 = vadd.f32 %v123_v18, %v29_v15 }
  0xdc   :  { %v125_v21 = vpop.f32.mrf.mxu0 }
  0xdd   :  { %v129_v22 = vmul.f32 0.01, %v124_v20  ;;  %v130_v24 = vmax.f32 %v122_v17, %v128_v19 }
  0xde   :  { %v126_v23 = vpop.f32.mrf.mxu0 }
  0xdf   :  { %v131_v25 = vmax.f32 %v124_v20, %v129_v22 }
  0xe1   :  { %v158_v26 = vpack.c.bf16 %v131_v25, %v130_v24 }
  0xe3   :  { %140 = vst [vmem:[%s235_s3] sm:$0xff] %v158_v26 }

// kernel: hourglass2_forward.44
= control target key start
LH: loop header
LB: loop body
LE: loop exit
PB: predicated region body
PF: predicated region fallthrough
CT: control target
= control target key end

     0   :  { %vm86_vm0 = vcmask 1043456   ;;  %v239_v1 = vmov 0   ;;  %vm82_vm1 = vcmask 588800   ;;  %vm143_vm2 = vcmask 64512   ;;  %s319_s1 = inlined_call_operand.vmem [shape: bf16[72,256], index: 1, kind: input, shape index: {}]   ;;  %s320_s2 = inlined_call_operand.vmem [shape: f32[8,1], index: 2, kind: input, shape index: {}]   ;;  %s321_s0 = inlined_call_operand.vmem [shape: bf16[8,72], index: 0, kind: input, shape index: {}]   ;;  %s322_s3 = inlined_call_operand.vmem [shape: bf16[8,8], index: 3, kind: input, shape index: {}]   ;;  %s323_s4 = inlined_call_operand.vmem [shape: f32[8,256], index: 4, kind: input, shape index: {}]   ;;  %s324_s5 = inlined_call_operand.vmem [shape: bf16[8,256], index: 5, kind: output, shape index: {}]  }
   0x1   :  { %v30_v0 = vld [vmem:[%s319_s1 + $0x40] sm:$0xff]  ;;  %125 = vmatprep.mubr.bf16.mxu0 %v239_v1  ;;  %224 = vset.pattern.permute.xlu0 %v239_v1  ;;  %v227_v4 = vld [vmem:[%s319_s1 + $0x34] ss:$8 sps:$4 sm:$0xff]   ;;  %v229_v6 = vld [vmem:[%s319_s1 + $0x30] ss:$8 sps:$4 sm:$0xff]  }
   0x2   :  { %v216_v2 = vcombine.high %v30_v0, %v30_v0  ;;  %v215_v3 = vcombine.low %v30_v0, %v30_v0  ;;  %185 = vmatprep.mubr.bf16.mxu1 %v239_v1  ;;  %v230_v7 = vld [vmem:[%s319_s1 + $0x24] ss:$8 sps:$4 sm:$0xff]   ;;  %v232_v9 = vld [vmem:[%s319_s1 + $0x20] ss:$8 sps:$4 sm:$0xff]   ;;  %v233_v10 = vld [vmem:[%s319_s1 + $0x14] ss:$8 sps:$4 sm:$0xff]  }
   0x3   :  { %v31_v8 = vld [vmem:[%s320_s2] sm:$0xff]  ;;  %v235_v11 = vld [vmem:[%s319_s1 + $0x10] ss:$8 sps:$4 sm:$0xff]   ;;  %v142_v32 = vld [vmem:[%s323_s4 + $0x8] sm:$0xff] }
   0x4   :  { %217 = vmatprep.subr.msk.bf16.mxu0 %vm86_vm0, %v216_v2  ;;  %v88_v5 = vsel %vm86_vm0, %v215_v3, 0  ;;  %34 = vperm.xlu0 %224, %v31_v8   ;;  %v236_v12 = vld [vmem:[%s319_s1 + $0x4] ss:$8 sps:$4 sm:$0xff]   ;;  %v238_v13 = vld [vmem:[%s319_s1] ss:$8 sps:$4 sm:$0xff]  }
   0x5   :  { %100 = vmatpush1.bf16.msra.mxu0 %v88_v5  ;;  %v21_v14 = vld [vmem:[%s321_s0] sm:$0xf] }
   0x6   :  { %101 = vmatprep.subr.bf16.mxu0 %v227_v4  ;;  %v138_v29 = vld [vmem:[%s322_s3] sm:$0xf] }
   0x7   :  { %v141_v30 = vld [vmem:[%s323_s4] sm:$0xff] }
   0x9   :  { %102 = vmatpush1.bf16.msra.mxu0 %v229_v6 }
   0xa   :  { %103 = vmatprep.subr.bf16.mxu0 %v230_v7 }
   0xd   :  { %104 = vmatpush1.bf16.msra.mxu0 %v232_v9 }
   0xe   :  { %105 = vmatprep.subr.bf16.mxu0 %v233_v10 }
  0x11   :  { %106 = vmatpush1.bf16.msra.mxu0 %v235_v11 }
  0x12   :  { %107 = vmatprep.subr.bf16.mxu0 %v236_v12 }
  0x15   :  { %108 = vmatpush1.bf16.msra.mxu0 %v238_v13 }
  0x18   :  { %218 = vmatmul.mubr.msk.bf16.vlgmr.msra.gmra.mxu0 %vm82_vm1, %v21_v14 }
  0x7f   :  { %v35_v15 = vpop.permute.xlu0 %34 }
  0xd8   :  { %v127_v16 = vpop.f32.mrf.mxu0 }
  0xd9   :  { %v128_v17 = vadd.f32 %v127_v16, %v35_v15 }
  0xda   :  { %v129_v18 = vpop.f32.mrf.mxu0 }
  0xdb   :  { %v134_v19 = vmul.f32 0.01, %v128_v17  ;;  %v130_v20 = vadd.f32 %v129_v18, %v35_v15 }
  0xdc   :  { %v131_v21 = vpop.f32.mrf.mxu0 }
  0xdd   :  { %v136_v22 = vmax.f32 %v128_v17, %v134_v19  ;;  %v135_v23 = vmul.f32 0.01, %v130_v20 }
  0xde   :  { %v132_v24 = vpop.f32.mrf.mxu0 }
  0xdf   :  { %v137_v25 = vmax.f32 %v130_v20, %v135_v23  ;;  %v139_v26 = vpack.c.bf16 %v136_v22, %v136_v22 }
  0xe1   :  { %v140_v27 = vpack.c.bf16 %v137_v25, %v137_v25  ;;  %v148_v28 = vsel %vm86_vm0, %v139_v26, 0 }
  0xe3   :  { %219 = vmatprep.subr.msk.bf16.mxu1 %vm86_vm0, %v140_v27 }
  0xe4   :  { %168 = vmatpush1.bf16.msra.mxu1 %v148_v28 }
  0xe7   :  { %220 = vmatmul.mubr.msk.bf16.vlgmr.msra.gmra.mxu1 %vm143_vm2, %v138_v29 }
 0x1a7   :  { %v187_v31 = vpop.f32.mrf.mxu1 }
 0x1a8   :  { %v188_v34 = vadd.f32 %v187_v31, %v141_v30 }
 0x1a9   :  { %v189_v33 = vpop.f32.mrf.mxu1 }
 0x1aa   :  { %v190_v35 = vadd.f32 %v189_v33, %v142_v32 }
 0x1ab   :  { %v191_v36 = vpop.f32.mrf.mxu1 }
 0x1ac   :  { %v222_v37 = vpack.c.bf16 %v190_v35, %v188_v34 }
 0x1ad   :  { %v192_v38 = vpop.f32.mrf.mxu1 }
 0x1ae   :  { %202 = vst [vmem:[%s324_s5] sm:$0xff] %v222_v37 }

// kernel: hourglass2_forward.46
= control target key start
LH: loop header
LB: loop body
LE: loop exit
PB: predicated region body
PF: predicated region fallthrough
CT: control target
= control target key end

     0   :  { %vm86_vm0 = vcmask 1043456   ;;  %v240_v1 = vmov 0   ;;  %vm82_vm1 = vcmask 588800   ;;  %vm144_vm2 = vcmask 64512   ;;  %s317_s1 = inlined_call_operand.vmem [shape: bf16[72,256], index: 1, kind: input, shape index: {}]   ;;  %s318_s2 = inlined_call_operand.vmem [shape: f32[8,1], index: 2, kind: input, shape index: {}]   ;;  %s319_s0 = inlined_call_operand.vmem [shape: bf16[8,72], index: 0, kind: input, shape index: {}]   ;;  %s320_s3 = inlined_call_operand.vmem [shape: bf16[8,8], index: 3, kind: input, shape index: {}]   ;;  %s321_s4 = inlined_call_operand.vmem [shape: bf16[8,256], index: 4, kind: input, shape index: {}]   ;;  %s322_s5 = inlined_call_operand.vmem [shape: bf16[8,256], index: 5, kind: output, shape index: {}]  }
   0x1   :  { %v30_v0 = vld [vmem:[%s317_s1 + $0x40] sm:$0xff]  ;;  %125 = vmatprep.mubr.bf16.mxu0 %v240_v1  ;;  %225 = vset.pattern.permute.xlu0 %v240_v1  ;;  %v228_v4 = vld [vmem:[%s317_s1 + $0x34] ss:$8 sps:$4 sm:$0xff]   ;;  %v230_v6 = vld [vmem:[%s317_s1 + $0x30] ss:$8 sps:$4 sm:$0xff]  }
   0x2   :  { %v217_v2 = vcombine.high %v30_v0, %v30_v0  ;;  %v216_v3 = vcombine.low %v30_v0, %v30_v0  ;;  %186 = vmatprep.mubr.bf16.mxu1 %v240_v1  ;;  %v231_v7 = vld [vmem:[%s317_s1 + $0x24] ss:$8 sps:$4 sm:$0xff]   ;;  %v233_v9 = vld [vmem:[%s317_s1 + $0x20] ss:$8 sps:$4 sm:$0xff]   ;;  %v234_v10 = vld [vmem:[%s317_s1 + $0x14] ss:$8 sps:$4 sm:$0xff]  }
   0x3   :  { %v31_v8 = vld [vmem:[%s318_s2] sm:$0xff]  ;;  %v236_v11 = vld [vmem:[%s317_s1 + $0x10] ss:$8 sps:$4 sm:$0xff]  }
   0x4   :  { %218 = vmatprep.subr.msk.bf16.mxu0 %vm86_vm0, %v217_v2  ;;  %v88_v5 = vsel %vm86_vm0, %v216_v3, 0  ;;  %34 = vperm.xlu0 %225, %v31_v8   ;;  %v237_v12 = vld [vmem:[%s317_s1 + $0x4] ss:$8 sps:$4 sm:$0xff]   ;;  %v239_v13 = vld [vmem:[%s317_s1] ss:$8 sps:$4 sm:$0xff]  }
   0x5   :  { %100 = vmatpush1.bf16.msra.mxu0 %v88_v5  ;;  %v21_v14 = vld [vmem:[%s319_s0] sm:$0xf] }
   0x6   :  { %101 = vmatprep.subr.bf16.mxu0 %v228_v4  ;;  %v138_v29 = vld [vmem:[%s320_s3] sm:$0xf] }
   0x7   :  { %v141_v30 = vld [vmem:[%s321_s4] sm:$0xff] }
   0x8   :  { %v142_v31 = vunpack.c.l.bf16 %v141_v30  ;;  %v143_v32 = vunpack.c.h.bf16 %v141_v30 }
   0x9   :  { %102 = vmatpush1.bf16.msra.mxu0 %v230_v6 }
   0xa   :  { %103 = vmatprep.subr.bf16.mxu0 %v231_v7 }
   0xd   :  { %104 = vmatpush1.bf16.msra.mxu0 %v233_v9 }
   0xe   :  { %105 = vmatprep.subr.bf16.mxu0 %v234_v10 }
  0x11   :  { %106 = vmatpush1.bf16.msra.mxu0 %v236_v11 }
  0x12   :  { %107 = vmatprep.subr.bf16.mxu0 %v237_v12 }
  0x15   :  { %108 = vmatpush1.bf16.msra.mxu0 %v239_v13 }
  0x18   :  { %219 = vmatmul.mubr.msk.bf16.vlgmr.msra.gmra.mxu0 %vm82_vm1, %v21_v14 }
  0x7f   :  { %v35_v15 = vpop.permute.xlu0 %34 }
  0xd8   :  { %v127_v16 = vpop.f32.mrf.mxu0 }
  0xd9   :  { %v128_v17 = vadd.f32 %v127_v16, %v35_v15 }
  0xda   :  { %v129_v18 = vpop.f32.mrf.mxu0 }
  0xdb   :  { %v134_v19 = vmul.f32 0.01, %v128_v17  ;;  %v130_v20 = vadd.f32 %v129_v18, %v35_v15 }
  0xdc   :  { %v131_v21 = vpop.f32.mrf.mxu0 }
  0xdd   :  { %v136_v22 = vmax.f32 %v128_v17, %v134_v19  ;;  %v135_v23 = vmul.f32 0.01, %v130_v20 }
  0xde   :  { %v132_v24 = vpop.f32.mrf.mxu0 }
  0xdf   :  { %v137_v25 = vmax.f32 %v130_v20, %v135_v23  ;;  %v139_v26 = vpack.c.bf16 %v136_v22, %v136_v22 }
  0xe1   :  { %v140_v27 = vpack.c.bf16 %v137_v25, %v137_v25  ;;  %v149_v28 = vsel %vm86_vm0, %v139_v26, 0 }
  0xe3   :  { %220 = vmatprep.subr.msk.bf16.mxu1 %vm86_vm0, %v140_v27 }
  0xe4   :  { %169 = vmatpush1.bf16.msra.mxu1 %v149_v28 }
  0xe7   :  { %221 = vmatmul.mubr.msk.bf16.vlgmr.msra.gmra.mxu1 %vm144_vm2, %v138_v29 }
 0x1a7   :  { %v188_v33 = vpop.f32.mrf.mxu1 }
 0x1a8   :  { %v189_v35 = vadd.f32 %v188_v33, %v142_v31 }
 0x1a9   :  { %v190_v34 = vpop.f32.mrf.mxu1 }
 0x1aa   :  { %v191_v36 = vadd.f32 %v190_v34, %v143_v32 }
 0x1ab   :  { %v192_v37 = vpop.f32.mrf.mxu1 }
 0x1ac   :  { %v223_v38 = vpack.c.bf16 %v191_v36, %v189_v35 }
 0x1ad   :  { %v193_v39 = vpop.f32.mrf.mxu1 }
 0x1ae   :  { %203 = vst [vmem:[%s322_s5] sm:$0xff] %v223_v38 }

// kernel: hourglass2_forward.47
= control target key start
LH: loop header
LB: loop body
LE: loop exit
PB: predicated region body
PF: predicated region fallthrough
CT: control target
= control target key end

     0   :  { %v325_v1 = vmov 0   ;;  %vm190_vm0 = vcmask 719872   ;;  %vm194_vm1 = vcmask 1043456   ;;  %s439_s1 = inlined_call_operand.vmem [shape: bf16[216,256], index: 1, kind: input, shape index: {}]   ;;  %s440_s0 = inlined_call_operand.vmem [shape: bf16[8,216], index: 0, kind: input, shape index: {}]   ;;  %s441_s2 = inlined_call_operand.vmem [shape: f32[8,1], index: 2, kind: input, shape index: {}]   ;;  %s442_s3 = inlined_call_operand.vmem [shape: f32[8,256], index: 3, kind: output, shape index: {}]  }
   0x1   :  { %v282_v0 = vld [vmem:[%s439_s1 + $0x74] ss:$8 sps:$4 sm:$0xff]   ;;  %281 = vset.pattern.permute.xlu0 %v325_v1  ;;  %v284_v2 = vld [vmem:[%s439_s1 + $0x70] ss:$8 sps:$4 sm:$0xff]   ;;  %v285_v3 = vld [vmem:[%s439_s1 + $0x64] ss:$8 sps:$4 sm:$0xff]  }
   0x2   :  { %201 = vmatprep.subr.bf16.mxu0 %v282_v0  ;;  %v287_v4 = vld [vmem:[%s439_s1 + $0x60] ss:$8 sps:$4 sm:$0xff]   ;;  %v288_v5 = vld [vmem:[%s439_s1 + $0x54] ss:$8 sps:$4 sm:$0xff]   ;;  %v290_v6 = vld [vmem:[%s439_s1 + $0x50] ss:$8 sps:$4 sm:$0xff]  }
   0x3   :  { %202 = vmatpush1.bf16.msra.mxu0 %v284_v2  ;;  %v291_v7 = vld [vmem:[%s439_s1 + $0x44] ss:$8 sps:$4 sm:$0xff]   ;;  %v293_v8 = vld [vmem:[%s439_s1 + $0x40] ss:$8 sps:$4 sm:$0xff]   ;;  %v294_v9 = vld [vmem:[%s439_s1 + $0x34] ss:$8 sps:$4 sm:$0xff]  }
   0x4   :  { %203 = vmatprep.subr.bf16.mxu0 %v285_v3  ;;  %v296_v10 = vld [vmem:[%s439_s1 + $0x30] ss:$8 sps:$4 sm:$0xff]   ;;  %v297_v11 = vld [vmem:[%s439_s1 + $0x24] ss:$8 sps:$4 sm:$0xff]   ;;  %v299_v15 = vld [vmem:[%s439_s1 + $0x20] ss:$8 sps:$4 sm:$0xff]  }
   0x5   :  { %v15_v12 = vld [vmem:[%s440_s0] sm:$0xff]  ;;  %v300_v16 = vld [vmem:[%s439_s1 + $0x14] ss:$8 sps:$4 sm:$0xff]   ;;  %v302_v17 = vld [vmem:[%s439_s1 + $0x10] ss:$8 sps:$4 sm:$0xff]  }
   0x6   :  { %v249_v13 = vcombine.high %v15_v12, %v15_v12  ;;  %v43_v14 = vld [vmem:[%s441_s2] sm:$0xff]  ;;  %v42_v19 = vld [vmem:[%s439_s1 + $0xd0] sm:$0xff]  ;;  %v248_v34 = vcombine.low %v15_v12, %v15_v12 }
   0x7   :  { %204 = vmatpush1.bf16.msra.mxu0 %v287_v4  ;;  %46 = vperm.xlu0 %281, %v43_v14   ;;  %v303_v18 = vld [vmem:[%s439_s1 + $0x4] ss:$8 sps:$4 sm:$0xff]   ;;  %v305_v20 = vld [vmem:[%s439_s1] ss:$8 sps:$4 sm:$0xff]   ;;  %v277_v21 = vcombine.high %v42_v19, %v42_v19  ;;  %v276_v22 = vcombine.low %v42_v19, %v42_v19  ;;  %v311_v26 = vld [vmem:[%s439_s1 + $0xb4] ss:$8 sps:$4 sm:$0xff]  }
   0x8   :  { %205 = vmatprep.subr.bf16.mxu0 %v288_v5  ;;  %279 = vmatprep.mubr.msk.bf16.mxu0 %vm190_vm0, %v249_v13  ;;  %v308_v24 = vld [vmem:[%s439_s1 + $0xc4] ss:$8 sps:$4 sm:$0xff]   ;;  %v310_v25 = vld [vmem:[%s439_s1 + $0xc0] ss:$8 sps:$4 sm:$0xff]   ;;  %v313_v27 = vld [vmem:[%s439_s1 + $0xb0] ss:$8 sps:$4 sm:$0xff]  }
   0x9   :  { %v196_v23 = vsel %vm194_vm1, %v276_v22, 0  ;;  %v314_v28 = vld [vmem:[%s439_s1 + $0xa4] ss:$8 sps:$4 sm:$0xff]   ;;  %v316_v29 = vld [vmem:[%s439_s1 + $0xa0] ss:$8 sps:$4 sm:$0xff]  }
   0xa   :  { %v317_v30 = vld [vmem:[%s439_s1 + $0x94] ss:$8 sps:$4 sm:$0xff]   ;;  %v319_v31 = vld [vmem:[%s439_s1 + $0x90] ss:$8 sps:$4 sm:$0xff]   ;;  %v320_v32 = vld [vmem:[%s439_s1 + $0x84] ss:$8 sps:$4 sm:$0xff]  }
   0xb   :  { %206 = vmatpush1.bf16.msra.mxu0 %v290_v6  ;;  %v322_v33 = vld [vmem:[%s439_s1 + $0x80] ss:$8 sps:$4 sm:$0xff]  }
   0xc   :  { %207 = vmatprep.subr.bf16.mxu0 %v291_v7 }
   0xf   :  { %208 = vmatpush1.bf16.msra.mxu0 %v293_v8 }
  0x10   :  { %209 = vmatprep.subr.bf16.mxu0 %v294_v9 }
  0x13   :  { %210 = vmatpush1.bf16.msra.mxu0 %v296_v10 }
  0x14   :  { %211 = vmatprep.subr.bf16.mxu0 %v297_v11 }
  0x17   :  { %212 = vmatpush1.bf16.msra.mxu0 %v299_v15 }
  0x18   :  { %213 = vmatprep.subr.bf16.mxu0 %v300_v16 }
  0x1b   :  { %214 = vmatpush1.bf16.msra.mxu0 %v302_v17 }
  0x1c   :  { %215 = vmatprep.subr.bf16.mxu0 %v303_v18 }
  0x1f   :  { %216 = vmatpush1.bf16.msra.mxu0 %v305_v20 }
  0x20   :  { %278 = vmatprep.subr.msk.bf16.mxu0 %vm194_vm1, %v277_v21 }
  0x23   :  { %222 = vmatpush2.bf16.msra.mxu0 %v196_v23 }
  0x24   :  { %223 = vmatprep.subr.bf16.mxu0 %v308_v24 }
  0x27   :  { %224 = vmatpush2.bf16.msra.mxu0 %v310_v25 }
  0x28   :  { %225 = vmatprep.subr.bf16.mxu0 %v311_v26 }
  0x2b   :  { %226 = vmatpush2.bf16.msra.mxu0 %v313_v27 }
  0x2c   :  { %227 = vmatprep.subr.bf16.mxu0 %v314_v28 }
  0x2f   :  { %228 = vmatpush2.bf16.msra.mxu0 %v316_v29 }
  0x30   :  { %229 = vmatprep.subr.bf16.mxu0 %v317_v30 }
  0x33   :  { %230 = vmatpush2.bf16.msra.mxu0 %v319_v31 }
  0x34   :  { %231 = vmatprep.subr.bf16.mxu0 %v320_v32 }
  0x37   :  { %232 = vmatpush2.bf16.msra.mxu0 %v322_v33 }
  0x3a   :  { %234 = vmatmul.mubr.bf16.vlgmr.msra.gmra.mxu0 %v248_v34 }
  0x82   :  { %v47_v35 = vpop.permute.xlu0 %46 }
  0xfa   :  { %v235_v36 = vpop.f32.mrf.mxu0 }
  0xfb   :  { %v236_v37 = vadd.f32 %v235_v36, %v47_v35 }
  0xfc   :  { %v237_v38 = vpop.f32.mrf.mxu0 }
  0xfd   :  { %242 = vst [vmem:[%s442_s3] sm:$0xff] %v236_v37  ;;  %v238_v39 = vadd.f32 %v237_v38, %v47_v35 }
  0xfe   :  { %v239_v40 = vpop.f32.mrf.mxu0 }
  0xff   :  { %243 = vst [vmem:[%s442_s3 + $0x8] sm:$0xff] %v238_v39 }
 0x100   :  { %v240_v41 = vpop.f32.mrf.mxu0 }

</bundles_post_ra>
